<compile_context>
chip_gen: v6e
topology: v6e:2x2x1
jax: 0.10.0
libtpu: 0.0.40
codegen_flags: <defaults>
</compile_context>

<pallas_src>
import math
import numpy as np
import jax
import jax.numpy as jnp
from jax import lax
from jax.experimental import pallas as pl
from jax.experimental.pallas import tpu as pltpu

CONV_LAYERS = (("conv1", 1, 16), ("conv2", 16, 32), ("conv3", 32, 64), ("conv4", 64, 128))


def _round8(n):
    return ((n + 7) // 8) * 8


def build_plan(h, w):
    """Static per-layer geometry for the conv chain (conv 3x3, stride 1, pad 2 + maxpool 2)."""
    plan = []
    hin, win, kin = h, w, h * w
    for name, cin, cout in CONV_LAYERS:
        hc, wc = hin + 2, win + 2            # conv output size
        hp, wp = hc // 2, wc // 2            # maxpool 2x2 stride 2 (floor)
        m8 = _round8(hp * wp)                # pooled positions padded to a sublane multiple
        plan.append(dict(name=name, cin=cin, cout=cout, hin=hin, win=win,
                         kin=kin, hc=hc, wc=wc, hp=hp, wp=wp, m8=m8))
        hin, win, kin = hp, wp, m8
    return plan


# --------------------------- conv1 (cin == 1) constants ---------------------------

def _build_conv1_mats(lay, w, b):
    """Small constant matrices implementing conv1+pool directly from the padded 2-D image.

    Layout of the pre-pool result Z_dx (2*rs, wp*cout):
        Z_dx[dy*rs + i, j*cout + c] = conv1 pre-bias output at (2i+dy, 2j+dx), channel c.
    Then max over (dy, dx), add bias, ReLU, and relayout to (m8, cout) rows = i*wp + j.
    """
    hin, win = lay["hin"], lay["win"]
    hp, wp, m8, cout = lay["hp"], lay["wp"], lay["m8"], lay["cout"]
    hpad, wpad = hin + 4, win + 4
    rs = _round8(hp)                               # sublane-aligned (dy, i) row stride

    # grow[(kh*2+dy)*rs + i, r] = 1  iff  r == 2*i + dy + kh   (row duplication/selection)
    grow = np.zeros((3 * 2 * rs, hpad), np.float32)
    for kh in range(3):
        for dy in range(2):
            for i in range(hp):
                grow[(kh * 2 + dy) * rs + i, 2 * i + dy + kh] = 1.0

    # wm1[kh*2+dx, r, j*cout + c] = w[c, 0, kh, kw]  where kw = r - 2j - dx (if 0<=kw<3)
    wnp = np.asarray(w, np.float32)
    wm1 = np.zeros((6, wpad, wp * cout), np.float32)
    for kh in range(3):
        for dx in range(2):
            for j in range(wp):
                for kw in range(3):
                    r = 2 * j + dx + kw
                    wm1[kh * 2 + dx, r, j * cout:(j + 1) * cout] = wnp[:, 0, kh, kw]

    b1row = np.tile(np.asarray(b, np.float32), wp).reshape(1, wp * cout)

    # Relayout helpers:  A1[p = i*wp + j, c] = A1m[i, j*cout + c]
    gsel = np.zeros((m8, hp), np.float32)
    mask1 = np.zeros((m8, wp * cout), np.float32)
    for p in range(hp * wp):
        i, j = divmod(p, wp)
        gsel[p, i] = 1.0
        mask1[p, j * cout:(j + 1) * cout] = 1.0
    gfold = np.zeros((wp * cout, cout), np.float32)
    for j in range(wp):
        gfold[j * cout:(j + 1) * cout, :] = np.eye(cout, dtype=np.float32)
    return grow, wm1, b1row, gsel, mask1, gfold


# --------------------------- conv2..conv4 gather matrices ---------------------------

def _build_gather(lay):
    """0/1 matrix G of shape (9*4*m8, kin): rows = (tap, pool offset, pooled position)."""
    hin, win, kin = lay["hin"], lay["win"], lay["kin"]
    hp, wp, m8 = lay["hp"], lay["wp"], lay["m8"]
    blk = 4 * m8
    g = np.zeros((9 * blk, kin), np.float32)
    for kh in range(3):
        for kw in range(3):
            t = kh * 3 + kw
            for dy in range(2):
                for dx in range(2):
                    o = dy * 2 + dx
                    for i in range(hp):
                        for j in range(wp):
                            hs = 2 * i + dy + kh - 2
                            ws = 2 * j + dx + kw - 2
                            if 0 <= hs < hin and 0 <= ws < win:
                                g[t * blk + o * m8 + i * wp + j, hs * win + ws] = 1.0
    return g


def prep_params(params, plan, nhid=128):
    """One-time parameter preparation; keeps every transpose/reshape out of the forward."""
    args = []

    # conv1 (direct 2-D path, no big im2col matrix)
    lay1 = plan[0]
    w1c, b1c = params[lay1["name"]]
    grow, wm1, b1row, gsel, mask1, gfold = _build_conv1_mats(lay1, w1c, b1c)
    args += [jnp.asarray(grow), jnp.asarray(wm1), jnp.asarray(b1row),
             jnp.asarray(gsel), jnp.asarray(mask1), jnp.asarray(gfold)]

    # conv2..conv4: gather (bf16, exact 0/1), im2col weight matrix (f32), bias row (f32)
    for lay in plan[1:]:
        w, b = params[lay["name"]]
        cin, cout = lay["cin"], lay["cout"]
        g = jnp.asarray(_build_gather(lay), dtype=jnp.bfloat16)
        wm = jnp.transpose(w, (2, 3, 1, 0)).reshape(9 * cin, cout).astype(jnp.float32)
        args += [g, wm, jnp.asarray(b, jnp.float32).reshape(1, cout)]

    # head
    w1, b1 = params["linear1"]
    w2, b2 = params["linear2"]
    last = plan[-1]
    nspat = last["hp"] * last["wp"]
    clast = last["cout"]
    assert w1.shape == (nhid, clast * nspat), "linear_dim mismatch with conv chain"
    # torch Flatten(start_dim=0) of (C,H,W): feature f = c*nspat + s, s = h*Wp + w.
    w1cat = jnp.transpose(w1.reshape(nhid, clast, nspat), (1, 2, 0)).reshape(clast, nspat * nhid)
    hmask = np.zeros((nspat, nspat * nhid), np.float32)
    for s in range(nspat):
        hmask[s, s * nhid:(s + 1) * nhid] = 1.0
    args += [w1cat.astype(jnp.float32),
             jnp.asarray(b1, jnp.float32).reshape(1, nhid),
             jnp.asarray(hmask),
             jnp.asarray(w2, jnp.float32).reshape(1, nhid),
             jnp.asarray(b2, jnp.float32).reshape(1, 1)]
    return tuple(args)


# --------------------------------- the fused kernel ---------------------------------

def _make_kernel(plan, nhid):
    lay1 = plan[0]
    hp1, wp1, cout1 = lay1["hp"], lay1["wp"], lay1["cout"]
    rs = _round8(hp1)
    n_conv_tail = 3 * (len(plan) - 1)
    nspat = plan[-1]["hp"] * plan[-1]["wp"]

    def kernel(x_ref, grow_ref, wm1_ref, b1row_ref, gsel_ref, mask1_ref, gfold_ref, *rest):
        conv_refs = rest[:n_conv_tail]
        w1cat_ref, b1h_ref, hmask_ref, w2row_ref, b2_ref = rest[n_conv_tail:n_conv_tail + 5]
        o_ref = rest[-1]

        # ---- conv1: direct from the padded 2-D image (no big gather matrix) ----
        xp = x_ref[0]                                                        # (H+4, W+4)
        y = jnp.dot(grow_ref[...], xp, preferred_element_type=jnp.float32)   # (6*rs, W+4)
        zdx = []
        for dx in range(2):
            acc = None
            for kh in range(3):
                ykh = y[(kh * 2) * rs:(kh * 2 + 2) * rs, :]                  # (2*rs, W+4)
                d = jnp.dot(ykh, wm1_ref[kh * 2 + dx],
                            preferred_element_type=jnp.float32)              # (2*rs, wp*cout)
                acc = d if acc is None else acc + d
            zdx.append(acc)
        # 2x2 max-pool = max over (dy row-blocks, dx arrays); bias+ReLU once after the max.
        pm = jnp.maximum(jnp.maximum(zdx[0][0:hp1], zdx[0][rs:rs + hp1]),
                         jnp.maximum(zdx[1][0:hp1], zdx[1][rs:rs + hp1]))    # (hp, wp*cout)
        a1m = jnp.maximum(pm + b1row_ref[...], 0.0)
        # Relayout (i rows, (j,c) lanes) -> (i*wp+j rows, c lanes) with 2 dots + a mask.
        trow = jnp.dot(gsel_ref[...], a1m, preferred_element_type=jnp.float32)   # (m8, wp*cout)
        a = jnp.dot(trow * mask1_ref[...], gfold_ref[...],
                    preferred_element_type=jnp.float32)                      # (m8, cout)

        # ---- conv2..conv4: gather-by-matmul (bf16 gathers), 1 conv matmul per layer ----
        for li, lay in enumerate(plan[1:]):
            g_ref, wm_ref, cb_ref = conv_refs[3 * li: 3 * li + 3]
            m8 = lay["m8"]
            blk = 4 * m8
            g = g_ref[...].astype(jnp.float32)                               # exact 0/1
            yg = jnp.dot(g, a, preferred_element_type=jnp.float32)           # (9*blk, cin)
            p = jnp.concatenate([yg[t * blk:(t + 1) * blk, :] for t in range(9)],
                                axis=1)                                      # (blk, 9*cin)
            z = jnp.dot(p, wm_ref[...], preferred_element_type=jnp.float32)  # (blk, cout)
            zm = jnp.maximum(jnp.maximum(z[0:m8], z[m8:2 * m8]),
                             jnp.maximum(z[2 * m8:3 * m8], z[3 * m8:4 * m8]))
            av = jnp.maximum(zm + cb_ref[...], 0.0)                          # (m8, cout)
            ridx = lax.broadcasted_iota(jnp.int32, (m8, 1), 0)
            a = jnp.where(ridx < lay["hp"] * lay["wp"], av, 0.0)             # zero pad rows

        # ---- head: linear1 via one matmul + mask fold, linear2 on the VPU, sigmoid ----
        v = jnp.dot(a[0:nspat, :], w1cat_ref[...],
                    preferred_element_type=jnp.float32)                      # (nspat, nspat*nhid)
        col = jnp.sum(v * hmask_ref[...], axis=0, keepdims=True)             # (1, nspat*nhid)
        hidden = b1h_ref[...]
        for s in range(nspat):
            hidden = hidden + col[:, s * nhid:(s + 1) * nhid]                # 128-aligned slices
        logit = jnp.sum(hidden * w2row_ref[...], axis=1, keepdims=True) + b2_ref[...]
        sig = 1.0 / (1.0 + jnp.exp(-logit))                                  # (1, 1)
        o_ref[...] = jnp.broadcast_to(sig.reshape(1, 1, 1), o_ref.shape)

    return kernel


def make_forward(plan, nhid=128):
    kernel = _make_kernel(plan, nhid)
    lay1 = plan[0]
    hpad, wpad = lay1["hin"] + 4, lay1["win"] + 4

    @jax.jit
    def forward(x_nchw, prepped):
        bsz = x_nchw.shape[0]
        assert x_nchw.shape[1] == 1, "conv1 expects a single input channel"
        xpad = jnp.pad(x_nchw[:, 0].astype(jnp.float32), ((0, 0), (2, 2), (2, 2)))
        const_specs = [pl.BlockSpec(a.shape, lambda i, nd=a.ndim: (0,) * nd)
                       for a in prepped]
        out = pl.pallas_call(
            kernel,
            out_shape=jax.ShapeDtypeStruct((bsz, 1, 128), jnp.float32),
            grid=(bsz,),
            in_specs=[pl.BlockSpec((1, hpad, wpad), lambda i: (i, 0, 0))] + const_specs,
            out_specs=pl.BlockSpec((1, 1, 128), lambda i: (i, 0, 0)),
            compiler_params=pltpu.CompilerParams(
                dimension_semantics=("parallel",)),   # megacore (v7x) splits the batch
        )(xpad, *prepped)
        return out[:, 0, 0]

    return forward


# ---------------- pure-JAX reference for validation ----------------

def cnn_reference(x_nchw, params):
    y = x_nchw.astype(jnp.float32)
    for name in ("conv1", "conv2", "conv3", "conv4"):
        w, b = params[name]
        y = lax.conv_general_dilated(y, w, (1, 1), [(2, 2), (2, 2)],
                                     dimension_numbers=("NCHW", "OIHW", "NCHW"))
        y = jnp.maximum(y + b.reshape(1, -1, 1, 1), 0.0)
        y = lax.reduce_window(y, -jnp.inf, lax.max, (1, 1, 2, 2), (1, 1, 2, 2), "VALID")
    bsz = y.shape[0]
    flat = y.reshape(bsz, -1)                      # per-sample (C,H,W) flatten order
    w1, b1 = params["linear1"]
    w2, b2 = params["linear2"]
    h = flat @ w1.T + b1
    logits = h @ w2.T + b2
    return jax.nn.sigmoid(logits)[:, 0]


# ---------------- deterministic synthetic parameters ----------------

def init_params(key, linear_dim):
    params = {}
    keys = jax.random.split(key, 2 * len(CONV_LAYERS) + 4)
    ki = 0
    for name, cin, cout in CONV_LAYERS:
        scale = 1.0 / math.sqrt(cin * 9)
        w = jax.random.normal(keys[ki], (cout, cin, 3, 3), jnp.float32) * scale; ki += 1
        b = jax.random.normal(keys[ki], (cout,), jnp.float32) * scale; ki += 1
        params[name] = (w, b)
    w1 = jax.random.normal(keys[ki], (128, linear_dim), jnp.float32) * (1.0 / math.sqrt(linear_dim)); ki += 1
    b1 = jax.random.normal(keys[ki], (128,), jnp.float32) * 0.01; ki += 1
    w2 = jax.random.normal(keys[ki], (1, 128), jnp.float32) * (1.0 / math.sqrt(128)); ki += 1
    b2 = jax.random.normal(keys[ki], (1,), jnp.float32) * 0.01; ki += 1
    params["linear1"] = (w1, b1)
    params["linear2"] = (w2, b2)
    return params


if __name__ == "__main__":
    # Input 16x16: conv(pad=2)+pool chain gives 16->9->5->3->2, so linear_dim = 128*2*2 = 512.
    H = W = 16
    B = 8                                    # batch of independent samples (per-sample
                                             # semantics identical to the PyTorch module)
    plan = build_plan(H, W)
    LINEAR_DIM = plan[-1]["cout"] * plan[-1]["hp"] * plan[-1]["wp"]

    key = jax.random.PRNGKey(0)
    kx, kp = jax.random.split(key)
    x = jax.random.normal(kx, (B, 1, H, W), jnp.float32)
    params = init_params(kp, LINEAR_DIM)

    prepped = prep_params(params, plan)      # one-time weight prep (outside the forward)
    forward = make_forward(plan)

    out = jax.block_until_ready(forward(x, prepped))

    ref = cnn_reference(x, params)
    assert out.shape == (B,), out.shape
    assert jnp.allclose(out, ref, atol=1e-3, rtol=1e-3), (out, ref)
    print("KERNEL_OK")
</pallas_src>

<mosaic_0001>
module attributes {stable_mosaic.version = 11 : i64} {
  func.func @kernel(%arg0: i32, %arg1: memref<1x20x20xf32, #tpu.memory_space<vmem>>, %arg2: memref<96x20xf32, #tpu.memory_space<vmem>>, %arg3: memref<6x20x144xf32, #tpu.memory_space<vmem>>, %arg4: memref<1x144xf32, #tpu.memory_space<vmem>>, %arg5: memref<88x9xf32, #tpu.memory_space<vmem>>, %arg6: memref<88x144xf32, #tpu.memory_space<vmem>>, %arg7: memref<144x16xf32, #tpu.memory_space<vmem>>, %arg8: memref<1152x88xbf16, #tpu.memory_space<vmem>>, %arg9: memref<144x32xf32, #tpu.memory_space<vmem>>, %arg10: memref<1x32xf32, #tpu.memory_space<vmem>>, %arg11: memref<576x32xbf16, #tpu.memory_space<vmem>>, %arg12: memref<288x64xf32, #tpu.memory_space<vmem>>, %arg13: memref<1x64xf32, #tpu.memory_space<vmem>>, %arg14: memref<288x16xbf16, #tpu.memory_space<vmem>>, %arg15: memref<576x128xf32, #tpu.memory_space<vmem>>, %arg16: memref<1x128xf32, #tpu.memory_space<vmem>>, %arg17: memref<128x512xf32, #tpu.memory_space<vmem>>, %arg18: memref<1x128xf32, #tpu.memory_space<vmem>>, %arg19: memref<4x512xf32, #tpu.memory_space<vmem>>, %arg20: memref<1x128xf32, #tpu.memory_space<vmem>>, %arg21: memref<1x1xf32, #tpu.memory_space<vmem>>, %arg22: memref<1x1x128xf32, #tpu.memory_space<vmem>>) attributes {dimension_semantics = [#tpu.dimension_semantics<parallel>], iteration_bounds = array<i64: 8>, scalar_prefetch = 0 : i64, scratch_operands = 0 : i64, tpu.core_type = #tpu.core_type<tc>, window_params = [{transform_indices = @transform_0, window_bounds = array<i64: 1, 20, 20>}, {pipeline_mode = #tpu.pipeline_mode<synchronous>, transform_indices = @transform_1, window_bounds = array<i64: 96, 20>}, {pipeline_mode = #tpu.pipeline_mode<synchronous>, transform_indices = @transform_2, window_bounds = array<i64: 6, 20, 144>}, {pipeline_mode = #tpu.pipeline_mode<synchronous>, transform_indices = @transform_3, window_bounds = array<i64: 1, 144>}, {pipeline_mode = #tpu.pipeline_mode<synchronous>, transform_indices = @transform_4, window_bounds = array<i64: 88, 9>}, {pipeline_mode = #tpu.pipeline_mode<synchronous>, transform_indices = @transform_5, window_bounds = array<i64: 88, 144>}, {pipeline_mode = #tpu.pipeline_mode<synchronous>, transform_indices = @transform_6, window_bounds = array<i64: 144, 16>}, {pipeline_mode = #tpu.pipeline_mode<synchronous>, transform_indices = @transform_7, window_bounds = array<i64: 1152, 88>}, {pipeline_mode = #tpu.pipeline_mode<synchronous>, transform_indices = @transform_8, window_bounds = array<i64: 144, 32>}, {pipeline_mode = #tpu.pipeline_mode<synchronous>, transform_indices = @transform_9, window_bounds = array<i64: 1, 32>}, {pipeline_mode = #tpu.pipeline_mode<synchronous>, transform_indices = @transform_10, window_bounds = array<i64: 576, 32>}, {pipeline_mode = #tpu.pipeline_mode<synchronous>, transform_indices = @transform_11, window_bounds = array<i64: 288, 64>}, {pipeline_mode = #tpu.pipeline_mode<synchronous>, transform_indices = @transform_12, window_bounds = array<i64: 1, 64>}, {pipeline_mode = #tpu.pipeline_mode<synchronous>, transform_indices = @transform_13, window_bounds = array<i64: 288, 16>}, {pipeline_mode = #tpu.pipeline_mode<synchronous>, transform_indices = @transform_14, window_bounds = array<i64: 576, 128>}, {pipeline_mode = #tpu.pipeline_mode<synchronous>, transform_indices = @transform_15, window_bounds = array<i64: 1, 128>}, {pipeline_mode = #tpu.pipeline_mode<synchronous>, transform_indices = @transform_16, window_bounds = array<i64: 128, 512>}, {pipeline_mode = #tpu.pipeline_mode<synchronous>, transform_indices = @transform_17, window_bounds = array<i64: 1, 128>}, {pipeline_mode = #tpu.pipeline_mode<synchronous>, transform_indices = @transform_18, window_bounds = array<i64: 4, 512>}, {pipeline_mode = #tpu.pipeline_mode<synchronous>, transform_indices = @transform_19, window_bounds = array<i64: 1, 128>}, {pipeline_mode = #tpu.pipeline_mode<synchronous>, transform_indices = @transform_20, window_bounds = array<i64: 1, 1>}, {transform_indices = @transform_21, window_bounds = array<i64: 1, 1, 128>}]} {
    %c0 = arith.constant 0 : index
    %c0_0 = arith.constant 0 : index
    %c0_1 = arith.constant 0 : index
    %0 = vector.load %arg1[%c0, %c0_0, %c0_1] : memref<1x20x20xf32, #tpu.memory_space<vmem>>, vector<1x20x20xf32>
    %1 = vector.shape_cast %0 : vector<1x20x20xf32> to vector<20x20xf32>
    %c0_2 = arith.constant 0 : index
    %c0_3 = arith.constant 0 : index
    %2 = vector.load %arg2[%c0_2, %c0_3] : memref<96x20xf32, #tpu.memory_space<vmem>>, vector<96x20xf32>
    %cst = arith.constant dense<0.000000e+00> : vector<96x20xf32>
    %3 = tpu.matmul %2, %1, %cst {dimension_numbers = #tpu.dot_dimension_numbers<[1], [0], [0], [1], [0, 0, 1, 1], [], []>} : vector<96x20xf32>, vector<20x20xf32>, vector<96x20xf32> -> vector<96x20xf32>
    %4 = vector.extract_strided_slice %3 {offsets = [0, 0], sizes = [32, 20], strides = [1, 1]} : vector<96x20xf32> to vector<32x20xf32>
    %c0_4 = arith.constant 0 : index
    %c0_5 = arith.constant 0 : index
    %c0_6 = arith.constant 0 : index
    %5 = vector.load %arg3[%c0_4, %c0_5, %c0_6] : memref<6x20x144xf32, #tpu.memory_space<vmem>>, vector<1x20x144xf32>
    %6 = vector.shape_cast %5 : vector<1x20x144xf32> to vector<20x144xf32>
    %cst_7 = arith.constant dense<0.000000e+00> : vector<32x144xf32>
    %7 = tpu.matmul %4, %6, %cst_7 {dimension_numbers = #tpu.dot_dimension_numbers<[1], [0], [0], [1], [0, 0, 1, 1], [], []>} : vector<32x20xf32>, vector<20x144xf32>, vector<32x144xf32> -> vector<32x144xf32>
    %8 = vector.extract_strided_slice %3 {offsets = [32, 0], sizes = [32, 20], strides = [1, 1]} : vector<96x20xf32> to vector<32x20xf32>
    %c2 = arith.constant 2 : index
    %c0_8 = arith.constant 0 : index
    %c0_9 = arith.constant 0 : index
    %9 = vector.load %arg3[%c2, %c0_8, %c0_9] : memref<6x20x144xf32, #tpu.memory_space<vmem>>, vector<1x20x144xf32>
    %10 = vector.shape_cast %9 : vector<1x20x144xf32> to vector<20x144xf32>
    %cst_10 = arith.constant dense<0.000000e+00> : vector<32x144xf32>
    %11 = tpu.matmul %8, %10, %cst_10 {dimension_numbers = #tpu.dot_dimension_numbers<[1], [0], [0], [1], [0, 0, 1, 1], [], []>} : vector<32x20xf32>, vector<20x144xf32>, vector<32x144xf32> -> vector<32x144xf32>
    %12 = arith.addf %7, %11 : vector<32x144xf32>
    %13 = vector.extract_strided_slice %3 {offsets = [64, 0], sizes = [32, 20], strides = [1, 1]} : vector<96x20xf32> to vector<32x20xf32>
    %c4 = arith.constant 4 : index
    %c0_11 = arith.constant 0 : index
    %c0_12 = arith.constant 0 : index
    %14 = vector.load %arg3[%c4, %c0_11, %c0_12] : memref<6x20x144xf32, #tpu.memory_space<vmem>>, vector<1x20x144xf32>
    %15 = vector.shape_cast %14 : vector<1x20x144xf32> to vector<20x144xf32>
    %cst_13 = arith.constant dense<0.000000e+00> : vector<32x144xf32>
    %16 = tpu.matmul %13, %15, %cst_13 {dimension_numbers = #tpu.dot_dimension_numbers<[1], [0], [0], [1], [0, 0, 1, 1], [], []>} : vector<32x20xf32>, vector<20x144xf32>, vector<32x144xf32> -> vector<32x144xf32>
    %17 = arith.addf %12, %16 : vector<32x144xf32>
    %18 = vector.extract_strided_slice %3 {offsets = [0, 0], sizes = [32, 20], strides = [1, 1]} : vector<96x20xf32> to vector<32x20xf32>
    %c1 = arith.constant 1 : index
    %c0_14 = arith.constant 0 : index
    %c0_15 = arith.constant 0 : index
    %19 = vector.load %arg3[%c1, %c0_14, %c0_15] : memref<6x20x144xf32, #tpu.memory_space<vmem>>, vector<1x20x144xf32>
    %20 = vector.shape_cast %19 : vector<1x20x144xf32> to vector<20x144xf32>
    %cst_16 = arith.constant dense<0.000000e+00> : vector<32x144xf32>
    %21 = tpu.matmul %18, %20, %cst_16 {dimension_numbers = #tpu.dot_dimension_numbers<[1], [0], [0], [1], [0, 0, 1, 1], [], []>} : vector<32x20xf32>, vector<20x144xf32>, vector<32x144xf32> -> vector<32x144xf32>
    %22 = vector.extract_strided_slice %3 {offsets = [32, 0], sizes = [32, 20], strides = [1, 1]} : vector<96x20xf32> to vector<32x20xf32>
    %c3 = arith.constant 3 : index
    %c0_17 = arith.constant 0 : index
    %c0_18 = arith.constant 0 : index
    %23 = vector.load %arg3[%c3, %c0_17, %c0_18] : memref<6x20x144xf32, #tpu.memory_space<vmem>>, vector<1x20x144xf32>
    %24 = vector.shape_cast %23 : vector<1x20x144xf32> to vector<20x144xf32>
    %cst_19 = arith.constant dense<0.000000e+00> : vector<32x144xf32>
    %25 = tpu.matmul %22, %24, %cst_19 {dimension_numbers = #tpu.dot_dimension_numbers<[1], [0], [0], [1], [0, 0, 1, 1], [], []>} : vector<32x20xf32>, vector<20x144xf32>, vector<32x144xf32> -> vector<32x144xf32>
    %26 = arith.addf %21, %25 : vector<32x144xf32>
    %27 = vector.extract_strided_slice %3 {offsets = [64, 0], sizes = [32, 20], strides = [1, 1]} : vector<96x20xf32> to vector<32x20xf32>
    %c5 = arith.constant 5 : index
    %c0_20 = arith.constant 0 : index
    %c0_21 = arith.constant 0 : index
    %28 = vector.load %arg3[%c5, %c0_20, %c0_21] : memref<6x20x144xf32, #tpu.memory_space<vmem>>, vector<1x20x144xf32>
    %29 = vector.shape_cast %28 : vector<1x20x144xf32> to vector<20x144xf32>
    %cst_22 = arith.constant dense<0.000000e+00> : vector<32x144xf32>
    %30 = tpu.matmul %27, %29, %cst_22 {dimension_numbers = #tpu.dot_dimension_numbers<[1], [0], [0], [1], [0, 0, 1, 1], [], []>} : vector<32x20xf32>, vector<20x144xf32>, vector<32x144xf32> -> vector<32x144xf32>
    %31 = arith.addf %26, %30 : vector<32x144xf32>
    %32 = vector.extract_strided_slice %17 {offsets = [0, 0], sizes = [9, 144], strides = [1, 1]} : vector<32x144xf32> to vector<9x144xf32>
    %33 = vector.extract_strided_slice %17 {offsets = [16, 0], sizes = [9, 144], strides = [1, 1]} : vector<32x144xf32> to vector<9x144xf32>
    %34 = arith.maximumf %32, %33 : vector<9x144xf32>
    %35 = vector.extract_strided_slice %31 {offsets = [0, 0], sizes = [9, 144], strides = [1, 1]} : vector<32x144xf32> to vector<9x144xf32>
    %36 = vector.extract_strided_slice %31 {offsets = [16, 0], sizes = [9, 144], strides = [1, 1]} : vector<32x144xf32> to vector<9x144xf32>
    %37 = arith.maximumf %35, %36 : vector<9x144xf32>
    %38 = arith.maximumf %34, %37 : vector<9x144xf32>
    %c0_23 = arith.constant 0 : index
    %c0_24 = arith.constant 0 : index
    %39 = vector.load %arg4[%c0_23, %c0_24] : memref<1x144xf32, #tpu.memory_space<vmem>>, vector<1x144xf32>
    %40 = vector.broadcast %39 : vector<1x144xf32> to vector<9x144xf32>
    %41 = arith.addf %38, %40 : vector<9x144xf32>
    %cst_25 = arith.constant 0.000000e+00 : f32
    %42 = vector.broadcast %cst_25 : f32 to vector<9x144xf32>
    %43 = arith.maximumf %41, %42 : vector<9x144xf32>
    %c0_26 = arith.constant 0 : index
    %c0_27 = arith.constant 0 : index
    %44 = vector.load %arg5[%c0_26, %c0_27] : memref<88x9xf32, #tpu.memory_space<vmem>>, vector<88x9xf32>
    %cst_28 = arith.constant dense<0.000000e+00> : vector<88x144xf32>
    %45 = tpu.matmul %44, %43, %cst_28 {dimension_numbers = #tpu.dot_dimension_numbers<[1], [0], [0], [1], [0, 0, 1, 1], [], []>} : vector<88x9xf32>, vector<9x144xf32>, vector<88x144xf32> -> vector<88x144xf32>
    %c0_29 = arith.constant 0 : index
    %c0_30 = arith.constant 0 : index
    %46 = vector.load %arg6[%c0_29, %c0_30] : memref<88x144xf32, #tpu.memory_space<vmem>>, vector<88x144xf32>
    %47 = arith.mulf %45, %46 : vector<88x144xf32>
    %c0_31 = arith.constant 0 : index
    %c0_32 = arith.constant 0 : index
    %48 = vector.load %arg7[%c0_31, %c0_32] : memref<144x16xf32, #tpu.memory_space<vmem>>, vector<144x16xf32>
    %cst_33 = arith.constant dense<0.000000e+00> : vector<88x16xf32>
    %49 = tpu.matmul %47, %48, %cst_33 {dimension_numbers = #tpu.dot_dimension_numbers<[1], [0], [0], [1], [0, 0, 1, 1], [], []>} : vector<88x144xf32>, vector<144x16xf32>, vector<88x16xf32> -> vector<88x16xf32>
    %c0_34 = arith.constant 0 : index
    %c0_35 = arith.constant 0 : index
    %50 = vector.load %arg8[%c0_34, %c0_35] : memref<1152x88xbf16, #tpu.memory_space<vmem>>, vector<1152x88xbf16>
    %51 = arith.extf %50 : vector<1152x88xbf16> to vector<1152x88xf32>
    %cst_36 = arith.constant dense<0.000000e+00> : vector<1152x16xf32>
    %52 = tpu.matmul %51, %49, %cst_36 {dimension_numbers = #tpu.dot_dimension_numbers<[1], [0], [0], [1], [0, 0, 1, 1], [], []>} : vector<1152x88xf32>, vector<88x16xf32>, vector<1152x16xf32> -> vector<1152x16xf32>
    %53 = vector.extract_strided_slice %52 {offsets = [0, 0], sizes = [128, 16], strides = [1, 1]} : vector<1152x16xf32> to vector<128x16xf32>
    %54 = vector.extract_strided_slice %52 {offsets = [128, 0], sizes = [128, 16], strides = [1, 1]} : vector<1152x16xf32> to vector<128x16xf32>
    %55 = vector.extract_strided_slice %52 {offsets = [256, 0], sizes = [128, 16], strides = [1, 1]} : vector<1152x16xf32> to vector<128x16xf32>
    %56 = vector.extract_strided_slice %52 {offsets = [384, 0], sizes = [128, 16], strides = [1, 1]} : vector<1152x16xf32> to vector<128x16xf32>
    %57 = vector.extract_strided_slice %52 {offsets = [512, 0], sizes = [128, 16], strides = [1, 1]} : vector<1152x16xf32> to vector<128x16xf32>
    %58 = vector.extract_strided_slice %52 {offsets = [640, 0], sizes = [128, 16], strides = [1, 1]} : vector<1152x16xf32> to vector<128x16xf32>
    %59 = vector.extract_strided_slice %52 {offsets = [768, 0], sizes = [128, 16], strides = [1, 1]} : vector<1152x16xf32> to vector<128x16xf32>
    %60 = vector.extract_strided_slice %52 {offsets = [896, 0], sizes = [128, 16], strides = [1, 1]} : vector<1152x16xf32> to vector<128x16xf32>
    %61 = vector.extract_strided_slice %52 {offsets = [1024, 0], sizes = [128, 16], strides = [1, 1]} : vector<1152x16xf32> to vector<128x16xf32>
    %62 = tpu.concatenate %53, %54, %55, %56, %57, %58, %59, %60, %61 in 1 : vector<128x16xf32>, vector<128x16xf32>, vector<128x16xf32>, vector<128x16xf32>, vector<128x16xf32>, vector<128x16xf32>, vector<128x16xf32>, vector<128x16xf32>, vector<128x16xf32> -> vector<128x144xf32>
    %c0_37 = arith.constant 0 : index
    %c0_38 = arith.constant 0 : index
    %63 = vector.load %arg9[%c0_37, %c0_38] : memref<144x32xf32, #tpu.memory_space<vmem>>, vector<144x32xf32>
    %cst_39 = arith.constant dense<0.000000e+00> : vector<128x32xf32>
    %64 = tpu.matmul %62, %63, %cst_39 {dimension_numbers = #tpu.dot_dimension_numbers<[1], [0], [0], [1], [0, 0, 1, 1], [], []>} : vector<128x144xf32>, vector<144x32xf32>, vector<128x32xf32> -> vector<128x32xf32>
    %65 = vector.extract_strided_slice %64 {offsets = [0, 0], sizes = [32, 32], strides = [1, 1]} : vector<128x32xf32> to vector<32x32xf32>
    %66 = vector.extract_strided_slice %64 {offsets = [32, 0], sizes = [32, 32], strides = [1, 1]} : vector<128x32xf32> to vector<32x32xf32>
    %67 = arith.maximumf %65, %66 : vector<32x32xf32>
    %68 = vector.extract_strided_slice %64 {offsets = [64, 0], sizes = [32, 32], strides = [1, 1]} : vector<128x32xf32> to vector<32x32xf32>
    %69 = vector.extract_strided_slice %64 {offsets = [96, 0], sizes = [32, 32], strides = [1, 1]} : vector<128x32xf32> to vector<32x32xf32>
    %70 = arith.maximumf %68, %69 : vector<32x32xf32>
    %71 = arith.maximumf %67, %70 : vector<32x32xf32>
    %c0_40 = arith.constant 0 : index
    %c0_41 = arith.constant 0 : index
    %72 = vector.load %arg10[%c0_40, %c0_41] : memref<1x32xf32, #tpu.memory_space<vmem>>, vector<1x32xf32>
    %73 = vector.broadcast %72 : vector<1x32xf32> to vector<32x32xf32>
    %74 = arith.addf %71, %73 : vector<32x32xf32>
    %cst_42 = arith.constant 0.000000e+00 : f32
    %75 = vector.broadcast %cst_42 : f32 to vector<32x32xf32>
    %76 = arith.maximumf %74, %75 : vector<32x32xf32>
    %77 = tpu.iota {dimensions = array<i32: 0>} : vector<32x1xi32>
    %c25_i32 = arith.constant 25 : i32
    %78 = vector.broadcast %c25_i32 : i32 to vector<32x1xi32>
    %79 = arith.cmpi slt, %77, %78 : vector<32x1xi32>
    %cst_43 = arith.constant 0.000000e+00 : f32
    %80 = vector.shape_cast %79 : vector<32x1xi1> to vector<32x1xi1>
    %81 = vector.broadcast %80 : vector<32x1xi1> to vector<32x32xi1>
    %82 = vector.broadcast %cst_43 : f32 to vector<32x32xf32>
    %83 = arith.select %81, %76, %82 : vector<32x32xi1>, vector<32x32xf32>
    %c0_44 = arith.constant 0 : index
    %c0_45 = arith.constant 0 : index
    %84 = vector.load %arg11[%c0_44, %c0_45] : memref<576x32xbf16, #tpu.memory_space<vmem>>, vector<576x32xbf16>
    %85 = arith.extf %84 : vector<576x32xbf16> to vector<576x32xf32>
    %cst_46 = arith.constant dense<0.000000e+00> : vector<576x32xf32>
    %86 = tpu.matmul %85, %83, %cst_46 {dimension_numbers = #tpu.dot_dimension_numbers<[1], [0], [0], [1], [0, 0, 1, 1], [], []>} : vector<576x32xf32>, vector<32x32xf32>, vector<576x32xf32> -> vector<576x32xf32>
    %87 = vector.extract_strided_slice %86 {offsets = [0, 0], sizes = [64, 32], strides = [1, 1]} : vector<576x32xf32> to vector<64x32xf32>
    %88 = vector.extract_strided_slice %86 {offsets = [64, 0], sizes = [64, 32], strides = [1, 1]} : vector<576x32xf32> to vector<64x32xf32>
    %89 = vector.extract_strided_slice %86 {offsets = [128, 0], sizes = [64, 32], strides = [1, 1]} : vector<576x32xf32> to vector<64x32xf32>
    %90 = vector.extract_strided_slice %86 {offsets = [192, 0], sizes = [64, 32], strides = [1, 1]} : vector<576x32xf32> to vector<64x32xf32>
    %91 = vector.extract_strided_slice %86 {offsets = [256, 0], sizes = [64, 32], strides = [1, 1]} : vector<576x32xf32> to vector<64x32xf32>
    %92 = vector.extract_strided_slice %86 {offsets = [320, 0], sizes = [64, 32], strides = [1, 1]} : vector<576x32xf32> to vector<64x32xf32>
    %93 = vector.extract_strided_slice %86 {offsets = [384, 0], sizes = [64, 32], strides = [1, 1]} : vector<576x32xf32> to vector<64x32xf32>
    %94 = vector.extract_strided_slice %86 {offsets = [448, 0], sizes = [64, 32], strides = [1, 1]} : vector<576x32xf32> to vector<64x32xf32>
    %95 = vector.extract_strided_slice %86 {offsets = [512, 0], sizes = [64, 32], strides = [1, 1]} : vector<576x32xf32> to vector<64x32xf32>
    %96 = tpu.concatenate %87, %88, %89, %90, %91, %92, %93, %94, %95 in 1 : vector<64x32xf32>, vector<64x32xf32>, vector<64x32xf32>, vector<64x32xf32>, vector<64x32xf32>, vector<64x32xf32>, vector<64x32xf32>, vector<64x32xf32>, vector<64x32xf32> -> vector<64x288xf32>
    %c0_47 = arith.constant 0 : index
    %c0_48 = arith.constant 0 : index
    %97 = vector.load %arg12[%c0_47, %c0_48] : memref<288x64xf32, #tpu.memory_space<vmem>>, vector<288x64xf32>
    %cst_49 = arith.constant dense<0.000000e+00> : vector<64x64xf32>
    %98 = tpu.matmul %96, %97, %cst_49 {dimension_numbers = #tpu.dot_dimension_numbers<[1], [0], [0], [1], [0, 0, 1, 1], [], []>} : vector<64x288xf32>, vector<288x64xf32>, vector<64x64xf32> -> vector<64x64xf32>
    %99 = vector.extract_strided_slice %98 {offsets = [0, 0], sizes = [16, 64], strides = [1, 1]} : vector<64x64xf32> to vector<16x64xf32>
    %100 = vector.extract_strided_slice %98 {offsets = [16, 0], sizes = [16, 64], strides = [1, 1]} : vector<64x64xf32> to vector<16x64xf32>
    %101 = arith.maximumf %99, %100 : vector<16x64xf32>
    %102 = vector.extract_strided_slice %98 {offsets = [32, 0], sizes = [16, 64], strides = [1, 1]} : vector<64x64xf32> to vector<16x64xf32>
    %103 = vector.extract_strided_slice %98 {offsets = [48, 0], sizes = [16, 64], strides = [1, 1]} : vector<64x64xf32> to vector<16x64xf32>
    %104 = arith.maximumf %102, %103 : vector<16x64xf32>
    %105 = arith.maximumf %101, %104 : vector<16x64xf32>
    %c0_50 = arith.constant 0 : index
    %c0_51 = arith.constant 0 : index
    %106 = vector.load %arg13[%c0_50, %c0_51] : memref<1x64xf32, #tpu.memory_space<vmem>>, vector<1x64xf32>
    %107 = vector.broadcast %106 : vector<1x64xf32> to vector<16x64xf32>
    %108 = arith.addf %105, %107 : vector<16x64xf32>
    %cst_52 = arith.constant 0.000000e+00 : f32
    %109 = vector.broadcast %cst_52 : f32 to vector<16x64xf32>
    %110 = arith.maximumf %108, %109 : vector<16x64xf32>
    %111 = tpu.iota {dimensions = array<i32: 0>} : vector<16x1xi32>
    %c9_i32 = arith.constant 9 : i32
    %112 = vector.broadcast %c9_i32 : i32 to vector<16x1xi32>
    %113 = arith.cmpi slt, %111, %112 : vector<16x1xi32>
    %cst_53 = arith.constant 0.000000e+00 : f32
    %114 = vector.shape_cast %113 : vector<16x1xi1> to vector<16x1xi1>
    %115 = vector.broadcast %114 : vector<16x1xi1> to vector<16x64xi1>
    %116 = vector.broadcast %cst_53 : f32 to vector<16x64xf32>
    %117 = arith.select %115, %110, %116 : vector<16x64xi1>, vector<16x64xf32>
    %c0_54 = arith.constant 0 : index
    %c0_55 = arith.constant 0 : index
    %118 = vector.load %arg14[%c0_54, %c0_55] : memref<288x16xbf16, #tpu.memory_space<vmem>>, vector<288x16xbf16>
    %119 = arith.extf %118 : vector<288x16xbf16> to vector<288x16xf32>
    %cst_56 = arith.constant dense<0.000000e+00> : vector<288x64xf32>
    %120 = tpu.matmul %119, %117, %cst_56 {dimension_numbers = #tpu.dot_dimension_numbers<[1], [0], [0], [1], [0, 0, 1, 1], [], []>} : vector<288x16xf32>, vector<16x64xf32>, vector<288x64xf32> -> vector<288x64xf32>
    %121 = vector.extract_strided_slice %120 {offsets = [0, 0], sizes = [32, 64], strides = [1, 1]} : vector<288x64xf32> to vector<32x64xf32>
    %122 = vector.extract_strided_slice %120 {offsets = [32, 0], sizes = [32, 64], strides = [1, 1]} : vector<288x64xf32> to vector<32x64xf32>
    %123 = vector.extract_strided_slice %120 {offsets = [64, 0], sizes = [32, 64], strides = [1, 1]} : vector<288x64xf32> to vector<32x64xf32>
    %124 = vector.extract_strided_slice %120 {offsets = [96, 0], sizes = [32, 64], strides = [1, 1]} : vector<288x64xf32> to vector<32x64xf32>
    %125 = vector.extract_strided_slice %120 {offsets = [128, 0], sizes = [32, 64], strides = [1, 1]} : vector<288x64xf32> to vector<32x64xf32>
    %126 = vector.extract_strided_slice %120 {offsets = [160, 0], sizes = [32, 64], strides = [1, 1]} : vector<288x64xf32> to vector<32x64xf32>
    %127 = vector.extract_strided_slice %120 {offsets = [192, 0], sizes = [32, 64], strides = [1, 1]} : vector<288x64xf32> to vector<32x64xf32>
    %128 = vector.extract_strided_slice %120 {offsets = [224, 0], sizes = [32, 64], strides = [1, 1]} : vector<288x64xf32> to vector<32x64xf32>
    %129 = vector.extract_strided_slice %120 {offsets = [256, 0], sizes = [32, 64], strides = [1, 1]} : vector<288x64xf32> to vector<32x64xf32>
    %130 = tpu.concatenate %121, %122, %123, %124, %125, %126, %127, %128, %129 in 1 : vector<32x64xf32>, vector<32x64xf32>, vector<32x64xf32>, vector<32x64xf32>, vector<32x64xf32>, vector<32x64xf32>, vector<32x64xf32>, vector<32x64xf32>, vector<32x64xf32> -> vector<32x576xf32>
    %c0_57 = arith.constant 0 : index
    %c0_58 = arith.constant 0 : index
    %131 = vector.load %arg15[%c0_57, %c0_58] : memref<576x128xf32, #tpu.memory_space<vmem>>, vector<576x128xf32>
    %cst_59 = arith.constant dense<0.000000e+00> : vector<32x128xf32>
    %132 = tpu.matmul %130, %131, %cst_59 {dimension_numbers = #tpu.dot_dimension_numbers<[1], [0], [0], [1], [0, 0, 1, 1], [], []>} : vector<32x576xf32>, vector<576x128xf32>, vector<32x128xf32> -> vector<32x128xf32>
    %133 = vector.extract_strided_slice %132 {offsets = [0, 0], sizes = [8, 128], strides = [1, 1]} : vector<32x128xf32> to vector<8x128xf32>
    %134 = vector.extract_strided_slice %132 {offsets = [8, 0], sizes = [8, 128], strides = [1, 1]} : vector<32x128xf32> to vector<8x128xf32>
    %135 = arith.maximumf %133, %134 : vector<8x128xf32>
    %136 = vector.extract_strided_slice %132 {offsets = [16, 0], sizes = [8, 128], strides = [1, 1]} : vector<32x128xf32> to vector<8x128xf32>
    %137 = vector.extract_strided_slice %132 {offsets = [24, 0], sizes = [8, 128], strides = [1, 1]} : vector<32x128xf32> to vector<8x128xf32>
    %138 = arith.maximumf %136, %137 : vector<8x128xf32>
    %139 = arith.maximumf %135, %138 : vector<8x128xf32>
    %c0_60 = arith.constant 0 : index
    %c0_61 = arith.constant 0 : index
    %140 = vector.load %arg16[%c0_60, %c0_61] : memref<1x128xf32, #tpu.memory_space<vmem>>, vector<1x128xf32>
    %141 = vector.broadcast %140 : vector<1x128xf32> to vector<8x128xf32>
    %142 = arith.addf %139, %141 : vector<8x128xf32>
    %cst_62 = arith.constant 0.000000e+00 : f32
    %143 = vector.broadcast %cst_62 : f32 to vector<8x128xf32>
    %144 = arith.maximumf %142, %143 : vector<8x128xf32>
    %145 = tpu.iota {dimensions = array<i32: 0>} : vector<8x1xi32>
    %c4_i32 = arith.constant 4 : i32
    %146 = vector.broadcast %c4_i32 : i32 to vector<8x1xi32>
    %147 = arith.cmpi slt, %145, %146 : vector<8x1xi32>
    %cst_63 = arith.constant 0.000000e+00 : f32
    %148 = vector.shape_cast %147 : vector<8x1xi1> to vector<8x1xi1>
    %149 = vector.broadcast %148 : vector<8x1xi1> to vector<8x128xi1>
    %150 = vector.broadcast %cst_63 : f32 to vector<8x128xf32>
    %151 = arith.select %149, %144, %150 : vector<8x128xi1>, vector<8x128xf32>
    %152 = vector.extract_strided_slice %151 {offsets = [0, 0], sizes = [4, 128], strides = [1, 1]} : vector<8x128xf32> to vector<4x128xf32>
    %c0_64 = arith.constant 0 : index
    %c0_65 = arith.constant 0 : index
    %153 = vector.load %arg17[%c0_64, %c0_65] : memref<128x512xf32, #tpu.memory_space<vmem>>, vector<128x512xf32>
    %cst_66 = arith.constant dense<0.000000e+00> : vector<4x512xf32>
    %154 = tpu.matmul %152, %153, %cst_66 {dimension_numbers = #tpu.dot_dimension_numbers<[1], [0], [0], [1], [0, 0, 1, 1], [], []>} : vector<4x128xf32>, vector<128x512xf32>, vector<4x512xf32> -> vector<4x512xf32>
    %c0_67 = arith.constant 0 : index
    %c0_68 = arith.constant 0 : index
    %155 = vector.load %arg19[%c0_67, %c0_68] : memref<4x512xf32, #tpu.memory_space<vmem>>, vector<4x512xf32>
    %156 = arith.mulf %154, %155 : vector<4x512xf32>
    %cst_69 = arith.constant dense<0.000000e+00> : vector<512xf32>
    %157 = vector.multi_reduction <add>, %156, %cst_69 [0] : vector<4x512xf32> to vector<512xf32>
    %158 = vector.shape_cast %157 : vector<512xf32> to vector<1x512xf32>
    %c0_70 = arith.constant 0 : index
    %c0_71 = arith.constant 0 : index
    %159 = vector.load %arg18[%c0_70, %c0_71] : memref<1x128xf32, #tpu.memory_space<vmem>>, vector<1x128xf32>
    %160 = vector.extract_strided_slice %158 {offsets = [0, 0], sizes = [1, 128], strides = [1, 1]} : vector<1x512xf32> to vector<1x128xf32>
    %161 = arith.addf %159, %160 : vector<1x128xf32>
    %162 = vector.extract_strided_slice %158 {offsets = [0, 128], sizes = [1, 128], strides = [1, 1]} : vector<1x512xf32> to vector<1x128xf32>
    %163 = arith.addf %161, %162 : vector<1x128xf32>
    %164 = vector.extract_strided_slice %158 {offsets = [0, 256], sizes = [1, 128], strides = [1, 1]} : vector<1x512xf32> to vector<1x128xf32>
    %165 = arith.addf %163, %164 : vector<1x128xf32>
    %166 = vector.extract_strided_slice %158 {offsets = [0, 384], sizes = [1, 128], strides = [1, 1]} : vector<1x512xf32> to vector<1x128xf32>
    %167 = arith.addf %165, %166 : vector<1x128xf32>
    %c0_72 = arith.constant 0 : index
    %c0_73 = arith.constant 0 : index
    %168 = vector.load %arg20[%c0_72, %c0_73] : memref<1x128xf32, #tpu.memory_space<vmem>>, vector<1x128xf32>
    %169 = arith.mulf %167, %168 : vector<1x128xf32>
    %cst_74 = arith.constant dense<0.000000e+00> : vector<1xf32>
    %170 = vector.multi_reduction <add>, %169, %cst_74 [1] : vector<1x128xf32> to vector<1xf32>
    %171 = vector.shape_cast %170 : vector<1xf32> to vector<1x1xf32>
    %c0_75 = arith.constant 0 : index
    %c0_76 = arith.constant 0 : index
    %172 = vector.load %arg21[%c0_75, %c0_76] : memref<1x1xf32, #tpu.memory_space<vmem>>, vector<1x1xf32>
    %173 = arith.addf %171, %172 : vector<1x1xf32>
    %cst_77 = arith.constant 0.000000e+00 : f32
    %174 = vector.broadcast %cst_77 : f32 to vector<1x1xf32>
    %175 = arith.subf %174, %173 : vector<1x1xf32>
    %176 = math.exp %175 : vector<1x1xf32>
    %cst_78 = arith.constant 1.000000e+00 : f32
    %177 = vector.broadcast %cst_78 : f32 to vector<1x1xf32>
    %178 = arith.addf %177, %176 : vector<1x1xf32>
    %cst_79 = arith.constant 1.000000e+00 : f32
    %179 = vector.broadcast %cst_79 : f32 to vector<1x1xf32>
    %180 = arith.divf %179, %178 : vector<1x1xf32>
    %181 = vector.shape_cast %180 : vector<1x1xf32> to vector<1x1x1xf32>
    %182 = vector.shape_cast %181 : vector<1x1x1xf32> to vector<1x1x1xf32>
    %183 = vector.broadcast %182 : vector<1x1x1xf32> to vector<1x1x128xf32>
    %c0_80 = arith.constant 0 : index
    %c0_81 = arith.constant 0 : index
    %c0_82 = arith.constant 0 : index
    %184 = vector.load %arg22[%c0_80, %c0_81, %c0_82] : memref<1x1x128xf32, #tpu.memory_space<vmem>>, vector<1x1x128xf32>
    tpu.vector_store %arg22[%c0_80, %c0_81, %c0_82], %183 {strides = array<i32>} : memref<1x1x128xf32, #tpu.memory_space<vmem>>, vector<1x1x128xf32>,
    return
  }
  func.func @transform_0(%arg0: i32) -> (i32, i32, i32) {
    %c0_i32 = arith.constant 0 : i32
    %c0_i32_0 = arith.constant 0 : i32
    %c0_i32_1 = arith.constant 0 : i32
    return %arg0, %c0_i32, %c0_i32_0 : i32, i32, i32
  }
  func.func @transform_1(%arg0: i32) -> (i32, i32) {
    %c0_i32 = arith.constant 0 : i32
    %c0_i32_0 = arith.constant 0 : i32
    %c0_i32_1 = arith.constant 0 : i32
    return %c0_i32, %c0_i32_0 : i32, i32
  }
  func.func @transform_2(%arg0: i32) -> (i32, i32, i32) {
    %c0_i32 = arith.constant 0 : i32
    %c0_i32_0 = arith.constant 0 : i32
    %c0_i32_1 = arith.constant 0 : i32
    %c0_i32_2 = arith.constant 0 : i32
    return %c0_i32, %c0_i32_0, %c0_i32_1 : i32, i32, i32
  }
  func.func @transform_3(%arg0: i32) -> (i32, i32) {
    %c0_i32 = arith.constant 0 : i32
    %c0_i32_0 = arith.constant 0 : i32
    %c0_i32_1 = arith.constant 0 : i32
    return %c0_i32, %c0_i32_0 : i32, i32
  }
  func.func @transform_4(%arg0: i32) -> (i32, i32) {
    %c0_i32 = arith.constant 0 : i32
    %c0_i32_0 = arith.constant 0 : i32
    %c0_i32_1 = arith.constant 0 : i32
    return %c0_i32, %c0_i32_0 : i32, i32
  }
  func.func @transform_5(%arg0: i32) -> (i32, i32) {
    %c0_i32 = arith.constant 0 : i32
    %c0_i32_0 = arith.constant 0 : i32
    %c0_i32_1 = arith.constant 0 : i32
    return %c0_i32, %c0_i32_0 : i32, i32
  }
  func.func @transform_6(%arg0: i32) -> (i32, i32) {
    %c0_i32 = arith.constant 0 : i32
    %c0_i32_0 = arith.constant 0 : i32
    %c0_i32_1 = arith.constant 0 : i32
    return %c0_i32, %c0_i32_0 : i32, i32
  }
  func.func @transform_7(%arg0: i32) -> (i32, i32) {
    %c0_i32 = arith.constant 0 : i32
    %c0_i32_0 = arith.constant 0 : i32
    %c0_i32_1 = arith.constant 0 : i32
    return %c0_i32, %c0_i32_0 : i32, i32
  }
  func.func @transform_8(%arg0: i32) -> (i32, i32) {
    %c0_i32 = arith.constant 0 : i32
    %c0_i32_0 = arith.constant 0 : i32
    %c0_i32_1 = arith.constant 0 : i32
    return %c0_i32, %c0_i32_0 : i32, i32
  }
  func.func @transform_9(%arg0: i32) -> (i32, i32) {
    %c0_i32 = arith.constant 0 : i32
    %c0_i32_0 = arith.constant 0 : i32
    %c0_i32_1 = arith.constant 0 : i32
    return %c0_i32, %c0_i32_0 : i32, i32
  }
  func.func @transform_10(%arg0: i32) -> (i32, i32) {
    %c0_i32 = arith.constant 0 : i32
    %c0_i32_0 = arith.constant 0 : i32
    %c0_i32_1 = arith.constant 0 : i32
    return %c0_i32, %c0_i32_0 : i32, i32
  }
  func.func @transform_11(%arg0: i32) -> (i32, i32) {
    %c0_i32 = arith.constant 0 : i32
    %c0_i32_0 = arith.constant 0 : i32
    %c0_i32_1 = arith.constant 0 : i32
    return %c0_i32, %c0_i32_0 : i32, i32
  }
  func.func @transform_12(%arg0: i32) -> (i32, i32) {
    %c0_i32 = arith.constant 0 : i32
    %c0_i32_0 = arith.constant 0 : i32
    %c0_i32_1 = arith.constant 0 : i32
    return %c0_i32, %c0_i32_0 : i32, i32
  }
  func.func @transform_13(%arg0: i32) -> (i32, i32) {
    %c0_i32 = arith.constant 0 : i32
    %c0_i32_0 = arith.constant 0 : i32
    %c0_i32_1 = arith.constant 0 : i32
    return %c0_i32, %c0_i32_0 : i32, i32
  }
  func.func @transform_14(%arg0: i32) -> (i32, i32) {
    %c0_i32 = arith.constant 0 : i32
    %c0_i32_0 = arith.constant 0 : i32
    %c0_i32_1 = arith.constant 0 : i32
    return %c0_i32, %c0_i32_0 : i32, i32
  }
  func.func @transform_15(%arg0: i32) -> (i32, i32) {
    %c0_i32 = arith.constant 0 : i32
    %c0_i32_0 = arith.constant 0 : i32
    %c0_i32_1 = arith.constant 0 : i32
    return %c0_i32, %c0_i32_0 : i32, i32
  }
  func.func @transform_16(%arg0: i32) -> (i32, i32) {
    %c0_i32 = arith.constant 0 : i32
    %c0_i32_0 = arith.constant 0 : i32
    %c0_i32_1 = arith.constant 0 : i32
    return %c0_i32, %c0_i32_0 : i32, i32
  }
  func.func @transform_17(%arg0: i32) -> (i32, i32) {
    %c0_i32 = arith.constant 0 : i32
    %c0_i32_0 = arith.constant 0 : i32
    %c0_i32_1 = arith.constant 0 : i32
    return %c0_i32, %c0_i32_0 : i32, i32
  }
  func.func @transform_18(%arg0: i32) -> (i32, i32) {
    %c0_i32 = arith.constant 0 : i32
    %c0_i32_0 = arith.constant 0 : i32
    %c0_i32_1 = arith.constant 0 : i32
    return %c0_i32, %c0_i32_0 : i32, i32
  }
  func.func @transform_19(%arg0: i32) -> (i32, i32) {
    %c0_i32 = arith.constant 0 : i32
    %c0_i32_0 = arith.constant 0 : i32
    %c0_i32_1 = arith.constant 0 : i32
    return %c0_i32, %c0_i32_0 : i32, i32
  }
  func.func @transform_20(%arg0: i32) -> (i32, i32) {
    %c0_i32 = arith.constant 0 : i32
    %c0_i32_0 = arith.constant 0 : i32
    %c0_i32_1 = arith.constant 0 : i32
    return %c0_i32, %c0_i32_0 : i32, i32
  }
  func.func @transform_21(%arg0: i32) -> (i32, i32, i32) {
    %c0_i32 = arith.constant 0 : i32
    %c0_i32_0 = arith.constant 0 : i32
    %c0_i32_1 = arith.constant 0 : i32
    return %arg0, %c0_i32, %c0_i32_0 : i32, i32, i32
  }
}

</mosaic_0001>

<bundles_post_ra>
// kernel: forward.1
= control target key start
LH: loop header
LB: loop body
LE: loop exit
PB: predicated region body
PF: predicated region fallthrough
CT: control target
= control target key end

     0   :  { %s9299_s26 = smov 0   ;;  %s11890_s0 = inlined_call_operand.vmem [shape: f32[8,20,20], index: 0, kind: input, shape index: {}]   ;;  %s11891_s1 = inlined_call_operand.vmem [shape: f32[96,20], index: 1, kind: input, shape index: {}]   ;;  %s11892_s2 = inlined_call_operand.vmem [shape: f32[6,20,144], index: 2, kind: input, shape index: {}]   ;;  %s11893_s3 = inlined_call_operand.vmem [shape: f32[1,144], index: 3, kind: input, shape index: {}]   ;;  %s11894_s4 = inlined_call_operand.vmem [shape: f32[88,9], index: 4, kind: input, shape index: {}]   ;;  %s11895_s5 = inlined_call_operand.vmem [shape: f32[88,144], index: 5, kind: input, shape index: {}]   ;;  %s11896_s6 = inlined_call_operand.vmem [shape: f32[144,16], index: 6, kind: input, shape index: {}]   ;;  %s11897_s7 = inlined_call_operand.vmem [shape: bf16[1152,88], index: 7, kind: input, shape index: {}]   ;;  %s11898_s8 = inlined_call_operand.vmem [shape: f32[144,32], index: 8, kind: input, shape index: {}]   ;;  %s11899_s9 = inlined_call_operand.vmem [shape: f32[1,32], index: 9, kind: input, shape index: {}]   ;;  %s11900_s10 = inlined_call_operand.vmem [shape: bf16[576,32], index: 10, kind: input, shape index: {}]   ;;  %s11901_s11 = inlined_call_operand.vmem [shape: f32[288,64], index: 11, kind: input, shape index: {}]   ;;  %s11902_s12 = inlined_call_operand.vmem [shape: f32[1,64], index: 12, kind: input, shape index: {}]   ;;  %s11903_s13 = inlined_call_operand.vmem [shape: bf16[288,16], index: 13, kind: input, shape index: {}]   ;;  %s11904_s14 = inlined_call_operand.vmem [shape: f32[576,128], index: 14, kind: input, shape index: {}]   ;;  %s11905_s15 = inlined_call_operand.vmem [shape: f32[1,128], index: 15, kind: input, shape index: {}]   ;;  %s11906_s16 = inlined_call_operand.vmem [shape: f32[128,512], index: 16, kind: input, shape index: {}]   ;;  %s11907_s17 = inlined_call_operand.vmem [shape: f32[1,128], index: 17, kind: input, shape index: {}]   ;;  %s11908_s18 = inlined_call_operand.vmem [shape: f32[4,512], index: 18, kind: input, shape index: {}]   ;;  %s11909_s19 = inlined_call_operand.vmem [shape: f32[1,128], index: 19, kind: input, shape index: {}]   ;;  %s11910_s20 = inlined_call_operand.<no memory space> [shape: f32[1,1], index: 20, kind: input, shape index: {}]   ;;  %s11911_s21 = inlined_call_operand.vmem [shape: f32[8,1,128], index: 21, kind: output, shape index: {}]  }
   0x1   :  { %11928 = sst [smem:[#allocation10_spill]] %s11890_s0  ;;  %v26_v0 = vstv %s11910_s20 }
   0x2   :  { %11929 = sst [smem:[#allocation11_spill]] %s11891_s1  ;;  %27 = vst [vmem:[#allocation2] sm:$0x1] %v26_v0 }
   0x3   :  { %11930 = sst [smem:[#allocation12_spill]] %s11892_s2 }
   0x4   :  { %11931 = sst [smem:[#allocation13_spill]] %s11893_s3 }
   0x5   :  { %11932 = sst [smem:[#allocation14_spill]] %s11894_s4 }
   0x6   :  { %11933 = sst [smem:[#allocation15_spill]] %s11895_s5 }
   0x7   :  { %11934 = sst [smem:[#allocation16_spill]] %s11896_s6 }
   0x8   :  { %11935 = sst [smem:[#allocation17_spill]] %s11897_s7 }
   0x9 LB: > { %s6758_s27 = sadd.s32 4294967295, %s9175_s26   ;;  %p6762_p0 = scmp.ge.s32.totalorder %s9175_s26, 1  ;;  %s9175_s26 = sphi %s9299_s26, %s33_s26  }
   0xa   : > { %p589_p1 = scmp.lt.s32.totalorder %s9175_s26, 9 }
   0xc   : > { %p590_p2 = pnand %p6762_p0, %p589_p1 }
   0xe   : > { %593 = sbr.rel (%p590_p2) target bundleno = 3562 (0xdea), region = 104 }
  0x13   : > { %p647_p3 = scmp.lt.s32.totalorder %s6758_s27, 7  ;;  %s11936_s20 = sld [smem:[#allocation11_spill]]  ;;  %vm670_vm0 = vcmask 162816   ;;  %vm707_vm1 = vcmask 1043456   ;;  %v11922_v22 = vmov 0.0   ;;  %vm1576_vm2 = vcmask 1040384  }
  0x14   : > { %s11937_s22 = sld [smem:[#allocation10_spill]]  ;;  %vm1542_vm3 = vcmask 72704   ;;  %vm1776_vm4 = vcmask 130048   ;;  %vm2218_vm5 = vcmask 719872   ;;  %s9178_s3 = smov 16   ;;  %vm3900_vm6 = vcmask 261120  }
  0x15   : > { %s11974_s27 = smov (!%p647_p3, %s6758_s27), 7  ;;  %s11938_s30 = sld [smem:[#allocation12_spill]]  ;;  %vm3917_vm7 = vcmask 392192   ;;  %vm3934_vm8 = vcmask 523264   ;;  %vm3951_vm9 = vcmask 654336   ;;  %vm3968_vm10 = vcmask 785408  }
  0x16   : > { %s8719_s4 = smul.u32 24, %s11974_s27  ;;  %s11939_s6 = sld [smem:[#allocation16_spill]]  ;;  %vm3985_vm11 = vcmask 916480  }
  0x17   : > { %s11941_s25 = sld [smem:[#allocation13_spill]]  ;;  %s11926_s2 = smov 32  }
  0x18   : > { %s11942_s29 = sld [smem:[#allocation14_spill]]  ;;  %s11920_s28 = smov 64  }
  0x19   : > { %v658_v1 = vld [vmem:[%s11936_s20] sm:$0xff]  ;;  %v668_v2 = vld [vmem:[%s11936_s20 + $0x50] sm:$0xff]  ;;  %v659_v6 = vld [vmem:[%s11936_s20 + $0x8] sm:$0xff]  ;;  %s11943_s24 = sld [smem:[#allocation15_spill]]  ;;  %s9182_s0 = smov 80  }
  0x1a   : > { %8241 = vmatprep.mubr.msk.f32.mxu0 %vm670_vm0, %v658_v1  ;;  %8256 = vmatprep.mubr.msk.f32.mxu1 %vm670_vm0, %v668_v2  ;;  %s651_s23 = scalar_lea.vmem %s11937_s22, %s8719_s4  ;;  %v669_v7 = vld [vmem:[%s11936_s20 + $0x58] sm:$0xff]  ;;  %v660_v8 = vld [vmem:[%s11936_s20 + $0x10] sm:$0xff]  ;;  %v662_v10 = vld [vmem:[%s11936_s20 + $0x20] sm:$0xff]  ;;  %s11944_s7 = sld [smem:[#allocation17_spill]] }
  0x1b   : > { %v657_v3 = vld [vmem:[%s651_s23 + $0x10] sm:$0xf]  ;;  %v656_v4 = vld [vmem:[%s651_s23 + $0x8] sm:$0xff]  ;;  %v655_v5 = vld [vmem:[%s651_s23] sm:$0xff]  ;;  %s11924_s4 = smov 96   ;;  %s9184_s23 = smov 112  }
  0x1c   : > { %8235 = vmatprep.subr.msk.mxu0 %vm707_vm1, %v657_v3  ;;  %8713 = vmatprep.subr.msk.mxu1 %vm707_vm1, %v657_v3  ;;  %v661_v9 = vld [vmem:[%s11936_s20 + $0x18] sm:$0xff]  ;;  %v663_v11 = vld [vmem:[%s11936_s20 + $0x28] sm:$0xff]  ;;  %v664_v12 = vld [vmem:[%s11936_s20 + $0x30] sm:$0xff]  ;;  %s11952_s1 = smov 64  }
  0x1d   : > { %8236 = vmatpush3.msk.msra.mxu0 %vm707_vm1, %v657_v3  ;;  %8716 = vmatpush3.msk.msra.mxu1 %vm707_vm1, %v657_v3  ;;  %v665_v13 = vld [vmem:[%s11936_s20 + $0x38] sm:$0xff]  ;;  %v666_v14 = vld [vmem:[%s11936_s20 + $0x40] sm:$0xff]  ;;  %v667_v15 = vld [vmem:[%s11936_s20 + $0x48] sm:$0xff] }
  0x1e   : > { %8237 = vmatprep.subr.mxu0 %v656_v4  ;;  %8714 = vmatprep.subr.mxu1 %v656_v4  ;;  %v6782_v16 = vld [vmem:[%s11938_s30 + $0x88] sm:$0xf]  ;;  %v6781_v17 = vld [vmem:[%s11938_s30 + $0x80] sm:$0xf]  ;;  %v6780_v18 = vld [vmem:[%s11938_s30 + $0x78] sm:$0xff] }
  0x1f   : > { %8238 = vmatpush3.msra.mxu0 %v656_v4  ;;  %8717 = vmatpush3.msra.mxu1 %v656_v4  ;;  %v6779_v19 = vld [vmem:[%s11938_s30 + $0x70] sm:$0xff]  ;;  %v6778_v20 = vld [vmem:[%s11938_s30 + $0x68] sm:$0xff]  ;;  %v6777_v21 = vld [vmem:[%s11938_s30 + $0x60] sm:$0xff] }
  0x20   : > { %8239 = vmatprep.subr.mxu0 %v655_v5  ;;  %8715 = vmatprep.subr.mxu1 %v655_v5  ;;  %v6800_v23 = vld [vmem:[%s11938_s30 + $0xe8] sm:$0xf]  ;;  %v6799_v24 = vld [vmem:[%s11938_s30 + $0xe0] sm:$0xf]  ;;  %v6798_v25 = vld [vmem:[%s11938_s30 + $0xd8] sm:$0xff] }
  0x21   : > { %8240 = vmatpush3.msra.mxu0 %v655_v5  ;;  %8718 = vmatpush3.msra.mxu1 %v655_v5  ;;  %v6797_v26 = vld [vmem:[%s11938_s30 + $0xd0] sm:$0xff]  ;;  %v6796_v27 = vld [vmem:[%s11938_s30 + $0xc8] sm:$0xff]  ;;  %v6795_v28 = vld [vmem:[%s11938_s30 + $0xc0] sm:$0xff] }
  0x22   : > { %8242 = vmatmul.mubr.msk.f32.vlgmr.msra.gmra.mxu0 %vm670_vm0, %v659_v6  ;;  %8257 = vmatmul.mubr.msk.f32.vlgmr.msra.gmra.mxu1 %vm670_vm0, %v669_v7  ;;  %v841_v29 = vld [vmem:[%s11938_s30 + $0x28] sm:$0xf]  ;;  %v6812_v30 = vld [vmem:[%s11938_s30 + $0x58] sm:$0xf]  ;;  %v840_v36 = vld [vmem:[%s11938_s30 + $0x20] sm:$0xf] }
  0x23   : > { %8244 = vmatprep.mubr.msk.f32.mxu0 %vm670_vm0, %v660_v8  ;;  %6783 = vmatprep.subr.msk.mxu1 %vm707_vm1, %v6782_v16  ;;  %v839_v38 = vld [vmem:[%s11938_s30 + $0x18] sm:$0xff]  ;;  %v838_v39 = vld [vmem:[%s11938_s30 + $0x10] sm:$0xff]  ;;  %v837_v41 = vld [vmem:[%s11938_s30 + $0x8] sm:$0xff] }
  0x24   : > { %6784 = vmatpush1.msk.msra.mxu1 %vm707_vm1, %v6781_v17  ;;  %931 = vmatprep.mubr.f32.mxu1 %v11922_v22  ;;  %v836_v42 = vld [vmem:[%s11938_s30] sm:$0xff]  ;;  %v6818_v44 = vld [vmem:[%s11938_s30 + $0xb8] sm:$0xf]  ;;  %v6811_v47 = vld [vmem:[%s11938_s30 + $0x50] sm:$0xf] }
  0x25   : > { %895 = vmatprep.subr.mxu1 %v6780_v18  ;;  %6801 = vmatprep.subr.msk.mxu0 %vm707_vm1, %v6800_v23  ;;  %v6810_v48 = vld [vmem:[%s11938_s30 + $0x48] sm:$0xff]  ;;  %v6809_v50 = vld [vmem:[%s11938_s30 + $0x40] sm:$0xff]  ;;  %v6808_v51 = vld [vmem:[%s11938_s30 + $0x38] sm:$0xff] }
  0x26   : > { %8245 = vmatmul.mubr.msk.f32.gmra.mxu0 %vm670_vm0, %v661_v9  ;;  %896 = vmatpush1.msra.mxu1 %v6779_v19  ;;  %v6807_v53 = vld [vmem:[%s11938_s30 + $0x30] sm:$0xff]  ;;  %v6816_v55 = vld [vmem:[%s11938_s30 + $0xa8] sm:$0xff]  ;;  %v6815_v56 = vld [vmem:[%s11938_s30 + $0xa0] sm:$0xff] }
  0x27   : > { %8247 = vmatprep.mubr.msk.f32.mxu0 %vm670_vm0, %v662_v10  ;;  %897 = vmatprep.subr.mxu1 %v6778_v20  ;;  %v6817_v54 = vld [vmem:[%s11938_s30 + $0xb0] sm:$0xf]  ;;  %v6814_v57 = vld [vmem:[%s11938_s30 + $0x98] sm:$0xff]  ;;  %v6834_v61 = vld [vmem:[%s11938_s30 + $0x108] sm:$0xff] }
  0x28   : > { %898 = vmatpush1.msra.mxu1 %v6777_v21  ;;  %6802 = vmatpush1.msk.msra.mxu0 %vm707_vm1, %v6799_v24  ;;  %v6813_v58 = vld [vmem:[%s11938_s30 + $0x90] sm:$0xff]  ;;  %v6836_v59 = vld [vmem:[%s11938_s30 + $0x118] sm:$0xf]  ;;  %v6833_v62 = vld [vmem:[%s11938_s30 + $0x100] sm:$0xff] }
  0x29   : > { %1116 = vmatprep.subr.mxu0 %v6798_v25  ;;  %6789 = vmatprep.subr.msk.mxu1 %vm707_vm1, %v841_v29  ;;  %v6835_v60 = vld [vmem:[%s11938_s30 + $0x110] sm:$0xf]  ;;  %v6832_v63 = vld [vmem:[%s11938_s30 + $0xf8] sm:$0xff]  ;;  %v1771_v3 = vld [vmem:[%s11939_s6 + $0x68] sm:$0xff] }
  0x2a   : > { %8248 = vmatmul.mubr.msk.f32.gmra.mxu0 %vm670_vm0, %v663_v11  ;;  %v6831_v0 = vld [vmem:[%s11938_s30 + $0xf0] sm:$0xff]  ;;  %v1773_v1 = vld [vmem:[%s11939_s6 + $0x78] sm:$0xff]  ;;  %v1770_v4 = vld [vmem:[%s11939_s6 + $0x60] sm:$0xff] }
  0x2b   : > { %8250 = vmatprep.mubr.msk.f32.mxu0 %vm670_vm0, %v664_v12  ;;  %1117 = vmatpush1.msra.mxu0 %v6797_v26  ;;  %v1772_v2 = vld [vmem:[%s11939_s6 + $0x70] sm:$0xff]  ;;  %v1769_v5 = vld [vmem:[%s11939_s6 + $0x58] sm:$0xff]  ;;  %v1767_v7 = vld [vmem:[%s11939_s6 + $0x48] sm:$0xff] }
  0x2c   : > { %1118 = vmatprep.subr.mxu0 %v6796_v27  ;;  %v1768_v6 = vld [vmem:[%s11939_s6 + $0x50] sm:$0xff]  ;;  %v1766_v9 = vld [vmem:[%s11939_s6 + $0x40] sm:$0xff]  ;;  %v1765_v11 = vld [vmem:[%s11939_s6 + $0x38] sm:$0xff] }
  0x2d   : > { %1119 = vmatpush1.msra.mxu0 %v6795_v28  ;;  %v1762_v18 = vld [vmem:[%s11939_s6 + $0x20] sm:$0xff]  ;;  %v1761_v21 = vld [vmem:[%s11939_s6 + $0x18] sm:$0xff]  ;;  %v1760_v25 = vld [vmem:[%s11939_s6 + $0x10] sm:$0xff] }
  0x2e   : > { %8251 = vmatmul.mubr.msk.f32.gmra.mxu0 %vm670_vm0, %v665_v13  ;;  %6825 = vmatprep.subr.msk.mxu0 %vm707_vm1, %v6812_v30  ;;  %v1764_v13 = vld [vmem:[%s11939_s6 + $0x30] sm:$0xff]  ;;  %v1759_v28 = vld [vmem:[%s11939_s6 + $0x8] sm:$0xff] }
  0x2f   : > { %8253 = vmatprep.mubr.msk.f32.mxu0 %vm670_vm0, %v666_v14 }
  0x32   : > { %8254 = vmatmul.mubr.msk.f32.gmra.mxu0 %vm670_vm0, %v667_v15  ;;  %v1763_v15 = vld [vmem:[%s11939_s6 + $0x28] sm:$0xff] }
  0x33   : > { %1152 = vmatprep.mubr.f32.mxu0 %v11922_v22 }
  0xe2   : > { %v9415_v31 = vpop.f32.mrf.mxu0  ;;  %v9473_v49 = vpop.f32.mrf.mxu1 }
  0xe4   : > { %v9417_v32 = vpop.f32.mrf.mxu0  ;;  %v827_v52 = vpop.f32.mrf.mxu1 }
  0xe6   : > { %v9419_v33 = vpop.f32.mrf.mxu0 }
  0xe8   : > { %v9421_v34 = vpop.f32.mrf.mxu0 }
  0xea   : > { %v9423_v35 = vpop.f32.mrf.mxu0 }
  0xec   : > { %v9428_v37 = vpop.f32.mrf.mxu0 }
  0xed   : > { %6785 = vmatmul.mubr.msk.f32.vlgmr.msra.gmra.mxu1 %vm670_vm0, %v9428_v37 }
  0xee   : > { %v9438_v40 = vpop.f32.mrf.mxu0  ;;  %937 = vmatprep.mubr.f32.mxu1 %v11922_v22  ;;  %6790 = vmatpush1.msk.msra.mxu1 %vm707_vm1, %v840_v36 }
  0xef   : > { %1002 = vmatprep.subr.mxu1 %v839_v38 }
  0xf0   : > { %v9448_v43 = vpop.f32.mrf.mxu0  ;;  %1003 = vmatpush1.msra.mxu1 %v838_v39 }
  0xf1   : > { %6786 = vmatmul.mubr.msk.f32.gmra.mxu1 %vm670_vm0, %v9423_v35  ;;  %1004 = vmatprep.subr.mxu1 %v837_v41 }
  0xf2   : > { %v9455_v45 = vpop.f32.mrf.mxu0  ;;  %943 = vmatprep.mubr.f32.mxu1 %v11922_v22  ;;  %1005 = vmatpush1.msra.mxu1 %v836_v42 }
  0xf3   : > { %6819 = vmatprep.subr.msk.mxu1 %vm707_vm1, %v6818_v44 }
  0xf4   : > { %v9459_v46 = vpop.f32.mrf.mxu0 }
  0xf5   : > { %6787 = vmatmul.mubr.msk.f32.gmra.mxu1 %vm670_vm0, %v9448_v43  ;;  %6803 = vmatmul.mubr.msk.f32.vlgmr.msra.gmra.mxu0 %vm670_vm0, %v9459_v46 }
  0xf6   : > { %949 = vmatprep.mubr.f32.mxu1 %v11922_v22  ;;  %1158 = vmatprep.mubr.f32.mxu0 %v11922_v22 }
  0xf7   : > { %6826 = vmatpush1.msk.msra.mxu0 %vm707_vm1, %v6811_v47 }
  0xf8   : > { %1328 = vmatprep.subr.mxu0 %v6810_v48 }
  0xf9   : > { %6788 = vmatmul.mubr.msk.f32.gmra.mxu1 %vm670_vm0, %v9438_v40  ;;  %6804 = vmatmul.mubr.msk.f32.gmra.mxu0 %vm670_vm0, %v9455_v45 }
  0xfa   : > { %1038 = vmatprep.mubr.f32.mxu1 %v11922_v22  ;;  %1164 = vmatprep.mubr.f32.mxu0 %v11922_v22 }
  0xfb   : > { %1329 = vmatpush1.msra.mxu0 %v6809_v50 }
  0xfc   : > { %1330 = vmatprep.subr.mxu0 %v6808_v51 }
  0xfd   : > { %6791 = vmatmul.mubr.msk.f32.vlgmr.msra.gmra.mxu1 %vm670_vm0, %v9417_v32  ;;  %6805 = vmatmul.mubr.msk.f32.gmra.mxu0 %vm670_vm0, %v827_v52 }
  0xfe   : > { %1044 = vmatprep.mubr.f32.mxu1 %v11922_v22  ;;  %1170 = vmatprep.mubr.f32.mxu0 %v11922_v22 }
  0xff   : > { %1331 = vmatpush1.msra.mxu0 %v6807_v53  ;;  %6820 = vmatpush1.msk.msra.mxu1 %vm707_vm1, %v6817_v54  ;;  %v1513_v53 = vlaneseq }
 0x100   : > { %1233 = vmatprep.subr.mxu1 %v6816_v55 }
 0x101   : > { %6792 = vmatmul.mubr.msk.f32.gmra.mxu1 %vm670_vm0, %v9415_v31  ;;  %6806 = vmatmul.mubr.msk.f32.gmra.mxu0 %vm670_vm0, %v9473_v49 }
 0x102   : > { %1050 = vmatprep.mubr.f32.mxu1 %v11922_v22  ;;  %1364 = vmatprep.mubr.f32.mxu0 %v11922_v22 }
 0x103   : > { %1234 = vmatpush1.msra.mxu1 %v6815_v56 }
 0x104   : > { %1235 = vmatprep.subr.mxu1 %v6814_v57  ;;  %v9653_v57 = vshrl.u32 %v1513_v53, 7 }
 0x105   : > { %6793 = vmatmul.mubr.msk.f32.gmra.mxu1 %vm670_vm0, %v9421_v34  ;;  %6827 = vmatmul.mubr.msk.f32.vlgmr.msra.gmra.mxu0 %vm670_vm0, %v9417_v32 }
 0x106   : > { %1056 = vmatprep.mubr.f32.mxu1 %v11922_v22  ;;  %1370 = vmatprep.mubr.f32.mxu0 %v11922_v22  ;;  %11940 = vst [vmem:[#allocation3_spill] sm:$0xff] %v9653_v57 }
 0x107   : > { %1236 = vmatpush1.msra.mxu1 %v6813_v58 }
 0x108   : > { %6837 = vmatprep.subr.msk.mxu1 %vm707_vm1, %v6836_v59 }
 0x109   : > { %6794 = vmatmul.mubr.msk.f32.gmra.mxu1 %vm670_vm0, %v9419_v33  ;;  %6828 = vmatmul.mubr.msk.f32.gmra.mxu0 %vm670_vm0, %v9415_v31 }
 0x10a   : > { %1269 = vmatprep.mubr.f32.mxu1 %v11922_v22  ;;  %1376 = vmatprep.mubr.f32.mxu0 %v11922_v22 }
 0x10d   : > { %6821 = vmatmul.mubr.msk.f32.vlgmr.msra.gmra.mxu1 %vm670_vm0, %v9428_v37  ;;  %6829 = vmatmul.mubr.msk.f32.gmra.mxu0 %vm670_vm0, %v9421_v34 }
 0x10e   : > { %1275 = vmatprep.mubr.f32.mxu1 %v11922_v22  ;;  %1382 = vmatprep.mubr.f32.mxu0 %v11922_v22 }
 0x10f   : > { %6838 = vmatpush1.msk.msra.mxu1 %vm707_vm1, %v6835_v60 }
 0x110   : > { %1430 = vmatprep.subr.mxu1 %v6834_v61 }
 0x111   : > { %6822 = vmatmul.mubr.msk.f32.gmra.mxu1 %vm670_vm0, %v9423_v35  ;;  %6830 = vmatmul.mubr.msk.f32.gmra.mxu0 %vm670_vm0, %v9419_v33 }
 0x112   : > { %1281 = vmatprep.mubr.f32.mxu1 %v11922_v22  ;;  %1431 = vmatpush1.msra.mxu1 %v6833_v62 }
 0x113   : > { %1432 = vmatprep.subr.mxu1 %v6832_v63  ;;  %1647 = vmatprep.mubr.f32.mxu0 %v11922_v22 }
 0x114   : > { %1433 = vmatpush1.msra.mxu1 %v6831_v0 }
 0x115   : > { %6823 = vmatmul.mubr.msk.f32.gmra.mxu1 %vm670_vm0, %v9448_v43  ;;  %1810 = vmatprep.subr.mxu1 %v11922_v22 }
 0x116   : > { %1287 = vmatprep.mubr.f32.mxu1 %v11922_v22 }
 0x119   : > { %6824 = vmatmul.mubr.msk.f32.gmra.mxu1 %vm670_vm0, %v9438_v40 }
 0x11a   : > { %1466 = vmatprep.mubr.f32.mxu1 %v11922_v22 }
 0x11d   : > { %6839 = vmatmul.mubr.msk.f32.vlgmr.msra.gmra.mxu1 %vm670_vm0, %v9459_v46 }
 0x11e   : > { %1472 = vmatprep.mubr.f32.mxu1 %v11922_v22  ;;  %1811 = vmatpush1.msra.mxu1 %v1773_v1 }
 0x11f   : > { %1812 = vmatprep.subr.mxu1 %v11922_v22 }
 0x120   : > { %1813 = vmatpush1.msra.mxu1 %v1772_v2  ;;  %v1515_v2 = vsub.s32 0, %v9653_v57 }
 0x121   : > { %6840 = vmatmul.mubr.msk.f32.gmra.mxu1 %vm670_vm0, %v9455_v45  ;;  %1814 = vmatprep.subr.mxu1 %v11922_v22 }
 0x122   : > { %1478 = vmatprep.mubr.f32.mxu1 %v11922_v22  ;;  %1815 = vmatpush1.msra.mxu1 %v1771_v3  ;;  %v1519_v3 = vsub.s32 1, %v9653_v57 }
 0x123   : > { %1816 = vmatprep.subr.mxu1 %v11922_v22 }
 0x124   : > { %1817 = vmatpush1.msra.mxu1 %v1770_v4 }
 0x125   : > { %6841 = vmatmul.mubr.msk.f32.gmra.mxu1 %vm670_vm0, %v827_v52  ;;  %1818 = vmatprep.subr.mxu1 %v11922_v22 }
 0x126   : > { %1484 = vmatprep.mubr.f32.mxu1 %v11922_v22  ;;  %1819 = vmatpush1.msra.mxu1 %v1769_v5 }
 0x127   : > { %1820 = vmatprep.subr.mxu1 %v11922_v22 }
 0x128   : > { %1821 = vmatpush1.msra.mxu1 %v1768_v6 }
 0x129   : > { %6842 = vmatmul.mubr.msk.f32.gmra.mxu1 %vm670_vm0, %v9473_v49  ;;  %1822 = vmatprep.subr.mxu1 %v11922_v22 }
 0x12a   : > { %1823 = vmatpush1.msra.mxu1 %v1767_v7 }
 0x12b   : > { %1824 = vmatprep.subr.mxu1 %v11922_v22 }
 0x12c   : > { %1825 = vmatpush1.msra.mxu1 %v1766_v9 }
 0x12d   : > { %1826 = vmatprep.subr.mxu1 %v11922_v22 }
 0x12e   : > { %1827 = vmatpush1.msra.mxu1 %v1765_v11 }
 0x12f   : > { %1828 = vmatprep.subr.mxu1 %v11922_v22 }
 0x130   : > { %1829 = vmatpush1.msra.mxu1 %v1764_v13 }
 0x131   : > { %1830 = vmatprep.subr.mxu1 %v11922_v22 }
 0x132   : > { %1831 = vmatpush1.msra.mxu1 %v1763_v15 }
 0x133   : > { %1832 = vmatprep.subr.mxu1 %v11922_v22 }
 0x134   : > { %1833 = vmatpush1.msra.mxu1 %v1762_v18 }
 0x135   : > { %1834 = vmatprep.subr.mxu1 %v11922_v22 }
 0x136   : > { %1835 = vmatpush1.msra.mxu1 %v1761_v21 }
 0x137   : > { %1836 = vmatprep.subr.mxu1 %v11922_v22 }
 0x138   : > { %1837 = vmatpush1.msra.mxu1 %v1760_v25 }
 0x139   : > { %1838 = vmatprep.subr.mxu1 %v11922_v22 }
 0x13a   : > { %1839 = vmatpush1.msra.mxu1 %v1759_v28 }
 0x13b   : > { %1840 = vmatprep.subr.mxu1 %v11922_v22 }
 0x1ad   : > { %v9605_v8 = vpop.f32.mrf.mxu1 }
 0x1af   : > { %v9611_v10 = vpop.f32.mrf.mxu1 }
 0x1b1   : > { %v9617_v12 = vpop.f32.mrf.mxu1 }
 0x1b3   : > { %v9623_v14 = vpop.f32.mrf.mxu1 }
 0x1b5   : > { %v9629_v16 = vpop.f32.mrf.mxu1  ;;  %v9631_v17 = vpop.f32.mrf.mxu0 }
 0x1b7   : > { %v947_v19 = vpop.f32.mrf.mxu1  ;;  %v1156_v20 = vpop.f32.mrf.mxu0 }
 0x1b9   : > { %v951_v23 = vpop.f32.mrf.mxu1  ;;  %v1160_v24 = vpop.f32.mrf.mxu0 }
 0x1bb   : > { %v953_v26 = vpop.f32.mrf.mxu1  ;;  %v9645_v27 = vpop.f32.mrf.mxu0 }
 0x1bd   : > { %v1040_v29 = vpop.f32.mrf.mxu1  ;;  %v1166_v30 = vpop.f32.mrf.mxu0 }
 0x1be   : > { %v1041_v1 = vadd.f32 %v1040_v29, %v9605_v8 }
 0x1bf   : > { %v1042_v31 = vpop.f32.mrf.mxu1  ;;  %v1168_v32 = vpop.f32.mrf.mxu0 }
 0x1c0   : > { %v1043_v58 = vadd.f32 %v1042_v31, %v9611_v10 }
 0x1c1   : > { %v1046_v33 = vpop.f32.mrf.mxu1  ;;  %v1172_v35 = vpop.f32.mrf.mxu0 }
 0x1c2   : > { %v1047_v61 = vadd.f32 %v1046_v33, %v9617_v12  ;;  %v1178_v4 = vadd.f32 %v1156_v20, %v1043_v58 }
 0x1c3   : > { %v1048_v34 = vpop.f32.mrf.mxu1  ;;  %v1174_v38 = vpop.f32.mrf.mxu0 }
 0x1c4   : > { %v1179_v11 = vadd.f32 %v1160_v24, %v1047_v61  ;;  %v1049_v13 = vadd.f32 %v1048_v34, %v9623_v14 }
 0x1c5   : > { %v1052_v36 = vpop.f32.mrf.mxu1  ;;  %v1366_v41 = vpop.f32.mrf.mxu0 }
 0x1c6   : > { %v1053_v5 = vadd.f32 %v1052_v36, %v9629_v16 }
 0x1c7   : > { %v1054_v37 = vpop.f32.mrf.mxu1  ;;  %v1368_v44 = vpop.f32.mrf.mxu0 }
 0x1c8   : > { %v1055_v62 = vadd.f32 %v1054_v37, %v947_v19  ;;  %v1181_v31 = vadd.f32 %v1166_v30, %v1053_v5  ;;  %v1511_v30 = vld [vmem:[%s11941_s25] sm:$0x3]  ;;  %v1538_v5 = vld [vmem:[%s11942_s29 + $0x38] sm:$0xff]  ;;  %s11916_s25 = smov 48  }
 0x1c9   : > { %v1058_v39 = vpop.f32.mrf.mxu1  ;;  %v1372_v47 = vpop.f32.mrf.mxu0 }
 0x1ca   : > { %v1059_v63 = vadd.f32 %v1058_v39, %v951_v23  ;;  %v1182_v18 = vadd.f32 %v1168_v32, %v1055_v62  ;;  %v1177_v32 = vadd.f32 %v9631_v17, %v1041_v1  ;;  %v1531_v62 = vld [vmem:[%s11942_s29] sm:$0xff]  ;;  %v1534_v1 = vld [vmem:[%s11942_s29 + $0x18] sm:$0xff] }
 0x1cb   : > { %v1060_v40 = vpop.f32.mrf.mxu1  ;;  %v1374_v50 = vpop.f32.mrf.mxu0 }
 0x1cc   : > { %v1061_v6 = vadd.f32 %v1060_v40, %v953_v26  ;;  %v1183_v19 = vadd.f32 %v1172_v35, %v1059_v63  ;;  %v1180_v35 = vadd.f32 %v9645_v27, %v1049_v13  ;;  %v1500_v40 = vmax.f32 %v1178_v4, %v1182_v18  ;;  %v1532_v63 = vld [vmem:[%s11942_s29 + $0x8] sm:$0xff]  ;;  %v1537_v4 = vld [vmem:[%s11942_s29 + $0x30] sm:$0xff]  ;;  %v1774_v13 = vld [vmem:[%s11939_s6 + $0x80] sm:$0xff] }
 0x1cd   : > { %v1271_v42 = vpop.f32.mrf.mxu1  ;;  %v1378_v54 = vpop.f32.mrf.mxu0  ;;  %v1714_v18 = vld [vmem:[%s11943_s24] sm:$0xff] }
 0x1ce   : > { %v1367_v21 = vadd.f32 %v1366_v41, %v1271_v42  ;;  %v1184_v16 = vadd.f32 %v1174_v38, %v1061_v6  ;;  %v1539_v6 = vld [vmem:[%s11942_s29 + $0x40] sm:$0xff] }
 0x1cf   : > { %v1273_v43 = vpop.f32.mrf.mxu1  ;;  %v1380_v59 = vpop.f32.mrf.mxu0 }
 0x1d0   : > { %v1369_v12 = vadd.f32 %v1368_v44, %v1273_v43  ;;  %v1501_v43 = vmax.f32 %v1179_v11, %v1183_v19  ;;  %v1775_v11 = vld [vmem:[%s11939_s6 + $0x88] sm:$0xff] }
 0x1d1   : > { %v1277_v45 = vpop.f32.mrf.mxu1  ;;  %v1384_v7 = vpop.f32.mrf.mxu0 }
 0x1d2   : > { %v1373_v25 = vadd.f32 %v1372_v47, %v1277_v45  ;;  %v1520_v47 = vrot.slane %v1511_v30, %v1519_v3  ;;  %v1536_v3 = vld [vmem:[%s11942_s29 + $0x28] sm:$0xff] }
 0x1d3   : > { %v1279_v46 = vpop.f32.mrf.mxu1  ;;  %v1386_v33 = vpop.f32.mrf.mxu0 }
 0x1d4   : > { %v1375_v26 = vadd.f32 %v1374_v50, %v1279_v46  ;;  %v1499_v46 = vmax.f32 %v1177_v32, %v1181_v31 }
 0x1d5   : > { %v1283_v48 = vpop.f32.mrf.mxu1 }
 0x1d6   : > { %v1379_v9 = vadd.f32 %v1378_v54, %v1283_v48  ;;  %v1502_v48 = vmax.f32 %v1180_v35, %v1184_v16 }
 0x1d7   : > { %v1285_v49 = vpop.f32.mrf.mxu1 }
 0x1d8   : > { %v1381_v15 = vadd.f32 %v1380_v59, %v1285_v49 }
 0x1d9   : > { %v1289_v51 = vpop.f32.mrf.mxu1 }
 0x1da   : > { %v1385_v28 = vadd.f32 %v1384_v7, %v1289_v51  ;;  %v1540_v7 = vld [vmem:[%s11942_s29 + $0x48] sm:$0xff] }
 0x1db   : > { %v1291_v52 = vpop.f32.mrf.mxu1 }
 0x1dc   : > { %v1387_v24 = vadd.f32 %v1386_v33, %v1291_v52  ;;  %v1516_v52 = vrot.slane %v1511_v30, %v1515_v2  ;;  %v1535_v2 = vld [vmem:[%s11942_s29 + $0x20] sm:$0xff] }
 0x1dd   : > { %v1468_v55 = vpop.f32.mrf.mxu1  ;;  %v1718_v33 = vld [vmem:[%s11943_s24 + $0x20] sm:$0xff] }
 0x1de   : > { %v1491_v36 = vadd.f32 %v1468_v55, %v1367_v21 }
 0x1df   : > { %v1470_v56 = vpop.f32.mrf.mxu1 }
 0x1e0   : > { %v1492_v29 = vadd.f32 %v1470_v56, %v1369_v12 }
 0x1e1   : > { %v1474_v60 = vpop.f32.mrf.mxu1 }
 0x1e2   : > { %v1493_v39 = vadd.f32 %v1474_v60, %v1373_v25  ;;  %v1717_v25 = vld [vmem:[%s11943_s24 + $0x18] sm:$0xff] }
 0x1e3   : > { %v1476_v0 = vpop.f32.mrf.mxu1 }
 0x1e4   : > { %v1494_v44 = vadd.f32 %v1476_v0, %v1375_v26  ;;  %v1533_v0 = vld [vmem:[%s11942_s29 + $0x10] sm:$0xff]  ;;  %v1719_v26 = vld [vmem:[%s11943_s24 + $0x28] sm:$0xff] }
 0x1e5   : > { %v1480_v10 = vpop.f32.mrf.mxu1 }
 0x1e6   : > { %v1495_v8 = vadd.f32 %v1480_v10, %v1379_v9  ;;  %v1541_v9 = vld [vmem:[%s11942_s29 + $0x50] sm:$0xff]  ;;  %v1758_v10 = vld [vmem:[%s11939_s6] sm:$0xff] }
 0x1e7   : > { %v1482_v23 = vpop.f32.mrf.mxu1  ;;  %1841 = vmatpush1.msra.mxu1 %v1758_v10 }
 0x1e8   : > { %v1496_v20 = vadd.f32 %v1482_v23, %v1381_v15  ;;  %v1503_v41 = vmax.f32 %v1491_v36, %v1495_v8  ;;  %1870 = vmatprep.subr.mxu1 %v11922_v22  ;;  %v1715_v15 = vld [vmem:[%s11943_s24 + $0x8] sm:$0xff] }
 0x1e9   : > { %v1486_v37 = vpop.f32.mrf.mxu1  ;;  %1871 = vmatpush2.msra.mxu1 %v1775_v11 }
 0x1ea   : > { %v1504_v14 = vmax.f32 %v1492_v29, %v1496_v20  ;;  %v1497_v34 = vadd.f32 %v1486_v37, %v1385_v28  ;;  %v1507_v17 = vmax.f32 %v1499_v46, %v1503_v41  ;;  %1872 = vmatprep.subr.mxu1 %v11922_v22  ;;  %v1716_v28 = vld [vmem:[%s11943_s24 + $0x10] sm:$0xff]  ;;  %v1725_v46 = vld [vmem:[%s11943_s24 + $0x58] sm:$0xff] }
 0x1eb   : > { %v1488_v42 = vpop.f32.mrf.mxu1  ;;  %1873 = vmatpush2.msra.mxu1 %v1774_v13  ;;  %v1735_v13 = vld [vmem:[%s11943_s24 + $0xa8] sm:$0xff] }
 0x1ec   : > { %v1505_v38 = vmax.f32 %v1493_v39, %v1497_v34  ;;  %v1498_v45 = vadd.f32 %v1488_v42, %v1387_v24  ;;  %v1508_v49 = vmax.f32 %v1500_v40, %v1504_v14  ;;  %v1523_v56 = vadd.f32 %v1516_v52, %v1507_v17  ;;  %4068 = vmatprep.subr.mxu1 %v11922_v22  ;;  %v1721_v14 = vld [vmem:[%s11943_s24 + $0x38] sm:$0xff]  ;;  %v1720_v34 = vld [vmem:[%s11943_s24 + $0x30] sm:$0xff]  ;;  %v1723_v42 = vld [vmem:[%s11943_s24 + $0x48] sm:$0xff] }
 0x1ed   : > { %v1727_v17 = vld [vmem:[%s11943_s24 + $0x68] sm:$0xff] }
 0x1ee   : > { %v1509_v50 = vmax.f32 %v1501_v43, %v1505_v38  ;;  %v1506_v51 = vmax.f32 %v1494_v44, %v1498_v45  ;;  %v1524_v55 = vadd.f32 %v1520_v47, %v1508_v49  ;;  %v1527_v61 = vmax.f32 %v1523_v56, 0.0  ;;  %v1722_v43 = vld [vmem:[%s11943_s24 + $0x40] sm:$0xff]  ;;  %v1729_v56 = vld [vmem:[%s11943_s24 + $0x78] sm:$0xff] }
 0x1f0   : > { %v1510_v27 = vmax.f32 %v1502_v48, %v1506_v51  ;;  %v1525_v53 = vadd.f32 %v1516_v52, %v1509_v50  ;;  %v1528_v60 = vmax.f32 %v1524_v55, 0.0  ;;  %v1726_v52 = vld [vmem:[%s11943_s24 + $0x60] sm:$0xff] }
 0x1f2   : > { %v1526_v54 = vadd.f32 %v1520_v47, %v1510_v27  ;;  %v1529_v59 = vmax.f32 %v1525_v53, 0.0  ;;  %v1724_v47 = vld [vmem:[%s11943_s24 + $0x50] sm:$0xff] }
 0x1f4   : > { %v1530_v58 = vmax.f32 %v1526_v54, 0.0 }
 0x1f6   : > { %6843 = vmatprep.subr.msk.mxu0 %vm1576_vm2, %v1530_v58  ;;  %v1728_v58 = vld [vmem:[%s11943_s24 + $0x70] sm:$0xff] }
 0x1f7   : > { %6844 = vmatpush1.msk.msra.mxu0 %vm1576_vm2, %v1529_v59 }
 0x1f8   : > { %1613 = vmatprep.subr.mxu0 %v1528_v60 }
 0x1f9   : > { %1614 = vmatpush1.msra.mxu0 %v1527_v61 }
 0x1fa   : > { %6845 = vmatmul.mubr.msk.f32.vlgmr.msra.gmra.mxu0 %vm1542_vm3, %v1531_v62 }
 0x1fb   : > { %1653 = vmatprep.mubr.f32.mxu0 %v11922_v22 }
 0x1fe   : > { %6846 = vmatmul.mubr.msk.f32.gmra.mxu0 %vm1542_vm3, %v1532_v63  ;;  %v1731_v63 = vld [vmem:[%s11943_s24 + $0x88] sm:$0xff] }
 0x1ff   : > { %1659 = vmatprep.mubr.f32.mxu0 %v11922_v22 }
 0x202   : > { %6847 = vmatmul.mubr.msk.f32.gmra.mxu0 %vm1542_vm3, %v1533_v0  ;;  %v1730_v0 = vld [vmem:[%s11943_s24 + $0x80] sm:$0xff] }
 0x203   : > { %1665 = vmatprep.mubr.f32.mxu0 %v11922_v22 }
 0x206   : > { %6848 = vmatmul.mubr.msk.f32.gmra.mxu0 %vm1542_vm3, %v1534_v1 }
 0x207   : > { %1671 = vmatprep.mubr.f32.mxu0 %v11922_v22 }
 0x20a   : > { %6849 = vmatmul.mubr.msk.f32.gmra.mxu0 %vm1542_vm3, %v1535_v2 }
 0x20b   : > { %1677 = vmatprep.mubr.f32.mxu0 %v11922_v22 }
 0x20e   : > { %6850 = vmatmul.mubr.msk.f32.gmra.mxu0 %vm1542_vm3, %v1536_v3 }
 0x20f   : > { %1683 = vmatprep.mubr.f32.mxu0 %v11922_v22 }
 0x212   : > { %6851 = vmatmul.mubr.msk.f32.gmra.mxu0 %vm1542_vm3, %v1537_v4 }
 0x213   : > { %1689 = vmatprep.mubr.f32.mxu0 %v11922_v22 }
 0x216   : > { %6852 = vmatmul.mubr.msk.f32.gmra.mxu0 %vm1542_vm3, %v1538_v5  ;;  %v1733_v5 = vld [vmem:[%s11943_s24 + $0x98] sm:$0xff] }
 0x217   : > { %1695 = vmatprep.mubr.f32.mxu0 %v11922_v22 }
 0x21a   : > { %6853 = vmatmul.mubr.msk.f32.gmra.mxu0 %vm1542_vm3, %v1539_v6  ;;  %v1732_v6 = vld [vmem:[%s11943_s24 + $0x90] sm:$0xff] }
 0x21b   : > { %1701 = vmatprep.mubr.f32.mxu0 %v11922_v22 }
 0x21e   : > { %6854 = vmatmul.mubr.msk.f32.gmra.mxu0 %vm1542_vm3, %v1540_v7 }
 0x21f   : > { %1707 = vmatprep.mubr.f32.mxu0 %v11922_v22 }
 0x222   : > { %6855 = vmatmul.mubr.msk.f32.gmra.mxu0 %vm1542_vm3, %v1541_v9 }
 0x2ba   : > { %v1649_v12 = vpop.f32.mrf.mxu0 }
 0x2bb   : > { %v1736_v8 = vmul.f32 %v1714_v18, %v1649_v12  ;;  %v1734_v12 = vld [vmem:[%s11943_s24 + $0xa0] sm:$0xff] }
 0x2bc   : > { %v1651_v19 = vpop.f32.mrf.mxu0 }
 0x2bd   : > { %v1737_v21 = vmul.f32 %v1715_v15, %v1651_v19 }
 0x2be   : > { %v1655_v23 = vpop.f32.mrf.mxu0 }
 0x2bf   : > { %6856 = vmatprep.mubr.msk.f32.mxu1 %vm1776_vm4, %v1737_v21  ;;  %v1738_v31 = vmul.f32 %v1716_v28, %v1655_v23  ;;  %v7157_v21 = vld [vmem:[%s11944_s7] sm:$0xff]  }
 0x2c0   : > { %v1657_v29 = vpop.f32.mrf.mxu0  ;;  %1875 = vmatmul.mubr.f32.vlgmr.msra.gmra.mxu1 %v1736_v8  ;;  %v7158_v8 = vunpack.c.l.bf16 %v7157_v21 }
 0x2c1   : > { %v1739_v20 = vmul.f32 %v1717_v25, %v1657_v29 }
 0x2c2   : > { %v1661_v16 = vpop.f32.mrf.mxu0  ;;  %8281 = vmatprep.mubr.msk.f32.mxu0 %vm2218_vm5, %v7158_v8  ;;  %v7673_v8 = vld [vmem:[%s11944_s7 + $0x70] sm:$0xff]  }
 0x2c3   : > { %6857 = vmatprep.mubr.msk.f32.mxu1 %vm1776_vm4, %v1739_v20  ;;  %v1740_v24 = vmul.f32 %v1718_v33, %v1661_v16 }
 0x2c4   : > { %v1663_v36 = vpop.f32.mrf.mxu0  ;;  %1880 = vmatmul.mubr.f32.gmra.mxu1 %v1738_v31 }
 0x2c5   : > { %v1741_v37 = vmul.f32 %v1719_v26, %v1663_v36 }
 0x2c6   : > { %v1667_v39 = vpop.f32.mrf.mxu0 }
 0x2c7   : > { %6858 = vmatprep.mubr.msk.f32.mxu1 %vm1776_vm4, %v1741_v37  ;;  %v1742_v40 = vmul.f32 %v1720_v34, %v1667_v39 }
 0x2c8   : > { %v1669_v32 = vpop.f32.mrf.mxu0  ;;  %1885 = vmatmul.mubr.f32.gmra.mxu1 %v1740_v24 }
 0x2c9   : > { %v1743_v35 = vmul.f32 %v1721_v14, %v1669_v32 }
 0x2ca   : > { %v1673_v41 = vpop.f32.mrf.mxu0 }
 0x2cb   : > { %6859 = vmatprep.mubr.msk.f32.mxu1 %vm1776_vm4, %v1743_v35  ;;  %v1744_v38 = vmul.f32 %v1722_v43, %v1673_v41 }
 0x2cc   : > { %v1675_v44 = vpop.f32.mrf.mxu0  ;;  %1890 = vmatmul.mubr.f32.gmra.mxu1 %v1742_v40 }
 0x2cd   : > { %v1745_v30 = vmul.f32 %v1723_v42, %v1675_v44 }
 0x2ce   : > { %v1679_v45 = vpop.f32.mrf.mxu0 }
 0x2cf   : > { %6860 = vmatprep.mubr.msk.f32.mxu1 %vm1776_vm4, %v1745_v30  ;;  %v1746_v50 = vmul.f32 %v1724_v47, %v1679_v45  ;;  %v7660_v30 = vld [vmem:[%s11944_s7 + $0x8] sm:$0xff]  }
 0x2d0   : > { %v1681_v48 = vpop.f32.mrf.mxu0  ;;  %1895 = vmatmul.mubr.f32.gmra.mxu1 %v1744_v38  ;;  %v7159_v38 = vunpack.c.h.bf16 %v7157_v21  ;;  %v7162_v45 = vunpack.c.l.bf16 %v7660_v30  ;;  %v7163_v47 = vunpack.c.h.bf16 %v7660_v30 }
 0x2d1   : > { %v1747_v49 = vmul.f32 %v1725_v46, %v1681_v48  ;;  %v7661_v46 = vld [vmem:[%s11944_s7 + $0x10] sm:$0xff]  }
 0x2d2   : > { %v1685_v51 = vpop.f32.mrf.mxu0  ;;  %v7166_v48 = vunpack.c.l.bf16 %v7661_v46 }
 0x2d3   : > { %6861 = vmatprep.mubr.msk.f32.mxu1 %vm1776_vm4, %v1747_v49  ;;  %v1748_v54 = vmul.f32 %v1726_v52, %v1685_v51  ;;  %v7662_v49 = vld [vmem:[%s11944_s7 + $0x18] sm:$0xff]  }
 0x2d4   : > { %v1687_v27 = vpop.f32.mrf.mxu0  ;;  %1900 = vmatmul.mubr.f32.gmra.mxu1 %v1746_v50  ;;  %v7167_v50 = vunpack.c.h.bf16 %v7661_v46  ;;  %v7170_v51 = vunpack.c.l.bf16 %v7662_v49  ;;  %v7171_v52 = vunpack.c.h.bf16 %v7662_v49 }
 0x2d5   : > { %v1749_v53 = vmul.f32 %v1727_v17, %v1687_v27  ;;  %v7663_v17 = vld [vmem:[%s11944_s7 + $0x20] sm:$0xff]  }
 0x2d6   : > { %v1691_v55 = vpop.f32.mrf.mxu0  ;;  %v7174_v27 = vunpack.c.l.bf16 %v7663_v17 }
 0x2d7   : > { %6862 = vmatprep.mubr.msk.f32.mxu1 %vm1776_vm4, %v1749_v53  ;;  %v1750_v61 = vmul.f32 %v1728_v58, %v1691_v55  ;;  %v7664_v53 = vld [vmem:[%s11944_s7 + $0x28] sm:$0xff]  }
 0x2d8   : > { %v1693_v59 = vpop.f32.mrf.mxu0  ;;  %1905 = vmatmul.mubr.f32.gmra.mxu1 %v1748_v54  ;;  %v7175_v54 = vunpack.c.h.bf16 %v7663_v17  ;;  %v7178_v55 = vunpack.c.l.bf16 %v7664_v53  ;;  %v7179_v58 = vunpack.c.h.bf16 %v7664_v53 }
 0x2d9   : > { %v1751_v60 = vmul.f32 %v1729_v56, %v1693_v59  ;;  %v7665_v56 = vld [vmem:[%s11944_s7 + $0x30] sm:$0xff]  }
 0x2da   : > { %v1697_v62 = vpop.f32.mrf.mxu0  ;;  %v7182_v59 = vunpack.c.l.bf16 %v7665_v56 }
 0x2db   : > { %6863 = vmatprep.mubr.msk.f32.mxu1 %vm1776_vm4, %v1751_v60  ;;  %v1752_v3 = vmul.f32 %v1730_v0, %v1697_v62  ;;  %v7666_v60 = vld [vmem:[%s11944_s7 + $0x38] sm:$0xff]  }
 0x2dc   : > { %v1699_v1 = vpop.f32.mrf.mxu0  ;;  %1910 = vmatmul.mubr.f32.gmra.mxu1 %v1750_v61  ;;  %v7183_v61 = vunpack.c.h.bf16 %v7665_v56  ;;  %v7186_v62 = vunpack.c.l.bf16 %v7666_v60  ;;  %v7187_v0 = vunpack.c.h.bf16 %v7666_v60 }
 0x2dd   : > { %v1753_v2 = vmul.f32 %v1731_v63, %v1699_v1  ;;  %v7667_v63 = vld [vmem:[%s11944_s7 + $0x40] sm:$0xff]  }
 0x2de   : > { %v1703_v4 = vpop.f32.mrf.mxu0  ;;  %v7190_v1 = vunpack.c.l.bf16 %v7667_v63 }
 0x2df   : > { %6864 = vmatprep.mubr.msk.f32.mxu1 %vm1776_vm4, %v1753_v2  ;;  %v1754_v10 = vmul.f32 %v1732_v6, %v1703_v4  ;;  %v7668_v2 = vld [vmem:[%s11944_s7 + $0x48] sm:$0xff]  }
 0x2e0   : > { %v1705_v7 = vpop.f32.mrf.mxu0  ;;  %1915 = vmatmul.mubr.f32.gmra.mxu1 %v1752_v3  ;;  %v7191_v3 = vunpack.c.h.bf16 %v7667_v63  ;;  %v7194_v4 = vunpack.c.l.bf16 %v7668_v2  ;;  %v7195_v6 = vunpack.c.h.bf16 %v7668_v2 }
 0x2e1   : > { %v1755_v9 = vmul.f32 %v1733_v5, %v1705_v7  ;;  %v7669_v5 = vld [vmem:[%s11944_s7 + $0x50] sm:$0xff]  }
 0x2e2   : > { %v1709_v11 = vpop.f32.mrf.mxu0  ;;  %v7198_v7 = vunpack.c.l.bf16 %v7669_v5 }
 0x2e3   : > { %6865 = vmatprep.mubr.msk.f32.mxu1 %vm1776_vm4, %v1755_v9  ;;  %v1756_v19 = vmul.f32 %v1734_v12, %v1709_v11  ;;  %v7670_v9 = vld [vmem:[%s11944_s7 + $0x58] sm:$0xff]  }
 0x2e4   : > { %v1711_v15 = vpop.f32.mrf.mxu0  ;;  %1920 = vmatmul.mubr.f32.gmra.mxu1 %v1754_v10  ;;  %v7199_v10 = vunpack.c.h.bf16 %v7669_v5  ;;  %v7202_v11 = vunpack.c.l.bf16 %v7670_v9  ;;  %v7203_v12 = vunpack.c.h.bf16 %v7670_v9 }
 0x2e5   : > { %v1757_v18 = vmul.f32 %v1735_v13, %v1711_v15  ;;  %v7671_v13 = vld [vmem:[%s11944_s7 + $0x60] sm:$0xff]  }
 0x2e6   : > { %v7206_v15 = vunpack.c.l.bf16 %v7671_v13 }
 0x2e7   : > { %6866 = vmatprep.mubr.msk.f32.mxu1 %vm1776_vm4, %v1757_v18  ;;  %v7672_v18 = vld [vmem:[%s11944_s7 + $0x68] sm:$0xff]  }
 0x2e8   : > { %1925 = vmatmul.mubr.f32.gmra.mxu1 %v1756_v19  ;;  %v7207_v19 = vunpack.c.h.bf16 %v7671_v13  ;;  %v7210_v21 = vunpack.c.l.bf16 %v7672_v18 }
 0x380   : > { %v1876_v23 = vpop.f32.mrf.mxu1 }
 0x382   : > { %v1878_v25 = vpop.f32.mrf.mxu1 }
 0x383   : > { %v7214_v25 = vunpack.c.l.bf16 %v7673_v8 }
 0x384   : > { %v1881_v28 = vpop.f32.mrf.mxu1 }
 0x386   : > { %v1883_v29 = vpop.f32.mrf.mxu1 }
 0x387   : > { %v7215_v29 = vunpack.c.h.bf16 %v7673_v8 }
 0x388   : > { %v1886_v20 = vpop.f32.mrf.mxu1 }
 0x38a   : > { %v1888_v31 = vpop.f32.mrf.mxu1 }
 0x38b   : > { %v7675_v31 = vld [vmem:[%s11944_s7 + $0x80] sm:$0xff]  }
 0x38c   : > { %v1891_v16 = vpop.f32.mrf.mxu1 }
 0x38e   : > { %v1893_v26 = vpop.f32.mrf.mxu1 }
 0x38f   : > { %v7222_v26 = vunpack.c.l.bf16 %v7675_v31 }
 0x390   : > { %v1896_v33 = vpop.f32.mrf.mxu1 }
 0x392   : > { %v1898_v36 = vpop.f32.mrf.mxu1 }
 0x393   : > { %v7223_v36 = vunpack.c.h.bf16 %v7675_v31 }
 0x394   : > { %v1901_v37 = vpop.f32.mrf.mxu1 }
 0x396   : > { %v1903_v24 = vpop.f32.mrf.mxu1 }
 0x397   : > { %v7677_v24 = vld [vmem:[%s11944_s7 + $0x90] sm:$0xff]  }
 0x398   : > { %v1906_v39 = vpop.f32.mrf.mxu1 }
 0x39a   : > { %v1908_v14 = vpop.f32.mrf.mxu1 }
 0x39b   : > { %v7230_v14 = vunpack.c.l.bf16 %v7677_v24 }
 0x39c   : > { %v1911_v34 = vpop.f32.mrf.mxu1 }
 0x39e   : > { %v1913_v32 = vpop.f32.mrf.mxu1 }
 0x39f   : > { %v7231_v32 = vunpack.c.h.bf16 %v7677_v24 }
 0x3a0   : > { %v1916_v35 = vpop.f32.mrf.mxu1 }
 0x3a2   : > { %v1918_v40 = vpop.f32.mrf.mxu1 }
 0x3a3   : > { %v7679_v40 = vld [vmem:[%s11944_s7 + $0xa0] sm:$0xff]  }
 0x3a4   : > { %v1921_v41 = vpop.f32.mrf.mxu1 }
 0x3a6   : > { %v1923_v42 = vpop.f32.mrf.mxu1 }
 0x3a7   : > { %v7238_v42 = vunpack.c.l.bf16 %v7679_v40 }
 0x3a8   : > { %v1926_v43 = vpop.f32.mrf.mxu1 }
 0x3a9   : > { %8259 = vmatprep.subr.mxu0 %v1926_v43 }
 0x3aa   : > { %v1928_v44 = vpop.f32.mrf.mxu1  ;;  %8260 = vmatpush3.msra.mxu0 %v1926_v43  ;;  %v7680_v43 = vld [vmem:[%s11944_s7 + $0xa8] sm:$0xff]  }
 0x3ab   : > { %8261 = vmatprep.subr.mxu0 %v1921_v41  ;;  %v7239_v44 = vunpack.c.h.bf16 %v7679_v40  ;;  %v7242_v30 = vunpack.c.l.bf16 %v7680_v43 }
 0x3ac   : > { %8262 = vmatpush3.msra.mxu0 %v1921_v41 }
 0x3ad   : > { %8263 = vmatprep.subr.mxu0 %v1916_v35 }
 0x3ae   : > { %8264 = vmatpush3.msra.mxu0 %v1916_v35 }
 0x3af   : > { %8265 = vmatprep.subr.mxu0 %v1911_v34 }
 0x3b0   : > { %8266 = vmatpush3.msra.mxu0 %v1911_v34  ;;  %v7678_v34 = vld [vmem:[%s11944_s7 + $0x98] sm:$0xff]  }
 0x3b1   : > { %8267 = vmatprep.subr.mxu0 %v1906_v39  ;;  %v7234_v35 = vunpack.c.l.bf16 %v7678_v34  ;;  %v7235_v41 = vunpack.c.h.bf16 %v7678_v34 }
 0x3b2   : > { %8268 = vmatpush3.msra.mxu0 %v1906_v39 }
 0x3b3   : > { %8269 = vmatprep.subr.mxu0 %v1901_v37 }
 0x3b4   : > { %8270 = vmatpush3.msra.mxu0 %v1901_v37 }
 0x3b5   : > { %8271 = vmatprep.subr.mxu0 %v1896_v33 }
 0x3b6   : > { %8272 = vmatpush3.msra.mxu0 %v1896_v33  ;;  %v7676_v33 = vld [vmem:[%s11944_s7 + $0x88] sm:$0xff]  }
 0x3b7   : > { %8273 = vmatprep.subr.mxu0 %v1891_v16  ;;  %v7226_v37 = vunpack.c.l.bf16 %v7676_v33  ;;  %v7227_v39 = vunpack.c.h.bf16 %v7676_v33 }
 0x3b8   : > { %8274 = vmatpush3.msra.mxu0 %v1891_v16 }
 0x3b9   : > { %8275 = vmatprep.subr.mxu0 %v1886_v20 }
 0x3ba   : > { %8276 = vmatpush3.msra.mxu0 %v1886_v20 }
 0x3bb   : > { %8277 = vmatprep.subr.mxu0 %v1881_v28 }
 0x3bc   : > { %8278 = vmatpush3.msra.mxu0 %v1881_v28  ;;  %v7674_v28 = vld [vmem:[%s11944_s7 + $0x78] sm:$0xff]  }
 0x3bd   : > { %8279 = vmatprep.subr.mxu0 %v1876_v23  ;;  %v7218_v20 = vunpack.c.l.bf16 %v7674_v28  ;;  %v7219_v16 = vunpack.c.h.bf16 %v7674_v28 }
 0x3be   : > { %8280 = vmatpush3.msra.mxu0 %v1876_v23  ;;  %v7211_v23 = vunpack.c.h.bf16 %v7672_v18 }
 0x3bf   : > { %8282 = vmatmul.mubr.msk.f32.vlgmr.msra.gmra.mxu0 %vm2218_vm5, %v7159_v38  ;;  %v7681_v38 = vld [vmem:[%s11944_s7 + $0xb0] sm:$0xff]  }
 0x3c0   : > { %8284 = vmatprep.mubr.msk.f32.mxu0 %vm2218_vm5, %v7162_v45  ;;  %v7243_v45 = vunpack.c.h.bf16 %v7680_v43  ;;  %v7246_v46 = vunpack.c.l.bf16 %v7681_v38 }
 0x3c3   : > { %8285 = vmatmul.mubr.msk.f32.gmra.mxu0 %vm2218_vm5, %v7163_v47  ;;  %v7682_v47 = vld [vmem:[%s11944_s7 + $0xb8] sm:$0xff]  }
 0x3c4   : > { %8287 = vmatprep.mubr.msk.f32.mxu0 %vm2218_vm5, %v7166_v48  ;;  %v7247_v48 = vunpack.c.h.bf16 %v7681_v38  ;;  %v7250_v49 = vunpack.c.l.bf16 %v7682_v47 }
 0x3c7   : > { %8288 = vmatmul.mubr.msk.f32.gmra.mxu0 %vm2218_vm5, %v7167_v50  ;;  %v7683_v50 = vld [vmem:[%s11944_s7 + $0xc0] sm:$0xff]  }
 0x3c8   : > { %8290 = vmatprep.mubr.msk.f32.mxu0 %vm2218_vm5, %v7170_v51  ;;  %v7251_v51 = vunpack.c.h.bf16 %v7682_v47  ;;  %v7254_v17 = vunpack.c.l.bf16 %v7683_v50 }
 0x3cb   : > { %8291 = vmatmul.mubr.msk.f32.gmra.mxu0 %vm2218_vm5, %v7171_v52  ;;  %v7684_v52 = vld [vmem:[%s11944_s7 + $0xc8] sm:$0xff]  }
 0x3cc   : > { %8293 = vmatprep.mubr.msk.f32.mxu0 %vm2218_vm5, %v7174_v27  ;;  %v7255_v27 = vunpack.c.h.bf16 %v7683_v50  ;;  %v7258_v53 = vunpack.c.l.bf16 %v7684_v52 }
 0x3cf   : > { %8294 = vmatmul.mubr.msk.f32.gmra.mxu0 %vm2218_vm5, %v7175_v54  ;;  %v7685_v54 = vld [vmem:[%s11944_s7 + $0xd0] sm:$0xff]  }
 0x3d0   : > { %8296 = vmatprep.mubr.msk.f32.mxu0 %vm2218_vm5, %v7178_v55  ;;  %v7259_v55 = vunpack.c.h.bf16 %v7684_v52  ;;  %v7262_v56 = vunpack.c.l.bf16 %v7685_v54 }
 0x3d3   : > { %8297 = vmatmul.mubr.msk.f32.gmra.mxu0 %vm2218_vm5, %v7179_v58  ;;  %v7686_v58 = vld [vmem:[%s11944_s7 + $0xd8] sm:$0xff]  }
 0x3d4   : > { %8299 = vmatprep.mubr.msk.f32.mxu0 %vm2218_vm5, %v7182_v59  ;;  %v7263_v59 = vunpack.c.h.bf16 %v7685_v54  ;;  %v7266_v60 = vunpack.c.l.bf16 %v7686_v58 }
 0x3d7   : > { %8300 = vmatmul.mubr.msk.f32.gmra.mxu0 %vm2218_vm5, %v7183_v61  ;;  %v7687_v61 = vld [vmem:[%s11944_s7 + $0xe0] sm:$0xff]  }
 0x3d8   : > { %8302 = vmatprep.mubr.msk.f32.mxu0 %vm2218_vm5, %v7186_v62  ;;  %v7267_v62 = vunpack.c.h.bf16 %v7686_v58  ;;  %v7270_v63 = vunpack.c.l.bf16 %v7687_v61 }
 0x3db   : > { %8303 = vmatmul.mubr.msk.f32.gmra.mxu0 %vm2218_vm5, %v7187_v0  ;;  %v7688_v0 = vld [vmem:[%s11944_s7 + $0xe8] sm:$0xff]  }
 0x3dc   : > { %8305 = vmatprep.mubr.msk.f32.mxu0 %vm2218_vm5, %v7190_v1  ;;  %v7271_v1 = vunpack.c.h.bf16 %v7687_v61  ;;  %v7274_v2 = vunpack.c.l.bf16 %v7688_v0 }
 0x3df   : > { %8306 = vmatmul.mubr.msk.f32.gmra.mxu0 %vm2218_vm5, %v7191_v3  ;;  %v7689_v3 = vld [vmem:[%s11944_s7 + $0xf0] sm:$0xff]  }
 0x3e0   : > { %8308 = vmatprep.mubr.msk.f32.mxu0 %vm2218_vm5, %v7194_v4  ;;  %v7275_v4 = vunpack.c.h.bf16 %v7688_v0  ;;  %v7278_v5 = vunpack.c.l.bf16 %v7689_v3 }
 0x3e3   : > { %8309 = vmatmul.mubr.msk.f32.gmra.mxu0 %vm2218_vm5, %v7195_v6  ;;  %v7690_v6 = vld [vmem:[%s11944_s7 + $0xf8] sm:$0xff]  }
 0x3e4   : > { %8311 = vmatprep.mubr.msk.f32.mxu0 %vm2218_vm5, %v7198_v7  ;;  %v7279_v7 = vunpack.c.h.bf16 %v7689_v3  ;;  %v7282_v9 = vunpack.c.l.bf16 %v7690_v6 }
 0x3e7   : > { %8312 = vmatmul.mubr.msk.f32.gmra.mxu0 %vm2218_vm5, %v7199_v10  ;;  %v7691_v10 = vld [vmem:[%s11944_s7 + $0x100] sm:$0xff]  }
 0x3e8   : > { %8314 = vmatprep.mubr.msk.f32.mxu0 %vm2218_vm5, %v7202_v11  ;;  %v7283_v11 = vunpack.c.h.bf16 %v7690_v6  ;;  %v7286_v13 = vunpack.c.l.bf16 %v7691_v10  ;;  %v7710_v6 = vld [vmem:[%s11944_s7 + $0x198] sm:$0xff]  }
 0x3eb   : > { %8315 = vmatmul.mubr.msk.f32.gmra.mxu0 %vm2218_vm5, %v7203_v12  ;;  %v7692_v12 = vld [vmem:[%s11944_s7 + $0x108] sm:$0xff]  }
 0x3ec   : > { %8317 = vmatprep.mubr.msk.f32.mxu0 %vm2218_vm5, %v7206_v15  ;;  %v7287_v15 = vunpack.c.h.bf16 %v7691_v10  ;;  %v7290_v18 = vunpack.c.l.bf16 %v7692_v12  ;;  %v7362_v10 = vunpack.c.l.bf16 %v7710_v6 }
 0x3ef   : > { %8318 = vmatmul.mubr.msk.f32.gmra.mxu0 %vm2218_vm5, %v7207_v19  ;;  %v7693_v19 = vld [vmem:[%s11944_s7 + $0x110] sm:$0xff]  }
 0x3f0   : > { %8320 = vmatprep.mubr.msk.f32.mxu0 %vm2218_vm5, %v7210_v21  ;;  %v7291_v21 = vunpack.c.h.bf16 %v7692_v12  ;;  %v7294_v8 = vunpack.c.l.bf16 %v7693_v19 }
 0x3f3   : > { %8321 = vmatmul.mubr.msk.f32.gmra.mxu0 %vm2218_vm5, %v7211_v23  ;;  %v7694_v23 = vld [vmem:[%s11944_s7 + $0x118] sm:$0xff]  }
 0x3f4   : > { %8323 = vmatprep.mubr.msk.f32.mxu0 %vm2218_vm5, %v7214_v25  ;;  %v7295_v25 = vunpack.c.h.bf16 %v7693_v19  ;;  %v7298_v28 = vunpack.c.l.bf16 %v7694_v23 }
 0x3f7   : > { %8324 = vmatmul.mubr.msk.f32.gmra.mxu0 %vm2218_vm5, %v7215_v29  ;;  %v7695_v29 = vld [vmem:[%s11944_s7 + $0x120] sm:$0xff]  }
 0x3f8   : > { %8326 = vmatprep.mubr.msk.f32.mxu0 %vm2218_vm5, %v7218_v20  ;;  %v7299_v20 = vunpack.c.h.bf16 %v7694_v23  ;;  %v7302_v31 = vunpack.c.l.bf16 %v7695_v29 }
 0x3fb   : > { %8327 = vmatmul.mubr.msk.f32.gmra.mxu0 %vm2218_vm5, %v7219_v16  ;;  %v7696_v16 = vld [vmem:[%s11944_s7 + $0x128] sm:$0xff]  }
 0x3fc   : > { %8329 = vmatprep.mubr.msk.f32.mxu0 %vm2218_vm5, %v7222_v26  ;;  %v7303_v26 = vunpack.c.h.bf16 %v7695_v29  ;;  %v7306_v33 = vunpack.c.l.bf16 %v7696_v16  ;;  %v7713_v29 = vld [vmem:[%s11944_s7 + $0x1b0] sm:$0xff]  }
 0x3ff   : > { %8330 = vmatmul.mubr.msk.f32.gmra.mxu0 %vm2218_vm5, %v7223_v36  ;;  %v7697_v36 = vld [vmem:[%s11944_s7 + $0x130] sm:$0xff]  }
 0x400   : > { %8332 = vmatprep.mubr.msk.f32.mxu0 %vm2218_vm5, %v7226_v37  ;;  %v7307_v37 = vunpack.c.h.bf16 %v7696_v16  ;;  %v7310_v24 = vunpack.c.l.bf16 %v7697_v36  ;;  %v7374_v16 = vunpack.c.l.bf16 %v7713_v29 }
 0x403   : > { %8333 = vmatmul.mubr.msk.f32.gmra.mxu0 %vm2218_vm5, %v7227_v39  ;;  %v7698_v39 = vld [vmem:[%s11944_s7 + $0x138] sm:$0xff]  }
 0x404   : > { %8335 = vmatprep.mubr.msk.f32.mxu0 %vm2218_vm5, %v7230_v14  ;;  %v7311_v14 = vunpack.c.h.bf16 %v7697_v36  ;;  %v7314_v34 = vunpack.c.l.bf16 %v7698_v39 }
 0x407   : > { %8336 = vmatmul.mubr.msk.f32.gmra.mxu0 %vm2218_vm5, %v7231_v32  ;;  %v7699_v32 = vld [vmem:[%s11944_s7 + $0x140] sm:$0xff]  }
 0x408   : > { %8338 = vmatprep.mubr.msk.f32.mxu0 %vm2218_vm5, %v7234_v35  ;;  %v7315_v35 = vunpack.c.h.bf16 %v7698_v39  ;;  %v7318_v40 = vunpack.c.l.bf16 %v7699_v32 }
 0x40b   : > { %8339 = vmatmul.mubr.msk.f32.gmra.mxu0 %vm2218_vm5, %v7235_v41  ;;  %v7700_v41 = vld [vmem:[%s11944_s7 + $0x148] sm:$0xff]  }
 0x40c   : > { %8341 = vmatprep.mubr.msk.f32.mxu0 %vm2218_vm5, %v7238_v42  ;;  %v7319_v42 = vunpack.c.h.bf16 %v7699_v32  ;;  %v7322_v43 = vunpack.c.l.bf16 %v7700_v41 }
 0x40f   : > { %8342 = vmatmul.mubr.msk.f32.gmra.mxu0 %vm2218_vm5, %v7239_v44  ;;  %v7701_v44 = vld [vmem:[%s11944_s7 + $0x150] sm:$0xff]  }
 0x410   : > { %8344 = vmatprep.mubr.msk.f32.mxu0 %vm2218_vm5, %v7242_v30  ;;  %v7323_v30 = vunpack.c.h.bf16 %v7700_v41  ;;  %v7326_v38 = vunpack.c.l.bf16 %v7701_v44  ;;  %v7716_v41 = vld [vmem:[%s11944_s7 + $0x1c8] sm:$0xff]  }
 0x413   : > { %8345 = vmatmul.mubr.msk.f32.gmra.mxu0 %vm2218_vm5, %v7243_v45  ;;  %v7702_v45 = vld [vmem:[%s11944_s7 + $0x158] sm:$0xff]  }
 0x414   : > { %8347 = vmatprep.mubr.msk.f32.mxu0 %vm2218_vm5, %v7246_v46  ;;  %v7327_v46 = vunpack.c.h.bf16 %v7701_v44  ;;  %v7330_v47 = vunpack.c.l.bf16 %v7702_v45  ;;  %v7386_v44 = vunpack.c.l.bf16 %v7716_v41 }
 0x417   : > { %8348 = vmatmul.mubr.msk.f32.gmra.mxu0 %vm2218_vm5, %v7247_v48  ;;  %v7703_v48 = vld [vmem:[%s11944_s7 + $0x160] sm:$0xff]  }
 0x418   : > { %8350 = vmatprep.mubr.msk.f32.mxu0 %vm2218_vm5, %v7250_v49  ;;  %v7331_v49 = vunpack.c.h.bf16 %v7702_v45  ;;  %v7334_v50 = vunpack.c.l.bf16 %v7703_v48 }
 0x41b   : > { %8351 = vmatmul.mubr.msk.f32.gmra.mxu0 %vm2218_vm5, %v7251_v51  ;;  %v7704_v51 = vld [vmem:[%s11944_s7 + $0x168] sm:$0xff]  }
 0x41c   : > { %8353 = vmatprep.mubr.msk.f32.mxu0 %vm2218_vm5, %v7254_v17  ;;  %v7335_v17 = vunpack.c.h.bf16 %v7703_v48  ;;  %v7338_v52 = vunpack.c.l.bf16 %v7704_v51 }
 0x41f   : > { %8354 = vmatmul.mubr.msk.f32.gmra.mxu0 %vm2218_vm5, %v7255_v27  ;;  %v7705_v27 = vld [vmem:[%s11944_s7 + $0x170] sm:$0xff]  }
 0x420   : > { %8356 = vmatprep.mubr.msk.f32.mxu0 %vm2218_vm5, %v7258_v53  ;;  %v7339_v53 = vunpack.c.h.bf16 %v7704_v51  ;;  %v7342_v54 = vunpack.c.l.bf16 %v7705_v27 }
 0x423   : > { %8357 = vmatmul.mubr.msk.f32.gmra.mxu0 %vm2218_vm5, %v7259_v55  ;;  %v7706_v55 = vld [vmem:[%s11944_s7 + $0x178] sm:$0xff]  }
 0x424   : > { %8359 = vmatprep.mubr.msk.f32.mxu0 %vm2218_vm5, %v7262_v56  ;;  %v7343_v56 = vunpack.c.h.bf16 %v7705_v27  ;;  %v7346_v58 = vunpack.c.l.bf16 %v7706_v55 }
 0x427   : > { %8360 = vmatmul.mubr.msk.f32.gmra.mxu0 %vm2218_vm5, %v7263_v59  ;;  %v7707_v59 = vld [vmem:[%s11944_s7 + $0x180] sm:$0xff]  }
 0x428   : > { %8362 = vmatprep.mubr.msk.f32.mxu0 %vm2218_vm5, %v7266_v60  ;;  %v7347_v60 = vunpack.c.h.bf16 %v7706_v55  ;;  %v7350_v61 = vunpack.c.l.bf16 %v7707_v59 }
 0x42b   : > { %8363 = vmatmul.mubr.msk.f32.gmra.mxu0 %vm2218_vm5, %v7267_v62  ;;  %v7708_v62 = vld [vmem:[%s11944_s7 + $0x188] sm:$0xff]  }
 0x42c   : > { %8365 = vmatprep.mubr.msk.f32.mxu0 %vm2218_vm5, %v7270_v63  ;;  %v7351_v63 = vunpack.c.h.bf16 %v7707_v59  ;;  %v7354_v0 = vunpack.c.l.bf16 %v7708_v62  ;;  %v7355_v3 = vunpack.c.h.bf16 %v7708_v62 }
 0x42f   : > { %8366 = vmatmul.mubr.msk.f32.gmra.mxu0 %vm2218_vm5, %v7271_v1  ;;  %v7709_v1 = vld [vmem:[%s11944_s7 + $0x190] sm:$0xff]  }
 0x430   : > { %8368 = vmatprep.mubr.msk.f32.mxu0 %vm2218_vm5, %v7274_v2 }
 0x433   : > { %8369 = vmatmul.mubr.msk.f32.gmra.mxu0 %vm2218_vm5, %v7275_v4  ;;  %v7358_v4 = vunpack.c.l.bf16 %v7709_v1 }
 0x434   : > { %8371 = vmatprep.mubr.msk.f32.mxu0 %vm2218_vm5, %v7278_v5 }
 0x437   : > { %8372 = vmatmul.mubr.msk.f32.gmra.mxu0 %vm2218_vm5, %v7279_v7 }
 0x438   : > { %8374 = vmatprep.mubr.msk.f32.mxu0 %vm2218_vm5, %v7282_v9  ;;  %v7359_v9 = vunpack.c.h.bf16 %v7709_v1 }
 0x43b   : > { %8375 = vmatmul.mubr.msk.f32.gmra.mxu0 %vm2218_vm5, %v7283_v11 }
 0x43c   : > { %8377 = vmatprep.mubr.msk.f32.mxu0 %vm2218_vm5, %v7286_v13  ;;  %v7711_v13 = vld [vmem:[%s11944_s7 + $0x1a0] sm:$0xff]  }
 0x43d   : > { %v7367_v23 = vunpack.c.h.bf16 %v7711_v13 }
 0x43f   : > { %8378 = vmatmul.mubr.msk.f32.gmra.mxu0 %vm2218_vm5, %v7287_v15  ;;  %v7363_v15 = vunpack.c.h.bf16 %v7710_v6 }
 0x440   : > { %8380 = vmatprep.mubr.msk.f32.mxu0 %vm2218_vm5, %v7290_v18  ;;  %v7366_v18 = vunpack.c.l.bf16 %v7711_v13 }
 0x443   : > { %8381 = vmatmul.mubr.msk.f32.gmra.mxu0 %vm2218_vm5, %v7291_v21  ;;  %v7712_v21 = vld [vmem:[%s11944_s7 + $0x1a8] sm:$0xff]  }
 0x444   : > { %8383 = vmatprep.mubr.msk.f32.mxu0 %vm2218_vm5, %v7294_v8 }
 0x447   : > { %8384 = vmatmul.mubr.msk.f32.gmra.mxu0 %vm2218_vm5, %v7295_v25  ;;  %v7370_v25 = vunpack.c.l.bf16 %v7712_v21 }
 0x448   : > { %8386 = vmatprep.mubr.msk.f32.mxu0 %vm2218_vm5, %v7298_v28 }
 0x44b   : > { %8387 = vmatmul.mubr.msk.f32.gmra.mxu0 %vm2218_vm5, %v7299_v20 }
 0x44c   : > { %8389 = vmatprep.mubr.msk.f32.mxu0 %vm2218_vm5, %v7302_v31  ;;  %v7371_v31 = vunpack.c.h.bf16 %v7712_v21 }
 0x44f   : > { %8390 = vmatmul.mubr.msk.f32.gmra.mxu0 %vm2218_vm5, %v7303_v26 }
 0x450   : > { %8392 = vmatprep.mubr.msk.f32.mxu0 %vm2218_vm5, %v7306_v33  ;;  %v7714_v33 = vld [vmem:[%s11944_s7 + $0x1b8] sm:$0xff]  }
 0x451   : > { %v7379_v32 = vunpack.c.h.bf16 %v7714_v33 }
 0x453   : > { %8393 = vmatmul.mubr.msk.f32.gmra.mxu0 %vm2218_vm5, %v7307_v37  ;;  %v7375_v37 = vunpack.c.h.bf16 %v7713_v29 }
 0x454   : > { %8395 = vmatprep.mubr.msk.f32.mxu0 %vm2218_vm5, %v7310_v24  ;;  %v7378_v24 = vunpack.c.l.bf16 %v7714_v33 }
 0x457   : > { %8396 = vmatmul.mubr.msk.f32.gmra.mxu0 %vm2218_vm5, %v7311_v14  ;;  %v7715_v14 = vld [vmem:[%s11944_s7 + $0x1c0] sm:$0xff]  }
 0x458   : > { %8398 = vmatprep.mubr.msk.f32.mxu0 %vm2218_vm5, %v7314_v34 }
 0x45b   : > { %8399 = vmatmul.mubr.msk.f32.gmra.mxu0 %vm2218_vm5, %v7315_v35  ;;  %v7382_v35 = vunpack.c.l.bf16 %v7715_v14 }
 0x45c   : > { %8401 = vmatprep.mubr.msk.f32.mxu0 %vm2218_vm5, %v7318_v40 }
 0x45f   : > { %8402 = vmatmul.mubr.msk.f32.gmra.mxu0 %vm2218_vm5, %v7319_v42 }
 0x460   : > { %8404 = vmatprep.mubr.msk.f32.mxu0 %vm2218_vm5, %v7322_v43  ;;  %v7383_v43 = vunpack.c.h.bf16 %v7715_v14 }
 0x463   : > { %8405 = vmatmul.mubr.msk.f32.gmra.mxu0 %vm2218_vm5, %v7323_v30 }
 0x464   : > { %8407 = vmatprep.mubr.msk.f32.mxu0 %vm2218_vm5, %v7326_v38  ;;  %v7717_v38 = vld [vmem:[%s11944_s7 + $0x1d0] sm:$0xff]  }
 0x467   : > { %8408 = vmatmul.mubr.msk.f32.gmra.mxu0 %vm2218_vm5, %v7327_v46  ;;  %v7387_v46 = vunpack.c.h.bf16 %v7716_v41 }
 0x468   : > { %8410 = vmatprep.mubr.msk.f32.mxu0 %vm2218_vm5, %v7330_v47  ;;  %v7390_v47 = vunpack.c.l.bf16 %v7717_v38 }
 0x46b   : > { %8411 = vmatmul.mubr.msk.f32.gmra.mxu0 %vm2218_vm5, %v7331_v49  ;;  %v7718_v49 = vld [vmem:[%s11944_s7 + $0x1d8] sm:$0xff]  }
 0x46c   : > { %8413 = vmatprep.mubr.msk.f32.mxu0 %vm2218_vm5, %v7334_v50 }
 0x46f   : > { %8414 = vmatmul.mubr.msk.f32.gmra.mxu0 %vm2218_vm5, %v7335_v17  ;;  %v7391_v17 = vunpack.c.h.bf16 %v7717_v38 }
 0x470   : > { %8416 = vmatprep.mubr.msk.f32.mxu0 %vm2218_vm5, %v7338_v52  ;;  %v7394_v52 = vunpack.c.l.bf16 %v7718_v49 }
 0x473   : > { %8417 = vmatmul.mubr.msk.f32.gmra.mxu0 %vm2218_vm5, %v7339_v53  ;;  %v7719_v53 = vld [vmem:[%s11944_s7 + $0x1e0] sm:$0xff]  }
 0x474   : > { %8419 = vmatprep.mubr.msk.f32.mxu0 %vm2218_vm5, %v7342_v54 }
 0x477   : > { %8420 = vmatmul.mubr.msk.f32.gmra.mxu0 %vm2218_vm5, %v7343_v56  ;;  %v7395_v56 = vunpack.c.h.bf16 %v7718_v49 }
 0x478   : > { %8422 = vmatprep.mubr.msk.f32.mxu0 %vm2218_vm5, %v7346_v58  ;;  %v7398_v58 = vunpack.c.l.bf16 %v7719_v53 }
 0x47b   : > { %8423 = vmatmul.mubr.msk.f32.gmra.mxu0 %vm2218_vm5, %v7347_v60  ;;  %v7720_v60 = vld [vmem:[%s11944_s7 + $0x1e8] sm:$0xff]  }
 0x47c   : > { %8425 = vmatprep.mubr.msk.f32.mxu0 %vm2218_vm5, %v7350_v61 }
 0x47f   : > { %v10062_v2 = vpop.f32.mrf.mxu0  ;;  %8426 = vmatmul.mubr.msk.f32.gmra.mxu0 %vm2218_vm5, %v7351_v63  ;;  %v7399_v63 = vunpack.c.h.bf16 %v7719_v53 }
 0x480   : > { %8428 = vmatprep.mubr.msk.f32.mxu0 %vm2218_vm5, %v7354_v0  ;;  %v7402_v0 = vunpack.c.l.bf16 %v7720_v60 }
 0x481   : > { %v10066_v5 = vpop.f32.mrf.mxu0 }
 0x483   : > { %v10071_v7 = vpop.f32.mrf.mxu0  ;;  %8429 = vmatmul.mubr.msk.f32.gmra.mxu0 %vm2218_vm5, %v7355_v3  ;;  %v7721_v3 = vld [vmem:[%s11944_s7 + $0x1f0] sm:$0xff]  }
 0x484   : > { %8431 = vmatprep.mubr.msk.f32.mxu0 %vm2218_vm5, %v7358_v4 }
 0x485   : > { %v10075_v11 = vpop.f32.mrf.mxu0 }
 0x487   : > { %v10080_v12 = vpop.f32.mrf.mxu0  ;;  %8432 = vmatmul.mubr.msk.f32.gmra.mxu0 %vm2218_vm5, %v7359_v9  ;;  %v7403_v9 = vunpack.c.h.bf16 %v7720_v60 }
 0x488   : > { %8434 = vmatprep.mubr.msk.f32.mxu0 %vm2218_vm5, %v7362_v10  ;;  %v7406_v10 = vunpack.c.l.bf16 %v7721_v3 }
 0x489   : > { %v10084_v19 = vpop.f32.mrf.mxu0 }
 0x48b   : > { %v10089_v8 = vpop.f32.mrf.mxu0  ;;  %8435 = vmatmul.mubr.msk.f32.gmra.mxu0 %vm2218_vm5, %v7363_v15  ;;  %v7722_v15 = vld [vmem:[%s11944_s7 + $0x1f8] sm:$0xff]  }
 0x48c   : > { %8437 = vmatprep.mubr.msk.f32.mxu0 %vm2218_vm5, %v7366_v18 }
 0x48d   : > { %v10093_v28 = vpop.f32.mrf.mxu0 }
 0x48f   : > { %v10098_v20 = vpop.f32.mrf.mxu0  ;;  %8438 = vmatmul.mubr.msk.f32.gmra.mxu0 %vm2218_vm5, %v7367_v23  ;;  %v7407_v23 = vunpack.c.h.bf16 %v7721_v3 }
 0x490   : > { %8440 = vmatprep.mubr.msk.f32.mxu0 %vm2218_vm5, %v7370_v25  ;;  %v7410_v25 = vunpack.c.l.bf16 %v7722_v15 }
 0x491   : > { %v10102_v26 = vpop.f32.mrf.mxu0 }
 0x493   : > { %v10107_v36 = vpop.f32.mrf.mxu0  ;;  %8441 = vmatmul.mubr.msk.f32.gmra.mxu0 %vm2218_vm5, %v7371_v31  ;;  %v7723_v31 = vld [vmem:[%s11944_s7 + $0x200] sm:$0xff]  }
 0x494   : > { %11945 = vst [vmem:[#allocation4_spill] sm:$0xff] %v10107_v36  ;;  %8443 = vmatprep.mubr.msk.f32.mxu0 %vm2218_vm5, %v7374_v16 }
 0x495   : > { %v10111_v39 = vpop.f32.mrf.mxu0 }
 0x497   : > { %v10116_v34 = vpop.f32.mrf.mxu0  ;;  %8444 = vmatmul.mubr.msk.f32.gmra.mxu0 %vm2218_vm5, %v7375_v37  ;;  %v7411_v37 = vunpack.c.h.bf16 %v7722_v15 }
 0x498   : > { %11946 = vst [vmem:[#allocation5_spill] sm:$0xff] %v10116_v34  ;;  %8446 = vmatprep.mubr.msk.f32.mxu0 %vm2218_vm5, %v7378_v24  ;;  %v7414_v24 = vunpack.c.l.bf16 %v7723_v31 }
 0x499   : > { %v10120_v40 = vpop.f32.mrf.mxu0 }
 0x49a   : > { %11947 = vst [vmem:[#allocation6_spill] sm:$0xff] %v10120_v40 }
 0x49b   : > { %v10125_v42 = vpop.f32.mrf.mxu0  ;;  %8447 = vmatmul.mubr.msk.f32.gmra.mxu0 %vm2218_vm5, %v7379_v32  ;;  %v7724_v32 = vld [vmem:[%s11944_s7 + $0x208] sm:$0xff]  }
 0x49c   : > { %11948 = vst [vmem:[#allocation7_spill] sm:$0xff] %v10125_v42  ;;  %8449 = vmatprep.mubr.msk.f32.mxu0 %vm2218_vm5, %v7382_v35 }
 0x49d   : > { %v10129_v30 = vpop.f32.mrf.mxu0 }
 0x49e   : > { %11949 = vst [vmem:[#allocation8_spill] sm:$0xff] %v10129_v30 }
 0x49f   : > { %v8307_v45 = vpop.f32.mrf.mxu0  ;;  %8450 = vmatmul.mubr.msk.f32.gmra.mxu0 %vm2218_vm5, %v7383_v43  ;;  %v7415_v43 = vunpack.c.h.bf16 %v7723_v31 }
 0x4a0   : > { %8452 = vmatprep.mubr.msk.f32.mxu0 %vm2218_vm5, %v7386_v44  ;;  %v7418_v44 = vunpack.c.l.bf16 %v7724_v32 }
 0x4a1   : > { %v2797_v48 = vpop.f32.mrf.mxu0 }
 0x4a2   : > { %v8737_v50 = vpack.i.bf16 %v8307_v45, %v2797_v48  ;;  %v7725_v45 = vld [vmem:[%s11944_s7 + $0x210] sm:$0xff]   ;;  %v7419_v48 = vunpack.c.h.bf16 %v7724_v32 }
 0x4a3   : > { %v8310_v51 = vpop.f32.mrf.mxu0  ;;  %8453 = vmatmul.mubr.msk.f32.gmra.mxu0 %vm2218_vm5, %v7387_v46  ;;  %v7422_v49 = vunpack.c.l.bf16 %v7725_v45  ;;  %v4013_v46 = vld [vmem:[%s11898_s8 + $0x58] sm:$0xff] }
 0x4a4   : > { %8738 = vrot.lane.b32.xlu0 %v8737_v50, %s9178_s3  ;;  %8455 = vmatprep.mubr.msk.f32.mxu0 %vm2218_vm5, %v7390_v47 }
 0x4a5   : > { %v2807_v27 = vpop.f32.mrf.mxu0 }
 0x4a6   : > { %v8742_v54 = vpack.i.bf16 %v8310_v51, %v2807_v27  ;;  %v7726_v51 = vld [vmem:[%s11944_s7 + $0x218] sm:$0xff]   ;;  %v7423_v27 = vunpack.c.h.bf16 %v7725_v45 }
 0x4a7   : > { %v8313_v55 = vpop.f32.mrf.mxu0  ;;  %8456 = vmatmul.mubr.msk.f32.gmra.mxu0 %vm2218_vm5, %v7391_v17  ;;  %v7426_v53 = vunpack.c.l.bf16 %v7726_v51 }
 0x4a8   : > { %8743 = vrot.lane.b32.xlu1 %v8742_v54, %s9178_s3  ;;  %8458 = vmatprep.mubr.msk.f32.mxu0 %vm2218_vm5, %v7394_v52 }
 0x4a9   : > { %v2817_v59 = vpop.f32.mrf.mxu0 }
 0x4aa   : > { %v8747_v61 = vpack.i.bf16 %v8313_v55, %v2817_v59  ;;  %v7727_v55 = vld [vmem:[%s11944_s7 + $0x220] sm:$0xff]   ;;  %v7427_v59 = vunpack.c.h.bf16 %v7726_v51 }
 0x4ab   : > { %v8316_v62 = vpop.f32.mrf.mxu0  ;;  %8459 = vmatmul.mubr.msk.f32.gmra.mxu0 %vm2218_vm5, %v7395_v56  ;;  %v7430_v60 = vunpack.c.l.bf16 %v7727_v55 }
 0x4ac   : > { %8748 = vrot.lane.b32.xlu0 %v8747_v61, %s9178_s3  ;;  %8461 = vmatprep.mubr.msk.f32.mxu0 %vm2218_vm5, %v7398_v58 }
 0x4ad   : > { %v2827_v1 = vpop.f32.mrf.mxu0 }
 0x4ae   : > { %v8752_v4 = vpack.i.bf16 %v8316_v62, %v2827_v1  ;;  %v7728_v62 = vld [vmem:[%s11944_s7 + $0x228] sm:$0xff]   ;;  %v7431_v1 = vunpack.c.h.bf16 %v7727_v55 }
 0x4af   : > { %v8319_v6 = vpop.f32.mrf.mxu0  ;;  %8462 = vmatmul.mubr.msk.f32.gmra.mxu0 %vm2218_vm5, %v7399_v63  ;;  %v7434_v3 = vunpack.c.l.bf16 %v7728_v62 }
 0x4b0   : > { %8753 = vrot.lane.b32.xlu1 %v8752_v4, %s9178_s3  ;;  %8464 = vmatprep.mubr.msk.f32.mxu0 %vm2218_vm5, %v7402_v0 }
 0x4b1   : > { %v2837_v13 = vpop.f32.mrf.mxu0 }
 0x4b2   : > { %v8757_v18 = vpack.i.bf16 %v8319_v6, %v2837_v13  ;;  %v7729_v6 = vld [vmem:[%s11944_s7 + $0x230] sm:$0xff]   ;;  %v7435_v13 = vunpack.c.h.bf16 %v7728_v62 }
 0x4b3   : > { %v10163_v21 = vpop.f32.mrf.mxu0  ;;  %8465 = vmatmul.mubr.msk.f32.gmra.mxu0 %vm2218_vm5, %v7403_v9  ;;  %v7438_v15 = vunpack.c.l.bf16 %v7729_v6 }
 0x4b4   : > { %8758 = vrot.lane.b32.xlu0 %v8757_v18, %s9178_s3  ;;  %8467 = vmatprep.mubr.msk.f32.mxu0 %vm2218_vm5, %v7406_v10 }
 0x4b5   : > { %v10168_v29 = vpop.f32.mrf.mxu0 }
 0x4b7   : > { %v10175_v33 = vpop.f32.mrf.mxu0  ;;  %8468 = vmatmul.mubr.msk.f32.gmra.mxu0 %vm2218_vm5, %v7407_v23  ;;  %v7730_v23 = vld [vmem:[%s11944_s7 + $0x238] sm:$0xff]   ;;  %s654_s7 = scalar_lea.vmem %s11911_s21, %s11974_s27 }
 0x4b8   : > { %8470 = vmatprep.mubr.msk.f32.mxu0 %vm2218_vm5, %v7410_v25 }
 0x4b9   : > { %v10179_v14 = vpop.f32.mrf.mxu0 }
 0x4bb   : > { %v10186_v41 = vpop.f32.mrf.mxu0  ;;  %8471 = vmatmul.mubr.msk.f32.gmra.mxu0 %vm2218_vm5, %v7411_v37  ;;  %v7439_v37 = vunpack.c.h.bf16 %v7729_v6 }
 0x4bc   : > { %8473 = vmatprep.mubr.msk.f32.mxu0 %vm2218_vm5, %v7414_v24  ;;  %v7442_v24 = vunpack.c.l.bf16 %v7730_v23 }
 0x4bd   : > { %v10190_v38 = vpop.f32.mrf.mxu0 }
 0x4bf   : > { %v8331_v47 = vpop.f32.mrf.mxu0  ;;  %8474 = vmatmul.mubr.msk.f32.gmra.mxu0 %vm2218_vm5, %v7415_v43 }
 0x4c0   : > { %8476 = vmatprep.mubr.msk.f32.mxu0 %vm2218_vm5, %v7418_v44  ;;  %v7443_v44 = vunpack.c.h.bf16 %v7730_v23 }
 0x4c1   : > { %v2877_v50 = vpop.f32.mrf.mxu0 }
 0x4c2   : > { %v8762_v17 = vpack.i.bf16 %v8331_v47, %v2877_v50 }
 0x4c3   : > { %v8334_v52 = vpop.f32.mrf.mxu0  ;;  %8477 = vmatmul.mubr.msk.f32.gmra.mxu0 %vm2218_vm5, %v7419_v48 }
 0x4c4   : > { %8763 = vrot.lane.b32.xlu0 %v8762_v17, %s11926_s2  ;;  %8479 = vmatprep.mubr.msk.f32.mxu0 %vm2218_vm5, %v7422_v49 }
 0x4c5   : > { %v2887_v54 = vpop.f32.mrf.mxu0 }
 0x4c6   : > { %v8767_v56 = vpack.i.bf16 %v8334_v52, %v2887_v54 }
 0x4c7   : > { %v8337_v58 = vpop.f32.mrf.mxu0  ;;  %8480 = vmatmul.mubr.msk.f32.gmra.mxu0 %vm2218_vm5, %v7423_v27 }
 0x4c8   : > { %8768 = vrot.lane.b32.xlu0 %v8767_v56, %s11926_s2  ;;  %8482 = vmatprep.mubr.msk.f32.mxu0 %vm2218_vm5, %v7426_v53 }
 0x4c9   : > { %v2897_v61 = vpop.f32.mrf.mxu0 }
 0x4ca   : > { %v8772_v63 = vpack.i.bf16 %v8337_v58, %v2897_v61 }
 0x4cb   : > { %v8340_v0 = vpop.f32.mrf.mxu0  ;;  %8483 = vmatmul.mubr.msk.f32.gmra.mxu0 %vm2218_vm5, %v7427_v59 }
 0x4cc   : > { %8773 = vrot.lane.b32.xlu1 %v8772_v63, %s11926_s2  ;;  %8485 = vmatprep.mubr.msk.f32.mxu0 %vm2218_vm5, %v7430_v60 }
 0x4cd   : > { %v2907_v4 = vpop.f32.mrf.mxu0 }
 0x4ce   : > { %v8777_v9 = vpack.i.bf16 %v8340_v0, %v2907_v4 }
 0x4cf   : > { %v8343_v10 = vpop.f32.mrf.mxu0  ;;  %8486 = vmatmul.mubr.msk.f32.gmra.mxu0 %vm2218_vm5, %v7431_v1  ;;  %v4011_v1 = vld [vmem:[%s11898_s8 + $0x48] sm:$0xff] }
 0x4d0   : > { %8778 = vrot.lane.b32.xlu0 %v8777_v9, %s11926_s2  ;;  %8488 = vmatprep.mubr.msk.f32.mxu0 %vm2218_vm5, %v7434_v3 }
 0x4d1   : > { %v2917_v18 = vpop.f32.mrf.mxu0 }
 0x4d2   : > { %v8782_v25 = vpack.i.bf16 %v8343_v10, %v2917_v18 }
 0x4d3   : > { %v10226_v31 = vpop.f32.mrf.mxu0  ;;  %8489 = vmatmul.mubr.msk.f32.gmra.mxu0 %vm2218_vm5, %v7435_v13 }
 0x4d4   : > { %8783 = vrot.lane.b32.xlu1 %v8782_v25, %s11926_s2  ;;  %8491 = vmatprep.mubr.msk.f32.mxu0 %vm2218_vm5, %v7438_v15 }
 0x4d5   : > { %v10231_v32 = vpop.f32.mrf.mxu0 }
 0x4d7   : > { %v10233_v43 = vpop.f32.mrf.mxu0  ;;  %8492 = vmatmul.mubr.msk.f32.gmra.mxu0 %vm2218_vm5, %v7439_v37 }
 0x4d8   : > { %8494 = vmatprep.mubr.msk.f32.mxu0 %vm2218_vm5, %v7442_v24 }
 0x4d9   : > { %v10237_v45 = vpop.f32.mrf.mxu0 }
 0x4db   : > { %v10239_v47 = vpop.f32.mrf.mxu0  ;;  %8495 = vmatmul.mubr.msk.f32.gmra.mxu0 %vm2218_vm5, %v7443_v44 }
 0x4dd   : > { %v10242_v48 = vpop.f32.mrf.mxu0 }
 0x4df   : > { %v8355_v49 = vpop.f32.mrf.mxu0 }
 0x4e1   : > { %v2957_v50 = vpop.f32.mrf.mxu0 }
 0x4e2   : > { %v8787_v51 = vpack.i.bf16 %v8355_v49, %v2957_v50 }
 0x4e3   : > { %v8358_v17 = vpop.f32.mrf.mxu0 }
 0x4e4   : > { %8788 = vrot.lane.b32.xlu1 %v8787_v51, %s11916_s25 }
 0x4e5   : > { %v2967_v52 = vpop.f32.mrf.mxu0 }
 0x4e6   : > { %v8792_v27 = vpack.i.bf16 %v8358_v17, %v2967_v52 }
 0x4e7   : > { %v8361_v53 = vpop.f32.mrf.mxu0 }
 0x4e8   : > { %8793 = vrot.lane.b32.xlu1 %v8792_v27, %s11916_s25 }
 0x4e9   : > { %v2977_v54 = vpop.f32.mrf.mxu0 }
 0x4ea   : > { %v8797_v55 = vpack.i.bf16 %v8361_v53, %v2977_v54 }
 0x4eb   : > { %v8364_v56 = vpop.f32.mrf.mxu0 }
 0x4ec   : > { %8798 = vrot.lane.b32.xlu0 %v8797_v55, %s11916_s25 }
 0x4ed   : > { %v2987_v58 = vpop.f32.mrf.mxu0 }
 0x4ee   : > { %v8802_v59 = vpack.i.bf16 %v8364_v56, %v2987_v58 }
 0x4ef   : > { %v8367_v60 = vpop.f32.mrf.mxu0 }
 0x4f0   : > { %8803 = vrot.lane.b32.xlu1 %v8802_v59, %s11916_s25 }
 0x4f1   : > { %v2997_v61 = vpop.f32.mrf.mxu0 }
 0x4f2   : > { %v8807_v62 = vpack.i.bf16 %v8367_v60, %v2997_v61 }
 0x4f3   : > { %v10248_v63 = vpop.f32.mrf.mxu0 }
 0x4f4   : > { %8808 = vrot.lane.b32.xlu0 %v8807_v62, %s11916_s25 }
 0x4f5   : > { %v10251_v0 = vpop.f32.mrf.mxu0 }
 0x4f7   : > { %v10255_v3 = vpop.f32.mrf.mxu0 }
 0x4f9   : > { %v10257_v4 = vpop.f32.mrf.mxu0 }
 0x4fb   : > { %v10261_v9 = vpop.f32.mrf.mxu0 }
 0x4fd   : > { %v10263_v10 = vpop.f32.mrf.mxu0 }
 0x4ff   : > { %v8379_v15 = vpop.f32.mrf.mxu0 }
 0x501   : > { %v3037_v18 = vpop.f32.mrf.mxu0 }
 0x502   : > { %v8812_v23 = vpack.i.bf16 %v8379_v15, %v3037_v18 }
 0x503   : > { %v8382_v25 = vpop.f32.mrf.mxu0 }
 0x504   : > { %8813 = vrot.lane.b32.xlu1 %v8812_v23, %s11920_s28 }
 0x505   : > { %v3047_v37 = vpop.f32.mrf.mxu0 }
 0x506   : > { %v8817_v24 = vpack.i.bf16 %v8382_v25, %v3047_v37 }
 0x507   : > { %v8385_v44 = vpop.f32.mrf.mxu0 }
 0x508   : > { %8818 = vrot.lane.b32.xlu0 %v8817_v24, %s11920_s28 }
 0x509   : > { %v3057_v49 = vpop.f32.mrf.mxu0 }
 0x50a   : > { %v8822_v50 = vpack.i.bf16 %v8385_v44, %v3057_v49 }
 0x50b   : > { %v8388_v51 = vpop.f32.mrf.mxu0 }
 0x50c   : > { %8823 = vrot.lane.b32.xlu1 %v8822_v50, %s11920_s28 }
 0x50d   : > { %v3067_v17 = vpop.f32.mrf.mxu0 }
 0x50e   : > { %v8827_v52 = vpack.i.bf16 %v8388_v51, %v3067_v17 }
 0x50f   : > { %v8391_v27 = vpop.f32.mrf.mxu0 }
 0x510   : > { %8828 = vrot.lane.b32.xlu0 %v8827_v52, %s11920_s28 }
 0x511   : > { %v3077_v53 = vpop.f32.mrf.mxu0 }
 0x512   : > { %v8832_v54 = vpack.i.bf16 %v8391_v27, %v3077_v53 }
 0x513   : > { %v10271_v55 = vpop.f32.mrf.mxu0 }
 0x514   : > { %8833 = vrot.lane.b32.xlu1 %v8832_v54, %s11920_s28  ;;  %s11954_s28 = smov 48  }
 0x515   : > { %v10274_v56 = vpop.f32.mrf.mxu0 }
 0x517   : > { %v10278_v59 = vpop.f32.mrf.mxu0 }
 0x519   : > { %v10280_v60 = vpop.f32.mrf.mxu0 }
 0x51b   : > { %v10284_v62 = vpop.f32.mrf.mxu0 }
 0x51d   : > { %v10286_v15 = vpop.f32.mrf.mxu0 }
 0x51f   : > { %v8403_v23 = vpop.f32.mrf.mxu0 }
 0x521   : > { %v3117_v25 = vpop.f32.mrf.mxu0 }
 0x522   : > { %v8837_v37 = vpack.i.bf16 %v8403_v23, %v3117_v25 }
 0x523   : > { %v8406_v24 = vpop.f32.mrf.mxu0 }
 0x524   : > { %8838 = vrot.lane.b32.xlu0 %v8837_v37, %s9182_s0 }
 0x525   : > { %v3127_v44 = vpop.f32.mrf.mxu0 }
 0x526   : > { %v8842_v49 = vpack.i.bf16 %v8406_v24, %v3127_v44  ;;  %v4017_v24 = vld [vmem:[%s11898_s8 + $0x78] sm:$0xff] }
 0x527   : > { %v8409_v50 = vpop.f32.mrf.mxu0  ;;  %4069 = vmatpush1.msra.mxu1 %v4017_v24  ;;  %v4014_v24 = vld [vmem:[%s11898_s8 + $0x60] sm:$0xff] }
 0x528   : > { %8843 = vrot.lane.b32.xlu1 %v8842_v49, %s9182_s0  ;;  %4070 = vmatprep.subr.mxu1 %v11922_v22  ;;  %v4016_v49 = vld [vmem:[%s11898_s8 + $0x70] sm:$0xff] }
 0x529   : > { %v3137_v51 = vpop.f32.mrf.mxu0  ;;  %4071 = vmatpush1.msra.mxu1 %v4016_v49 }
 0x52a   : > { %v8847_v17 = vpack.i.bf16 %v8409_v50, %v3137_v51  ;;  %v10311_v50 = vpop.permute.xlu0 %8738  ;;  %4072 = vmatprep.subr.mxu1 %v11922_v22 }
 0x52b   : > { %v8412_v52 = vpop.f32.mrf.mxu0 }
 0x52c   : > { %8848 = vrot.lane.b32.xlu0 %v8847_v17, %s9182_s0  ;;  %v10315_v17 = vpop.permute.xlu1 %8743 }
 0x52d   : > { %v3147_v27 = vpop.f32.mrf.mxu0 }
 0x52e   : > { %v8852_v53 = vpack.i.bf16 %v8412_v52, %v3147_v27  ;;  %v4015_v27 = vld [vmem:[%s11898_s8 + $0x68] sm:$0xff]  ;;  %v10329_v49 = vpop.permute.xlu0 %8748  ;;  %v4012_v52 = vld [vmem:[%s11898_s8 + $0x50] sm:$0xff] }
 0x52f   : > { %v10293_v54 = vpop.f32.mrf.mxu0  ;;  %4073 = vmatpush1.msra.mxu1 %v4015_v27 }
 0x530   : > { %8853 = vrot.lane.b32.xlu1 %v8852_v53, %s9182_s0  ;;  %4074 = vmatprep.subr.mxu1 %v11922_v22  ;;  %v10333_v18 = vpop.permute.xlu1 %8753 }
 0x531   : > { %v10296_v23 = vpop.f32.mrf.mxu0  ;;  %4075 = vmatpush1.msra.mxu1 %v4014_v24 }
 0x532   : > { %4076 = vmatprep.subr.mxu1 %v11922_v22  ;;  %v8759_v61 = vpop.permute.xlu0 %8758 }
 0x533   : > { %v10298_v25 = vpop.f32.mrf.mxu0  ;;  %4077 = vmatpush1.msra.mxu1 %v4013_v46  ;;  %v4010_v46 = vld [vmem:[%s11898_s8 + $0x40] sm:$0xff]  ;;  %v8761_v16 = vunpack.i.h.bf16 %v8759_v61  ;;  %v8760_v57 = vunpack.i.l.bf16 %v8759_v61 }
 0x534   : > { %4078 = vmatprep.subr.mxu1 %v11922_v22 }
 0x535   : > { %v10300_v37 = vpop.f32.mrf.mxu0  ;;  %4079 = vmatpush1.msra.mxu1 %v4012_v52  ;;  %v3893_v61 = vsel %vm1776_vm4, %v10098_v20, %v8761_v16 }
 0x536   : > { %4080 = vmatprep.subr.mxu1 %v11922_v22 }
 0x537   : > { %v10305_v44 = vpop.f32.mrf.mxu0  ;;  %4081 = vmatpush1.msra.mxu1 %v4011_v1  ;;  %v4009_v1 = vld [vmem:[%s11898_s8 + $0x38] sm:$0xff] }
 0x538   : > { %4082 = vmatprep.subr.mxu1 %v11922_v22 }
 0x539   : > { %v10313_v51 = vpop.f32.mrf.mxu0  ;;  %4083 = vmatpush1.msra.mxu1 %v4010_v46  ;;  %v4007_v46 = vld [vmem:[%s11898_s8 + $0x28] sm:$0xff] }
 0x53a   : > { %4084 = vmatprep.subr.mxu1 %v11922_v22 }
 0x53b   : > { %v10323_v53 = vpop.f32.mrf.mxu0  ;;  %4085 = vmatpush1.msra.mxu1 %v4009_v1 }
 0x53c   : > { %4086 = vmatprep.subr.mxu1 %v11922_v22 }
 0x53d   : > { %v10331_v13 = vpop.f32.mrf.mxu0 }
 0x53e   : > { %v10343_v24 = vpop.permute.xlu1 %8773 }
 0x53f   : > { %v8427_v27 = vpop.f32.mrf.mxu0 }
 0x541   : > { %v3197_v6 = vpop.f32.mrf.mxu0 }
 0x542   : > { %v8857_v35 = vpack.i.bf16 %v8427_v27, %v3197_v6 }
 0x543   : > { %v8430_v58 = vpop.f32.mrf.mxu0 }
 0x544   : > { %8858 = vrot.lane.b32.xlu1 %v8857_v35, %s11924_s4  ;;  %v4008_v35 = vld [vmem:[%s11898_s8 + $0x30] sm:$0xff] }
 0x545   : > { %v3207_v6 = vpop.f32.mrf.mxu0  ;;  %4087 = vmatpush1.msra.mxu1 %v4008_v35  ;;  %v4003_v35 = vld [vmem:[%s11898_s8 + $0x8] sm:$0xff] }
 0x546   : > { %v8862_v52 = vpack.i.bf16 %v8430_v58, %v3207_v6  ;;  %v8784_v27 = vpop.permute.xlu1 %8783  ;;  %v3892_v58 = vsel %vm1776_vm4, %v10102_v26, %v8760_v57  ;;  %4088 = vmatprep.subr.mxu1 %v11922_v22  ;;  %v4006_v57 = vld [vmem:[%s11898_s8 + $0x20] sm:$0xff] }
 0x547   : > { %v8786_v42 = vunpack.i.h.bf16 %v8784_v27  ;;  %v8785_v30 = vunpack.i.l.bf16 %v8784_v27  ;;  %v8433_v34 = vpop.f32.mrf.mxu0  ;;  %4089 = vmatpush1.msra.mxu1 %v4007_v46  ;;  %v4002_v46 = vld [vmem:[%s11898_s8] sm:$0xff] }
 0x548   : > { %8863 = vrot.lane.b32.xlu0 %v8862_v52, %s11924_s4  ;;  %4090 = vmatprep.subr.mxu1 %v11922_v22 }
 0x549   : > { %v10371_v6 = vsel %vm3900_vm6, %v3893_v61, %v8786_v42  ;;  %v10374_v27 = vsel %vm3900_vm6, %v3892_v58, %v8785_v30  ;;  %v3217_v1 = vpop.f32.mrf.mxu0  ;;  %v4005_v42 = vld [vmem:[%s11898_s8 + $0x18] sm:$0xff]  ;;  %4091 = vmatpush1.msra.mxu1 %v4006_v57  ;;  %v4019_v57 = vld [vmem:[%s11898_s8 + $0x88] sm:$0xff] }
 0x54a   : > { %11950 = vst [vmem:[#allocation9_spill] sm:$0xff] %v10371_v6  ;;  %v8867_v20 = vpack.i.bf16 %v8433_v34, %v3217_v1  ;;  %4092 = vmatprep.subr.mxu1 %v11922_v22  ;;  %v4004_v34 = vld [vmem:[%s11898_s8 + $0x10] sm:$0xff] }
 0x54b   : > { %v8436_v26 = vpop.f32.mrf.mxu0  ;;  %4093 = vmatpush1.msra.mxu1 %v4005_v42  ;;  %v4018_v42 = vld [vmem:[%s11898_s8 + $0x80] sm:$0xff] }
 0x54c   : > { %8868 = vrot.lane.b32.xlu1 %v8867_v20, %s11924_s4  ;;  %4094 = vmatprep.subr.mxu1 %v11922_v22 }
 0x54d   : > { %v3227_v30 = vpop.f32.mrf.mxu0  ;;  %4095 = vmatpush1.msra.mxu1 %v4004_v34 }
 0x54e   : > { %v8872_v16 = vpack.i.bf16 %v8436_v26, %v3227_v30  ;;  %4096 = vmatprep.subr.mxu1 %v11922_v22 }
 0x54f   : > { %v8439_v52 = vpop.f32.mrf.mxu0  ;;  %4097 = vmatpush1.msra.mxu1 %v4003_v35 }
 0x550   : > { %8873 = vrot.lane.b32.xlu0 %v8872_v16, %s11924_s4  ;;  %4098 = vmatprep.subr.mxu1 %v11922_v22 }
 0x551   : > { %v3237_v61 = vpop.f32.mrf.mxu0  ;;  %4099 = vmatpush1.msra.mxu1 %v4002_v46 }
 0x552   : > { %v8887_v58 = vpack.i.bf16 %v8439_v52, %v3237_v61  ;;  %4128 = vmatprep.subr.mxu1 %v11922_v22 }
 0x553   : > { %v8442_v1 = vpop.f32.mrf.mxu0  ;;  %4129 = vmatpush2.msra.mxu1 %v4019_v57  ;;  %v8882_v57 = vpack.i.bf16 %v10293_v54, %v10296_v23  ;;  %v11953_v23 = vpack.i.bf16 %v10271_v55, %v10274_v56 }
 0x554   : > { %8888 = vrot.lane.b32.xlu1 %v8887_v58, %s11924_s4  ;;  %4130 = vmatprep.subr.mxu1 %v11922_v22  ;;  %v8902_v22 = vpack.i.bf16 %v10226_v31, %v10231_v32 }
 0x555   : > { %v3247_v20 = vpop.f32.mrf.mxu0  ;;  %4131 = vmatpush2.msra.mxu1 %v4018_v42 }
 0x557   : > { %v8445_v26 = vpop.f32.mrf.mxu0 }
 0x559   : > { %v3257_v30 = vpop.f32.mrf.mxu0 }
 0x55b   : > { %v10408_v16 = vpop.f32.mrf.mxu0 }
 0x55d   : > { %v3267_v34 = vpop.f32.mrf.mxu0 }
 0x55f   : > { %v8451_v52 = vpop.f32.mrf.mxu0 }
 0x561   : > { %v3277_v35 = vpop.f32.mrf.mxu0 }
 0x562   : > { %v8877_v61 = vpack.i.bf16 %v8451_v52, %v3277_v35  ;;  %v11951_v52 = vpack.i.bf16 %v10163_v21, %v10168_v29 }
 0x563   : > { %v8454_v58 = vpop.f32.mrf.mxu0 }
 0x564   : > { %8878 = vrot.lane.b32.xlu0 %v8877_v61, %s9184_s23 }
 0x565   : > { %v3287_v46 = vpop.f32.mrf.mxu0 }
 0x566   : > { %v8892_v40 = vpack.i.bf16 %v8454_v58, %v3287_v46  ;;  %v8927_v58 = vpack.i.bf16 %v8442_v1, %v3247_v20  ;;  %v8967_v1 = vpack.i.bf16 %v8445_v26, %v3257_v30 }
 0x567   : > { %v8457_v36 = vpop.f32.mrf.mxu0 }
 0x568   : > { %8883 = vrot.lane.b32.xlu0 %v8882_v57, %s9182_s0  ;;  %8893 = vrot.lane.b32.xlu1 %v8892_v40, %s9184_s23  ;;  %v11955_v40 = vpack.i.bf16 %v10248_v63, %v10251_v0  ;;  %v8942_v0 = vpack.i.bf16 %v10233_v43, %v10237_v45  ;;  %v11958_v43 = vpack.i.bf16 %v10278_v59, %v10280_v60 }
 0x569   : > { %v3297_v42 = vpop.f32.mrf.mxu0  ;;  %v11961_v59 = vpack.i.bf16 %v10284_v62, %v10286_v15  ;;  %v11962_v60 = vpack.i.bf16 %v10261_v9, %v10263_v10 }
 0x56a   : > { %v8922_v32 = vpack.i.bf16 %v8457_v36, %v3297_v42  ;;  %v11956_v36 = vpack.i.bf16 %v10175_v33, %v10179_v14  ;;  %v11959_v14 = vpack.i.bf16 %v10305_v44, %v10313_v51 }
 0x56b   : > { %v8460_v6 = vpop.f32.mrf.mxu0 }
 0x56c   : > { %8903 = vrot.lane.b32.xlu0 %v8902_v22, %s11926_s2  ;;  %8898 = vrot.lane.b32.xlu1 %v11951_v52, %s9178_s3  ;;  %v8917_v22 = vpack.i.bf16 %v10298_v25, %v10300_v37 }
 0x56d   : > { %v3307_v35 = vpop.f32.mrf.mxu0 }
 0x56e   : > { %v8937_v21 = vpack.i.bf16 %v8460_v6, %v3307_v35  ;;  %v11957_v6 = vpack.i.bf16 %v10255_v3, %v10257_v4  ;;  %v8982_v3 = vpack.i.bf16 %v10239_v47, %v10242_v48  ;;  %v11960_v4 = vpack.i.bf16 %v10186_v41, %v10190_v38  ;;  %v8764_v41 = vpop.permute.xlu0 %8763  ;;  %v8789_v38 = vpop.permute.xlu1 %8788 }
 0x56f   : > { %v8463_v54 = vpop.f32.mrf.mxu0  ;;  %v8740_v35 = vunpack.i.l.bf16 %v10311_v50 }
 0x570   : > { %8913 = vrot.lane.b32.xlu0 %v11953_v23, %s11952_s1  ;;  %8908 = vrot.lane.b32.xlu1 %v11955_v40, %s11954_s28  ;;  %v8790_v23 = vunpack.i.l.bf16 %v8789_v38  ;;  %v8741_v40 = vunpack.i.h.bf16 %v10311_v50 }
 0x571   : > { %v3317_v31 = vpop.f32.mrf.mxu0 }
 0x572   : > { %v8957_v20 = vpack.i.bf16 %v8463_v54, %v3317_v31  ;;  %v10486_v47 = vpop.permute.xlu0 %8768  ;;  %v10490_v9 = vpop.permute.xlu1 %8793  ;;  %v8765_v54 = vunpack.i.l.bf16 %v8764_v41  ;;  %v3885_v50 = vsel %vm1776_vm4, %v10062_v2, %v8741_v40 }
 0x573   : > { %v8466_v61 = vpop.f32.mrf.mxu0  ;;  %v8771_v40 = vunpack.i.h.bf16 %v10486_v47 }
 0x574   : > { %8918 = vrot.lane.b32.xlu1 %v8917_v22, %s9182_s0  ;;  %8923 = vrot.lane.b32.xlu0 %v8922_v32, %s9184_s23 }
 0x575   : > { %v3327_v29 = vpop.f32.mrf.mxu0 }
 0x576   : > { %v8972_v33 = vpack.i.bf16 %v8466_v61, %v3327_v29  ;;  %v10488_v48 = vpop.permute.xlu0 %8778  ;;  %v3884_v61 = vsel %vm1776_vm4, %v10066_v5, %v8740_v35  ;;  %v8766_v29 = vunpack.i.h.bf16 %v8764_v41 }
 0x577   : > { %v8469_v55 = vpop.f32.mrf.mxu0 }
 0x578   : > { %8928 = vrot.lane.b32.xlu0 %v8927_v58, %s11924_s4  ;;  %8938 = vrot.lane.b32.xlu1 %v8937_v21, %s9184_s23  ;;  %v3901_v58 = vsel %vm3900_vm6, %v3884_v61, %v8765_v54 }
 0x579   : > { %v3337_v63 = vpop.f32.mrf.mxu0 }
 0x57a   : > { %v8997_v44 = vpack.i.bf16 %v8469_v55, %v3337_v63  ;;  %v10492_v10 = vpop.permute.xlu0 %8798  ;;  %v8791_v63 = vunpack.i.h.bf16 %v8789_v38 }
 0x57b   : > { %v8472_v56 = vpop.f32.mrf.mxu0 }
 0x57c   : > { %8933 = vrot.lane.b32.xlu0 %v11956_v36, %s9178_s3  ;;  %8943 = vrot.lane.b32.xlu1 %v8942_v0, %s11926_s2  ;;  %v3918_v0 = vsel %vm3917_vm7, %v3901_v58, %v8790_v23 }
 0x57d   : > { %v3347_v25 = vpop.f32.mrf.mxu0 }
 0x57e   : > { %v10496_v62 = vpop.permute.xlu0 %8808 }
 0x57f   : > { %v10443_v37 = vpop.f32.mrf.mxu0 }
 0x580   : > { %8948 = vrot.lane.b32.xlu0 %v11957_v6, %s11954_s28  ;;  %8953 = vrot.lane.b32.xlu1 %v11958_v43, %s11952_s1  ;;  %v8745_v6 = vunpack.i.l.bf16 %v10315_v17 }
 0x581   : > { %v3357_v45 = vpop.f32.mrf.mxu0 }
 0x582   : > { %7011 = vmatprep.mubr.msk.f32.mxu1 %vm1776_vm4, %v3357_v45  ;;  %v10498_v51 = vpop.permute.xlu0 %8818  ;;  %v3886_v35 = vsel %vm1776_vm4, %v10075_v11, %v8745_v6 }
 0x583   : > { %v8820_v38 = vunpack.i.l.bf16 %v10498_v51 }
 0x584   : > { %8968 = vrot.lane.b32.xlu1 %v8967_v1, %s11924_s4  ;;  %8958 = vrot.lane.b32.xlu0 %v8957_v20, %s9184_s23  ;;  %v3902_v20 = vsel %vm3900_vm6, %v3885_v50, %v8766_v29 }
 0x586   : > { %v10502_v26 = vpop.permute.xlu0 %8828 }
 0x588   : > { %8963 = vrot.lane.b32.xlu0 %v11959_v14, %s9182_s0  ;;  %8973 = vrot.lane.b32.xlu1 %v8972_v33, %s9184_s23  ;;  %v8770_v33 = vunpack.i.l.bf16 %v10486_v47 }
 0x58c   : > { %8983 = vrot.lane.b32.xlu0 %v8982_v3, %s11926_s2  ;;  %8978 = vrot.lane.b32.xlu1 %v11960_v4, %s9178_s3  ;;  %v8478_v3 = vpop.f32.mrf.mxu0  ;;  %v3919_v4 = vsel %vm3917_vm7, %v3902_v20, %v8791_v63 }
 0x590   : > { %8993 = vrot.lane.b32.xlu0 %v11961_v59, %s11952_s1  ;;  %8988 = vrot.lane.b32.xlu1 %v11962_v60, %s11954_s28  ;;  %v8795_v59 = vunpack.i.l.bf16 %v10490_v9  ;;  %s11970_s28 = smov 32  }
 0x594   : > { %3736 = vrot.lane.b32.xlu1 %v10331_v13, %s9182_s0  ;;  %8998 = vrot.lane.b32.xlu0 %v8997_v44, %s9184_s23  ;;  %v10494_v13 = vpop.permute.xlu1 %8803 }
 0x598   : > { %3800 = vrot.lane.b32.xlu0 %v3267_v34, %s11924_s4  ;;  %3864 = vrot.lane.b32.xlu1 %v3347_v25, %s9184_s23  ;;  %v8814_v15 = vpop.permute.xlu1 %8813 }
 0x599   : > { %v8815_v31 = vunpack.i.l.bf16 %v8814_v15 }
 0x59b   : > { %v3935_v36 = vsel %vm3934_vm8, %v3918_v0, %v8815_v31  ;;  %v3903_v31 = vsel %vm3900_vm6, %v3886_v35, %v8770_v33  ;;  %v8751_v33 = vunpack.i.h.bf16 %v10329_v49  ;;  %v8801_v35 = vunpack.i.h.bf16 %v10492_v10 }
 0x59c   : > { %3738 = vrot.lane.b32.xlu0 %v10323_v53, %s9182_s0  ;;  %3802 = vrot.lane.b32.xlu1 %v10408_v16, %s11924_s4  ;;  %v10500_v53 = vpop.permute.xlu1 %8823  ;;  %v8839_v16 = vpop.permute.xlu0 %8838  ;;  %v3920_v11 = vsel %vm3917_vm7, %v3903_v31, %v8795_v59  ;;  %s11971_s0 = smov 96  }
 0x59d   : > { %v8840_v21 = vunpack.i.l.bf16 %v8839_v16  ;;  %v8841_v43 = vunpack.i.h.bf16 %v8839_v16  ;;  %v3937_v63 = vsel %vm3934_vm8, %v3920_v11, %v8820_v38 }
 0x59f   : > { %v3952_v45 = vsel %vm3951_vm9, %v3935_v36, %v8840_v21  ;;  %v3367_v21 = vpop.f32.mrf.mxu0 }
 0x5a0   : > { %3866 = vrot.lane.b32.xlu0 %v8472_v56, %s9184_s23  ;;  %v10504_v30 = vpop.permute.xlu1 %8833  ;;  %v10508_v46 = vpop.permute.xlu0 %8848  ;;  %v8816_v56 = vunpack.i.h.bf16 %v8814_v15 }
 0x5a2   : > { %v3936_v41 = vsel %vm3934_vm8, %v3919_v4, %v8816_v56  ;;  %v8750_v56 = vunpack.i.l.bf16 %v10329_v49  ;;  %v8776_v49 = vunpack.i.h.bf16 %v10343_v24 }
 0x5a3   : > { %v3953_v23 = vsel %vm3951_vm9, %v3936_v41, %v8841_v43 }
 0x5a4   : > { %v10506_v34 = vpop.permute.xlu1 %8843 }
 0x5a5   : > { %v8845_v54 = vunpack.i.l.bf16 %v10506_v34 }
 0x5a7   : > { %v3954_v36 = vsel %vm3951_vm9, %v3937_v63, %v8845_v54 }
 0x5a8   : > { %v10510_v57 = vpop.permute.xlu1 %8853 }
 0x5b6   : > { %v8859_v42 = vpop.permute.xlu1 %8858 }
 0x5b7   : > { %v8860_v55 = vunpack.i.l.bf16 %v8859_v42  ;;  %v8861_v14 = vunpack.i.h.bf16 %v8859_v42  ;;  %v8746_v42 = vunpack.i.h.bf16 %v10315_v17  ;;  %v8796_v17 = vunpack.i.h.bf16 %v10490_v9 }
 0x5b8   : > { %v8846_v9 = vunpack.i.h.bf16 %v10506_v34 }
 0x5b9   : > { %v3969_v2 = vsel %vm3968_vm10, %v3952_v45, %v8860_v55  ;;  %v3970_v29 = vsel %vm3968_vm10, %v3953_v23, %v8861_v14  ;;  %v3887_v50 = vsel %vm1776_vm4, %v10071_v7, %v8746_v42  ;;  %v8481_v45 = vpop.f32.mrf.mxu0  ;;  %v8800_v7 = vunpack.i.l.bf16 %v10492_v10 }
 0x5ba   : > { %v10512_v52 = vpop.permute.xlu0 %8863  ;;  %v8826_v23 = vunpack.i.h.bf16 %v10500_v53 }
 0x5bb   : > { %v8865_v61 = vunpack.i.l.bf16 %v10512_v52  ;;  %v8866_v6 = vunpack.i.h.bf16 %v10512_v52  ;;  %v3888_v52 = vsel %vm1776_vm4, %v10084_v19, %v8750_v56 }
 0x5bd   : > { %v3971_v43 = vsel %vm3968_vm10, %v3954_v36, %v8865_v61  ;;  %v8755_v61 = vunpack.i.l.bf16 %v10333_v18 }
 0x5be   : > { %v10516_v22 = vpop.permute.xlu1 %8868 }
 0x5bf   : > { %v8870_v38 = vunpack.i.l.bf16 %v10516_v22 }
 0x5c2   : > { %v10518_v32 = vpop.permute.xlu0 %8873 }
 0x5c6   : > { %v10527_v25 = vpop.permute.xlu1 %8888 }
 0x5d6   : > { %v8879_v5 = vpop.permute.xlu0 %8878 }
 0x5d7   : > { %v8880_v1 = vunpack.i.l.bf16 %v8879_v5  ;;  %v8881_v60 = vunpack.i.h.bf16 %v8879_v5  ;;  %v8775_v5 = vunpack.i.l.bf16 %v10343_v24 }
 0x5d9   : > { %v3986_v44 = vsel %vm3985_vm11, %v3969_v2, %v8880_v1  ;;  %v3987_v55 = vsel %vm3985_vm11, %v3970_v29, %v8881_v60  ;;  %v8825_v2 = vunpack.i.l.bf16 %v10500_v53  ;;  %v8850_v60 = vunpack.i.l.bf16 %v10508_v46 }
 0x5da   : > { %v10539_v15 = vpop.permute.xlu0 %8883  ;;  %v8894_v16 = vpop.permute.xlu1 %8893  ;;  %4133 = vmatmul.mubr.f32.vlgmr.msra.gmra.mxu1 %v3986_v44  ;;  %v3905_v41 = vsel %vm3900_vm6, %v3888_v52, %v8775_v5  ;;  %v8871_v53 = vunpack.i.h.bf16 %v10516_v22  ;;  %v3890_v22 = vsel %vm1776_vm4, %v10093_v28, %v8755_v61  ;;  %v8781_v5 = vunpack.i.h.bf16 %v10488_v48 }
 0x5db   : > { %7012 = vmatprep.mubr.msk.f32.mxu1 %vm1776_vm4, %v10443_v37  ;;  %v8895_v58 = vunpack.i.l.bf16 %v8894_v16  ;;  %v8821_v37 = vunpack.i.h.bf16 %v10498_v51  ;;  %v3904_v51 = vsel %vm3900_vm6, %v3887_v50, %v8771_v40  ;;  %v8896_v20 = vunpack.i.h.bf16 %v8894_v16  ;;  %v3377_v16 = vpop.f32.mrf.mxu0 }
 0x5dc   : > { %v3921_v1 = vsel %vm3917_vm7, %v3904_v51, %v8796_v17  ;;  %v3922_v54 = vsel %vm3917_vm7, %v3905_v41, %v8800_v7  ;;  %v8756_v50 = vunpack.i.h.bf16 %v10333_v18  ;;  %v8875_v7 = vunpack.i.l.bf16 %v10518_v32 }
 0x5dd   : > { %v3988_v34 = vsel %vm3985_vm11, %v3971_v43, %v8895_v58  ;;  %v3938_v14 = vsel %vm3934_vm8, %v3921_v1, %v8821_v37  ;;  %v3939_v24 = vsel %vm3934_vm8, %v3922_v54, %v8825_v2  ;;  %v8484_v58 = vpop.f32.mrf.mxu0  ;;  %v8805_v37 = vunpack.i.l.bf16 %v10494_v13 }
 0x5de   : > { %v10557_v0 = vpop.permute.xlu0 %8903  ;;  %v10559_v47 = vpop.permute.xlu1 %8898  ;;  %4138 = vmatmul.mubr.f32.gmra.mxu1 %v3987_v55  ;;  %v3955_v44 = vsel %vm3951_vm9, %v3938_v14, %v8846_v9  ;;  %v3956_v29 = vsel %vm3951_vm9, %v3939_v24, %v8850_v60  ;;  %v8830_v9 = vunpack.i.l.bf16 %v10502_v26  ;;  %v8806_v1 = vunpack.i.h.bf16 %v10494_v13 }
 0x5df   : > { %7013 = vmatprep.mubr.msk.f32.mxu1 %vm1776_vm4, %v3367_v21  ;;  %v3972_v42 = vsel %vm3968_vm10, %v3955_v44, %v8866_v6  ;;  %v8851_v21 = vunpack.i.h.bf16 %v10508_v46  ;;  %v3973_v11 = vsel %vm3968_vm10, %v3956_v29, %v8870_v38  ;;  %v8855_v6 = vunpack.i.l.bf16 %v10510_v57 }
 0x5e0   : > { %v3989_v19 = vsel %vm3985_vm11, %v3972_v42, %v8896_v20  ;;  %v3387_v20 = vpop.f32.mrf.mxu0  ;;  %v3891_v14 = vsel %vm1776_vm4, %v10089_v8, %v8756_v50  ;;  %v8810_v44 = vunpack.i.l.bf16 %v10496_v62  ;;  %v8876_v38 = vunpack.i.h.bf16 %v10518_v32 }
 0x5e1   : > { %v3908_v60 = vsel %vm3900_vm6, %v3891_v14, %v8781_v5  ;;  %v8900_v54 = vunpack.i.l.bf16 %v10559_v47  ;;  %v8836_v61 = vunpack.i.h.bf16 %v10504_v30  ;;  %v8886_v29 = vunpack.i.h.bf16 %v10539_v15 }
 0x5e2   : > { %v10577_v4 = vpop.permute.xlu0 %8913  ;;  %v10579_v59 = vpop.permute.xlu1 %8908  ;;  %4143 = vmatmul.mubr.f32.gmra.mxu1 %v3988_v34  ;;  %v3925_v8 = vsel %vm3917_vm7, %v3908_v60, %v8806_v1  ;;  %v3926_v32 = vsel %vm3917_vm7, %v10374_v27, %v8810_v44 }
 0x5e3   : > { %7014 = vmatprep.mubr.msk.f32.mxu1 %vm1776_vm4, %v8478_v3  ;;  %v3889_v3 = vsel %vm1776_vm4, %v10080_v12, %v8751_v33  ;;  %v8780_v12 = vunpack.i.l.bf16 %v10488_v48  ;;  %v8487_v42 = vpop.f32.mrf.mxu0  ;;  %v3894_v27 = vsel %vm1776_vm4, %v10111_v39, %v8900_v54  ;;  %v11964_v39 = vld [vmem:[#allocation4_spill] sm:$0xff] }
 0x5e4   : > { %v3906_v17 = vsel %vm3900_vm6, %v3889_v3, %v8776_v49  ;;  %v8856_v49 = vunpack.i.h.bf16 %v10510_v57  ;;  %v8811_v3 = vunpack.i.h.bf16 %v10496_v62 }
 0x5e5   : > { %v3923_v55 = vsel %vm3917_vm7, %v3906_v17, %v8801_v35  ;;  %v3907_v18 = vsel %vm3900_vm6, %v3890_v22, %v8780_v12  ;;  %v8885_v35 = vunpack.i.l.bf16 %v10539_v15  ;;  %v8905_v17 = vunpack.i.l.bf16 %v10557_v0  ;;  %v3397_v12 = vpop.f32.mrf.mxu0 }
 0x5e6   : > { %v10597_v40 = vpop.permute.xlu1 %8918  ;;  %v8924_v31 = vpop.permute.xlu0 %8923  ;;  %4148 = vmatmul.mubr.f32.gmra.mxu1 %v3989_v19  ;;  %v3940_v56 = vsel %vm3934_vm8, %v3923_v55, %v8826_v23  ;;  %v3924_v33 = vsel %vm3917_vm7, %v3907_v18, %v8805_v37  ;;  %v8890_v37 = vunpack.i.l.bf16 %v10527_v25  ;;  %v8906_v15 = vunpack.i.h.bf16 %v10557_v0 }
 0x5e7   : > { %v8925_v10 = vunpack.i.l.bf16 %v8924_v31  ;;  %7015 = vmatprep.mubr.msk.f32.mxu1 %vm1776_vm4, %v3377_v16  ;;  %v8926_v63 = vunpack.i.h.bf16 %v8924_v31  ;;  %v3957_v43 = vsel %vm3951_vm9, %v3940_v56, %v8851_v21  ;;  %v3941_v2 = vsel %vm3934_vm8, %v3924_v33, %v8830_v9 }
 0x5e8   : > { %v3974_v34 = vsel %vm3968_vm10, %v3957_v43, %v8871_v53  ;;  %v3958_v41 = vsel %vm3951_vm9, %v3941_v2, %v8855_v6  ;;  %v8901_v21 = vunpack.i.h.bf16 %v10559_v47  ;;  %v8911_v9 = vunpack.i.h.bf16 %v10579_v59  ;;  %v8490_v6 = vpop.f32.mrf.mxu0 }
 0x5e9   : > { %v3990_v46 = vsel %vm3985_vm11, %v3973_v11, %v8925_v10  ;;  %v3991_v48 = vsel %vm3985_vm11, %v3974_v34, %v8926_v63  ;;  %v3975_v16 = vsel %vm3968_vm10, %v3958_v41, %v8875_v7  ;;  %v8915_v22 = vunpack.i.l.bf16 %v10577_v4  ;;  %v11965_v41 = vld [vmem:[#allocation6_spill] sm:$0xff] }
 0x5ea   : > { %v10613_v36 = vpop.permute.xlu0 %8928  ;;  %v8939_v51 = vpop.permute.xlu1 %8938  ;;  %4153 = vmatmul.mubr.f32.gmra.mxu1 %v3990_v46  ;;  %v3895_v56 = vsel %vm1776_vm4, %v11964_v39, %v8901_v21  ;;  %v3911_v5 = vsel %vm3900_vm6, %v3894_v27, %v8905_v17  ;;  %v8916_v34 = vunpack.i.h.bf16 %v10577_v4 }
 0x5eb   : > { %7016 = vmatprep.mubr.msk.f32.mxu1 %vm1776_vm4, %v8481_v45  ;;  %v8940_v28 = vunpack.i.l.bf16 %v8939_v51  ;;  %v8831_v45 = vunpack.i.h.bf16 %v10502_v26  ;;  %v8835_v26 = vunpack.i.l.bf16 %v10504_v30  ;;  %v8941_v19 = vunpack.i.h.bf16 %v8939_v51  ;;  %v3407_v44 = vpop.f32.mrf.mxu0 }
 0x5ec   : > { %v8910_v30 = vunpack.i.l.bf16 %v10579_v59  ;;  %v8891_v59 = vunpack.i.h.bf16 %v10527_v25  ;;  %v3912_v33 = vsel %vm3900_vm6, %v3895_v56, %v8906_v15  ;;  %v8930_v2 = vunpack.i.l.bf16 %v10613_v36 }
 0x5ed   : > { %v3992_v57 = vsel %vm3985_vm11, %v3975_v16, %v8940_v28  ;;  %v3942_v23 = vsel %vm3934_vm8, %v3925_v8, %v8831_v45  ;;  %v3943_v62 = vsel %vm3934_vm8, %v3926_v32, %v8835_v26  ;;  %v8920_v28 = vunpack.i.l.bf16 %v10597_v40 }
 0x5ee   : > { %v10631_v52 = vpop.permute.xlu0 %8933  ;;  %v10633_v13 = vpop.permute.xlu1 %8943  ;;  %4158 = vmatmul.mubr.f32.gmra.mxu1 %v3991_v48  ;;  %v3959_v10 = vsel %vm3951_vm9, %v3942_v23, %v8856_v49  ;;  %v3960_v11 = vsel %vm3951_vm9, %v3943_v62, %v8885_v35  ;;  %v3928_v18 = vsel %vm3917_vm7, %v3911_v5, %v8910_v30  ;;  %v3929_v45 = vsel %vm3917_vm7, %v3912_v33, %v8911_v9 }
 0x5ef   : > { %7017 = vmatprep.mubr.msk.f32.mxu1 %vm1776_vm4, %v3387_v20  ;;  %v3976_v53 = vsel %vm3968_vm10, %v3959_v10, %v8876_v38  ;;  %v3977_v0 = vsel %vm3968_vm10, %v3960_v11, %v8890_v37  ;;  %v8935_v1 = vunpack.i.l.bf16 %v10631_v52  ;;  %v8936_v60 = vunpack.i.h.bf16 %v10631_v52 }
 0x5f0   : > { %v3993_v47 = vsel %vm3985_vm11, %v3976_v53, %v8941_v19  ;;  %v8945_v25 = vunpack.i.l.bf16 %v10633_v13  ;;  %v3945_v49 = vsel %vm3934_vm8, %v3928_v18, %v8915_v22  ;;  %v8921_v35 = vunpack.i.h.bf16 %v10597_v40 }
 0x5f1   : > { %v3896_v8 = vsel %vm1776_vm4, %v11965_v41, %v8935_v1  ;;  %v3962_v54 = vsel %vm3951_vm9, %v3945_v49, %v8920_v28  ;;  %v3946_v19 = vsel %vm3934_vm8, %v3929_v45, %v8916_v34  ;;  %v11968_v28 = vld [vmem:[#allocation7_spill] sm:$0xff] }
 0x5f2   : > { %v10649_v24 = vpop.permute.xlu0 %8948  ;;  %v10651_v31 = vpop.permute.xlu1 %8953  ;;  %4163 = vmatmul.mubr.f32.gmra.mxu1 %v3992_v57  ;;  %v8931_v57 = vunpack.i.h.bf16 %v10613_v36  ;;  %v3979_v32 = vsel %vm3968_vm10, %v3962_v54, %v8930_v2  ;;  %v3913_v21 = vsel %vm3900_vm6, %v3896_v8, %v8945_v25 }
 0x5f3   : > { %7018 = vmatprep.mubr.msk.f32.mxu1 %vm1776_vm4, %v8484_v58  ;;  %v11963_v58 = vld [vmem:[#allocation9_spill] sm:$0xff]  ;;  %v8950_v26 = vunpack.i.l.bf16 %v10649_v24  ;;  %v8951_v10 = vunpack.i.h.bf16 %v10649_v24  ;;  %v8955_v62 = vunpack.i.l.bf16 %v10651_v31  ;;  %v8956_v24 = vunpack.i.h.bf16 %v10651_v31 }
 0x5f4   : > { %v3927_v55 = vsel %vm3917_vm7, %v11963_v58, %v8811_v3  ;;  %v8946_v3 = vunpack.i.h.bf16 %v10633_v13  ;;  %v11967_v58 = vld [vmem:[#allocation8_spill] sm:$0xff] }
 0x5f5   : > { %v3944_v50 = vsel %vm3934_vm8, %v3927_v55, %v8836_v61  ;;  %v11966_v61 = vld [vmem:[#allocation5_spill] sm:$0xff]  ;;  %v3930_v17 = vsel %vm3917_vm7, %v3913_v21, %v8950_v26 }
 0x5f6   : > { %v10672_v63 = vpop.permute.xlu1 %8968  ;;  %v8959_v46 = vpop.permute.xlu0 %8958  ;;  %4168 = vmatmul.mubr.f32.gmra.mxu1 %v3993_v47  ;;  %v3961_v43 = vsel %vm3951_vm9, %v3944_v50, %v8886_v29  ;;  %v3897_v40 = vsel %vm1776_vm4, %v11966_v61, %v8936_v60  ;;  %v3963_v47 = vsel %vm3951_vm9, %v3946_v19, %v8921_v35  ;;  %v10763_v61 = vld [vmem:[%s11900_s10] sm:$0xff]  }
 0x5f7   : > { %v8960_v51 = vunpack.i.l.bf16 %v8959_v46  ;;  %7019 = vmatprep.mubr.msk.f32.mxu1 %vm1776_vm4, %v3397_v12  ;;  %v8961_v7 = vunpack.i.h.bf16 %v8959_v46  ;;  %v3978_v4 = vsel %vm3968_vm10, %v3961_v43, %v8891_v59  ;;  %v8493_v29 = vpop.f32.mrf.mxu0  ;;  %v3914_v11 = vsel %vm3900_vm6, %v3897_v40, %v8946_v3 }
 0x5f8   : > { %v3931_v15 = vsel %vm3917_vm7, %v3914_v11, %v8951_v10  ;;  %v3947_v46 = vsel %vm3934_vm8, %v3930_v17, %v8955_v62  ;;  %v3980_v56 = vsel %vm3968_vm10, %v3963_v47, %v8931_v57  ;;  %v8970_v22 = vunpack.i.l.bf16 %v10672_v63 }
 0x5f9   : > { %v3994_v20 = vsel %vm3985_vm11, %v3977_v0, %v8960_v51  ;;  %v3995_v16 = vsel %vm3985_vm11, %v3978_v4, %v8961_v7  ;;  %v3417_v39 = vpop.f32.mrf.mxu0  ;;  %v3948_v18 = vsel %vm3934_vm8, %v3931_v15, %v8956_v24  ;;  %v8971_v60 = vunpack.i.h.bf16 %v10672_v63 }
 0x5fa   : > { %v10690_v48 = vpop.permute.xlu0 %8963  ;;  %v8974_v14 = vpop.permute.xlu1 %8973  ;;  %4173 = vmatmul.mubr.f32.gmra.mxu1 %v3994_v20  ;;  %v7446_v40 = vunpack.c.l.bf16 %v10763_v61 }
 0x5fb   : > { %7020 = vmatprep.mubr.msk.f32.mxu1 %vm1776_vm4, %v8487_v42  ;;  %v8975_v38 = vunpack.i.l.bf16 %v8974_v14  ;;  %v8965_v36 = vunpack.i.l.bf16 %v10690_v48  ;;  %v8976_v13 = vunpack.i.h.bf16 %v8974_v14  ;;  %v8966_v50 = vunpack.i.h.bf16 %v10690_v48  ;;  %v8496_v34 = vpop.f32.mrf.mxu0 }
 0x5fd   : > { %v3996_v12 = vsel %vm3985_vm11, %v3979_v32, %v8975_v38  ;;  %v3997_v51 = vsel %vm3985_vm11, %v3980_v56, %v8976_v13  ;;  %v3964_v31 = vsel %vm3951_vm9, %v3947_v46, %v8965_v36  ;;  %v3965_v33 = vsel %vm3951_vm9, %v3948_v18, %v8966_v50  ;;  %v3427_v8 = vpop.f32.mrf.mxu0 }
 0x5fe   : > { %v10704_v42 = vpop.permute.xlu0 %8983  ;;  %v8979_v52 = vpop.permute.xlu1 %8978  ;;  %4178 = vmatmul.mubr.f32.gmra.mxu1 %v3995_v16  ;;  %v3981_v59 = vsel %vm3968_vm10, %v3964_v31, %v8970_v22  ;;  %v3982_v26 = vsel %vm3968_vm10, %v3965_v33, %v8971_v60 }
 0x5ff   : > { %v8980_v23 = vunpack.i.l.bf16 %v8979_v52  ;;  %7021 = vmatprep.mubr.msk.f32.mxu1 %vm1776_vm4, %v3407_v44  ;;  %v8985_v53 = vunpack.i.l.bf16 %v10704_v42  ;;  %v8981_v9 = vunpack.i.h.bf16 %v8979_v52  ;;  %v8986_v20 = vunpack.i.h.bf16 %v10704_v42 }
 0x601   : > { %v3898_v55 = vsel %vm1776_vm4, %v11967_v58, %v8980_v23  ;;  %v3899_v48 = vsel %vm1776_vm4, %v11968_v28, %v8981_v9 }
 0x602   : > { %v8994_v27 = vpop.permute.xlu0 %8993  ;;  %v8989_v30 = vpop.permute.xlu1 %8988  ;;  %4183 = vmatmul.mubr.f32.gmra.mxu1 %v3996_v12  ;;  %v3916_v41 = vsel %vm3900_vm6, %v3899_v48, %v8986_v20 }
 0x603   : > { %v8990_v37 = vunpack.i.l.bf16 %v8989_v30  ;;  %7022 = vmatprep.mubr.msk.f32.mxu1 %vm1776_vm4, %v8490_v6  ;;  %v8995_v5 = vunpack.i.l.bf16 %v8994_v27  ;;  %v3915_v6 = vsel %vm3900_vm6, %v3898_v55, %v8985_v53  ;;  %v8991_v14 = vunpack.i.h.bf16 %v8989_v30 }
 0x604   : > { %v8996_v49 = vunpack.i.h.bf16 %v8994_v27 }
 0x605   : > { %v3932_v1 = vsel %vm3917_vm7, %v3915_v6, %v8990_v37  ;;  %v3933_v16 = vsel %vm3917_vm7, %v3916_v41, %v8991_v14 }
 0x606   : > { %v3737_v0 = vpop.permute.xlu1 %3736  ;;  %v8999_v43 = vpop.permute.xlu0 %8998  ;;  %4188 = vmatmul.mubr.f32.gmra.mxu1 %v3997_v51  ;;  %v3949_v25 = vsel %vm3934_vm8, %v3932_v1, %v8995_v5  ;;  %v3950_v52 = vsel %vm3934_vm8, %v3933_v16, %v8996_v49 }
 0x607   : > { %v9000_v7 = vunpack.i.l.bf16 %v8999_v43  ;;  %7023 = vmatprep.mubr.msk.f32.mxu1 %vm1776_vm4, %v3417_v39  ;;  %v9001_v45 = vunpack.i.h.bf16 %v8999_v43  ;;  %v3966_v38 = vsel %vm3951_vm9, %v3949_v25, %v3737_v0 }
 0x609   : > { %v3998_v2 = vsel %vm3985_vm11, %v3981_v59, %v9000_v7  ;;  %v3999_v35 = vsel %vm3985_vm11, %v3982_v26, %v9001_v45  ;;  %v11969_v45 = vld [vmem:[#allocation3_spill] sm:$0xff] }
 0x60a   : > { %v3801_v44 = vpop.permute.xlu0 %3800  ;;  %4193 = vmatmul.mubr.f32.gmra.mxu1 %v3998_v2  ;;  %v3865_v4 = vpop.permute.xlu1 %3864  ;;  %v4244_v2 = vadd.s32 24, %v11969_v45  ;;  %vm6437_vm14 = vcmp.lt.s32.totalorder %v11969_v45, 4 }
 0x60b   : > { %7024 = vmatprep.mubr.msk.f32.mxu1 %vm1776_vm4, %v8493_v29  ;;  %v3983_v63 = vsel %vm3968_vm10, %v3966_v38, %v3801_v44 }
 0x60c   : > { %v4000_v57 = vsel %vm3985_vm11, %v3983_v63, %v3865_v4  ;;  %v7027_v4 = vld [vmem:[%s11899_s9] ss:$0 sm:$0xff]  ;;  %vm4248_vm12 = vcmp.lt.s32.totalorder %v4244_v2, 25 }
 0x60e   : > { %v3739_v42 = vpop.permute.xlu0 %3738  ;;  %4198 = vmatmul.mubr.f32.gmra.mxu1 %v3999_v35  ;;  %v3803_v19 = vpop.permute.xlu1 %3802 }
 0x60f   : > { %7025 = vmatprep.mubr.msk.f32.mxu1 %vm1776_vm4, %v3427_v8  ;;  %v3967_v54 = vsel %vm3951_vm9, %v3950_v52, %v3739_v42  ;;  %v7731_v42 = vld [vmem:[%s11900_s10 + $0x8] sm:$0xff]  }
 0x610   : > { %v3984_v23 = vsel %vm3968_vm10, %v3967_v54, %v3803_v19  ;;  %v7447_v54 = vunpack.c.h.bf16 %v10763_v61  ;;  %v7450_v19 = vunpack.c.l.bf16 %v7731_v42 }
 0x612   : > { %v3867_v3 = vpop.permute.xlu0 %3866  ;;  %4203 = vmatmul.mubr.f32.gmra.mxu1 %v4000_v57  ;;  %v7732_v57 = vld [vmem:[%s11900_s10 + $0x10] sm:$0xff]  }
 0x613   : > { %7026 = vmatprep.mubr.msk.f32.mxu1 %vm1776_vm4, %v8496_v34  ;;  %v4001_v32 = vsel %vm3985_vm11, %v3984_v23, %v3867_v3  ;;  %v7451_v3 = vunpack.c.h.bf16 %v7731_v42  ;;  %v7454_v23 = vunpack.c.l.bf16 %v7732_v57  ;;  %v7455_v61 = vunpack.c.h.bf16 %v7732_v57  ;;  %v7753_v57 = vld [vmem:[%s11900_s10 + $0xb8] sm:$0xff]  }
 0x616   : > { %4208 = vmatmul.mubr.f32.gmra.mxu1 %v4001_v32  ;;  %v7733_v32 = vld [vmem:[%s11900_s10 + $0x18] sm:$0xff]  }
 0x617   : > { %8505 = vmatprep.mubr.msk.f32.mxu1 %vm3900_vm6, %v7446_v40  ;;  %v7458_v40 = vunpack.c.l.bf16 %v7733_v32 }
 0x69a   : > { %v4134_v21 = vpop.f32.mrf.mxu1 }
 0x69c   : > { %v4136_v10 = vpop.f32.mrf.mxu1 }
 0x69d   : > { %v7459_v10 = vunpack.c.h.bf16 %v7733_v32  ;;  %v7754_v32 = vld [vmem:[%s11900_s10 + $0xc0] sm:$0xff]  }
 0x69e   : > { %v4139_v62 = vpop.f32.mrf.mxu1 }
 0x6a0   : > { %v4141_v29 = vpop.f32.mrf.mxu1 }
 0x6a1   : > { %v7735_v29 = vld [vmem:[%s11900_s10 + $0x28] sm:$0xff]  }
 0x6a2   : > { %v4144_v17 = vpop.f32.mrf.mxu1 }
 0x6a4   : > { %v4146_v36 = vpop.f32.mrf.mxu1 }
 0x6a5   : > { %v7466_v36 = vunpack.c.l.bf16 %v7735_v29 }
 0x6a6   : > { %v4149_v13 = vpop.f32.mrf.mxu1 }
 0x6a8   : > { %v4151_v12 = vpop.f32.mrf.mxu1 }
 0x6a9   : > { %v7467_v12 = vunpack.c.h.bf16 %v7735_v29  ;;  %v7756_v29 = vld [vmem:[%s11900_s10 + $0xd0] sm:$0xff]  }
 0x6aa   : > { %v4154_v53 = vpop.f32.mrf.mxu1 }
 0x6ab   : > { %v4213_v60 = vmax.f32 %v4134_v21, %v4154_v53  ;;  %v7734_v21 = vld [vmem:[%s11900_s10 + $0x20] sm:$0xff]  }
 0x6ac   : > { %v4156_v27 = vpop.f32.mrf.mxu1 }
 0x6ad   : > { %v7737_v27 = vld [vmem:[%s11900_s10 + $0x38] sm:$0xff]  }
 0x6ae   : > { %v4159_v30 = vpop.f32.mrf.mxu1 }
 0x6af   : > { %v4214_v20 = vmax.f32 %v4139_v62, %v4159_v30  ;;  %v7462_v62 = vunpack.c.l.bf16 %v7734_v21 }
 0x6b0   : > { %v4161_v47 = vpop.f32.mrf.mxu1 }
 0x6b1   : > { %v7474_v47 = vunpack.c.l.bf16 %v7737_v27 }
 0x6b2   : > { %v4164_v11 = vpop.f32.mrf.mxu1 }
 0x6b3   : > { %v4215_v1 = vmax.f32 %v4144_v17, %v4164_v11  ;;  %v7463_v17 = vunpack.c.h.bf16 %v7734_v21  ;;  %v7738_v11 = vld [vmem:[%s11900_s10 + $0x40] sm:$0xff]   ;;  %v7755_v21 = vld [vmem:[%s11900_s10 + $0xc8] sm:$0xff]  }
 0x6b4   : > { %v4166_v24 = vpop.f32.mrf.mxu1 }
 0x6b5   : > { %v7475_v24 = vunpack.c.h.bf16 %v7737_v27  ;;  %v7758_v27 = vld [vmem:[%s11900_s10 + $0xe0] sm:$0xff]  }
 0x6b6   : > { %v4169_v58 = vpop.f32.mrf.mxu1 }
 0x6b7   : > { %v4216_v34 = vmax.f32 %v4149_v13, %v4169_v58  ;;  %v7736_v13 = vld [vmem:[%s11900_s10 + $0x30] sm:$0xff]   ;;  %v7478_v58 = vunpack.c.l.bf16 %v7738_v11 }
 0x6b8   : > { %v4171_v55 = vpop.f32.mrf.mxu1  ;;  %v7470_v53 = vunpack.c.l.bf16 %v7736_v13  ;;  %v7471_v30 = vunpack.c.h.bf16 %v7736_v13  ;;  %v7757_v13 = vld [vmem:[%s11900_s10 + $0xd8] sm:$0xff]  }
 0x6b9   : > { %v7739_v55 = vld [vmem:[%s11900_s10 + $0x48] sm:$0xff]  }
 0x6ba   : > { %v4174_v37 = vpop.f32.mrf.mxu1 }
 0x6bc   : > { %v4176_v15 = vpop.f32.mrf.mxu1 }
 0x6bd   : > { %v7482_v15 = vunpack.c.l.bf16 %v7739_v55 }
 0x6be   : > { %v4179_v46 = vpop.f32.mrf.mxu1 }
 0x6c0   : > { %v4181_v50 = vpop.f32.mrf.mxu1 }
 0x6c1   : > { %v7483_v50 = vunpack.c.h.bf16 %v7739_v55  ;;  %v7760_v55 = vld [vmem:[%s11900_s10 + $0xf0] sm:$0xff]  }
 0x6c2   : > { %v4184_v39 = vpop.f32.mrf.mxu1 }
 0x6c4   : > { %v4186_v56 = vpop.f32.mrf.mxu1 }
 0x6c5   : > { %v7741_v56 = vld [vmem:[%s11900_s10 + $0x58] sm:$0xff]  }
 0x6c6   : > { %v4189_v9 = vpop.f32.mrf.mxu1 }
 0x6c8   : > { %v4191_v51 = vpop.f32.mrf.mxu1 }
 0x6c9   : > { %v7490_v51 = vunpack.c.l.bf16 %v7741_v56 }
 0x6ca   : > { %v4194_v31 = vpop.f32.mrf.mxu1 }
 0x6cb   : > { %v4217_v33 = vmax.f32 %v4174_v37, %v4194_v31  ;;  %v7479_v37 = vunpack.c.h.bf16 %v7738_v11  ;;  %v7742_v31 = vld [vmem:[%s11900_s10 + $0x60] sm:$0xff]   ;;  %v7759_v11 = vld [vmem:[%s11900_s10 + $0xe8] sm:$0xff]  }
 0x6cc   : > { %v4196_v22 = vpop.f32.mrf.mxu1 }
 0x6cd   : > { %v4221_v49 = vmax.f32 %v4213_v60, %v4217_v33  ;;  %v7491_v22 = vunpack.c.h.bf16 %v7741_v56  ;;  %v7746_v33 = vld [vmem:[%s11900_s10 + $0x80] sm:$0xff]  }
 0x6ce   : > { %v4199_v5 = vpop.f32.mrf.mxu1  ;;  %v7511_v2 = vunpack.c.h.bf16 %v7746_v33 }
 0x6cf   : > { %v4218_v7 = vmax.f32 %v4179_v46, %v4199_v5  ;;  %v4232_v35 = vadd.f32 %v7027_v4, %v4221_v49  ;;  %v7740_v46 = vld [vmem:[%s11900_s10 + $0x50] sm:$0xff]   ;;  %v7494_v5 = vunpack.c.l.bf16 %v7742_v31  ;;  %v7749_v49 = vld [vmem:[%s11900_s10 + $0x98] sm:$0xff]  }
 0x6d0   : > { %v4201_v0 = vpop.f32.mrf.mxu1 }
 0x6d1   : > { %v4222_v25 = vmax.f32 %v4214_v20, %v4218_v7  ;;  %v4236_v52 = vmax.f32 %v4232_v35, 0.0  ;;  %v7743_v0 = vld [vmem:[%s11900_s10 + $0x68] sm:$0xff]   ;;  %v7745_v20 = vld [vmem:[%s11900_s10 + $0x78] sm:$0xff]  }
 0x6d2   : > { %v4204_v6 = vpop.f32.mrf.mxu1  ;;  %v7751_v35 = vld [vmem:[%s11900_s10 + $0xa8] sm:$0xff]  }
 0x6d3   : > { %v4219_v43 = vmax.f32 %v4184_v39, %v4204_v6  ;;  %v4233_v38 = vadd.f32 %v7027_v4, %v4222_v25  ;;  %v7486_v39 = vunpack.c.l.bf16 %v7740_v46  ;;  %v7495_v6 = vunpack.c.h.bf16 %v7742_v31  ;;  %v7748_v25 = vld [vmem:[%s11900_s10 + $0x90] sm:$0xff]  }
 0x6d4   : > { %v4206_v18 = vpop.f32.mrf.mxu1  ;;  %v7530_v42 = vunpack.c.l.bf16 %v7751_v35 }
 0x6d5   : > { %v4223_v28 = vmax.f32 %v4215_v1, %v4219_v43  ;;  %v4237_v63 = vmax.f32 %v4233_v38, 0.0  ;;  %v7498_v43 = vunpack.c.l.bf16 %v7743_v0  ;;  %v7744_v18 = vld [vmem:[%s11900_s10 + $0x70] sm:$0xff]   ;;  %v7499_v1 = vunpack.c.h.bf16 %v7743_v0 }
 0x6d6   : > { %v4209_v59 = vpop.f32.mrf.mxu1  ;;  %v7502_v7 = vunpack.c.l.bf16 %v7744_v18  ;;  %v7523_v38 = vunpack.c.h.bf16 %v7749_v49 }
 0x6d7   : > { %v4220_v48 = vmax.f32 %v4189_v9, %v4209_v59  ;;  %v4234_v8 = vadd.f32 %v7027_v4, %v4223_v28  ;;  %v7487_v9 = vunpack.c.h.bf16 %v7740_v46  ;;  %v7503_v59 = vunpack.c.h.bf16 %v7744_v18  ;;  %v7761_v46 = vld [vmem:[%s11900_s10 + $0xf8] sm:$0xff]  }
 0x6d8   : > { %v4211_v14 = vpop.f32.mrf.mxu1  ;;  %v7507_v28 = vunpack.c.h.bf16 %v7745_v20  ;;  %v7571_v56 = vunpack.c.h.bf16 %v7761_v46 }
 0x6d9   : > { %v4224_v44 = vmax.f32 %v4216_v34, %v4220_v48  ;;  %v4238_v16 = vmax.f32 %v4234_v8, 0.0  ;;  %v7506_v34 = vunpack.c.l.bf16 %v7745_v20  ;;  %v7510_v48 = vunpack.c.l.bf16 %v7746_v33  ;;  %v7747_v14 = vld [vmem:[%s11900_s10 + $0x88] sm:$0xff]  }
 0x6da   : > { %v7514_v60 = vunpack.c.l.bf16 %v7747_v14  ;;  %v7522_v8 = vunpack.c.l.bf16 %v7749_v49  ;;  %v5316_v49 = vld [vmem:[%s11901_s11 + $0xf0] sm:$0xff] }
 0x6db   : > { %v4235_v41 = vadd.f32 %v7027_v4, %v4224_v44  ;;  %v7515_v44 = vunpack.c.h.bf16 %v7747_v14  ;;  %v7518_v4 = vunpack.c.l.bf16 %v7748_v25 }
 0x6dd   : > { %v4239_v26 = vmax.f32 %v4235_v41, 0.0  ;;  %v7519_v41 = vunpack.c.h.bf16 %v7748_v25 }
 0x6df   : > { %8497 = vmatprep.subr.msk.mxu1 %vm4248_vm12, %v4239_v26 }
 0x6e0   : > { %8498 = vmatpush3.msk.msra.mxu1 %vm4248_vm12, %v4239_v26  ;;  %v7750_v26 = vld [vmem:[%s11900_s10 + $0xa0] sm:$0xff]  }
 0x6e1   : > { %8499 = vmatprep.subr.mxu1 %v4238_v16 }
 0x6e2   : > { %8500 = vmatpush3.msra.mxu1 %v4238_v16  ;;  %v7526_v16 = vunpack.c.l.bf16 %v7750_v26 }
 0x6e3   : > { %8501 = vmatprep.subr.mxu1 %v4237_v63 }
 0x6e4   : > { %8502 = vmatpush3.msra.mxu1 %v4237_v63  ;;  %v7527_v63 = vunpack.c.h.bf16 %v7750_v26  ;;  %v5315_v26 = vld [vmem:[%s11901_s11 + $0xe8] sm:$0xff] }
 0x6e5   : > { %8503 = vmatprep.subr.mxu1 %v4236_v52 }
 0x6e6   : > { %8504 = vmatpush3.msra.mxu1 %v4236_v52  ;;  %v7752_v52 = vld [vmem:[%s11900_s10 + $0xb0] sm:$0xff]  }
 0x6e7   : > { %8506 = vmatmul.mubr.msk.f32.vlgmr.msra.gmra.mxu1 %vm3900_vm6, %v7447_v54  ;;  %v7531_v54 = vunpack.c.h.bf16 %v7751_v35  ;;  %v5314_v35 = vld [vmem:[%s11901_s11 + $0xe0] sm:$0xff] }
 0x6e8   : > { %8508 = vmatprep.mubr.msk.f32.mxu1 %vm3900_vm6, %v7450_v19  ;;  %v7534_v19 = vunpack.c.l.bf16 %v7752_v52 }
 0x6eb   : > { %8509 = vmatmul.mubr.msk.f32.gmra.mxu1 %vm3900_vm6, %v7451_v3  ;;  %v7535_v3 = vunpack.c.h.bf16 %v7752_v52  ;;  %v5313_v52 = vld [vmem:[%s11901_s11 + $0xd8] sm:$0xff] }
 0x6ec   : > { %8511 = vmatprep.mubr.msk.f32.mxu1 %vm3900_vm6, %v7454_v23  ;;  %v7538_v23 = vunpack.c.l.bf16 %v7753_v57 }
 0x6ef   : > { %8512 = vmatmul.mubr.msk.f32.gmra.mxu1 %vm3900_vm6, %v7455_v61  ;;  %v7539_v61 = vunpack.c.h.bf16 %v7753_v57  ;;  %v5312_v57 = vld [vmem:[%s11901_s11 + $0xd0] sm:$0xff] }
 0x6f0   : > { %8514 = vmatprep.mubr.msk.f32.mxu1 %vm3900_vm6, %v7458_v40  ;;  %v7542_v40 = vunpack.c.l.bf16 %v7754_v32 }
 0x6f3   : > { %8515 = vmatmul.mubr.msk.f32.gmra.mxu1 %vm3900_vm6, %v7459_v10  ;;  %v7543_v10 = vunpack.c.h.bf16 %v7754_v32 }
 0x6f4   : > { %8517 = vmatprep.mubr.msk.f32.mxu1 %vm3900_vm6, %v7462_v62  ;;  %v7546_v62 = vunpack.c.l.bf16 %v7755_v21 }
 0x6f7   : > { %8518 = vmatmul.mubr.msk.f32.gmra.mxu1 %vm3900_vm6, %v7463_v17  ;;  %v7547_v17 = vunpack.c.h.bf16 %v7755_v21 }
 0x6f8   : > { %8520 = vmatprep.mubr.msk.f32.mxu1 %vm3900_vm6, %v7466_v36  ;;  %v7550_v36 = vunpack.c.l.bf16 %v7756_v29 }
 0x6fb   : > { %8521 = vmatmul.mubr.msk.f32.gmra.mxu1 %vm3900_vm6, %v7467_v12  ;;  %v7551_v12 = vunpack.c.h.bf16 %v7756_v29 }
 0x6fc   : > { %8523 = vmatprep.mubr.msk.f32.mxu1 %vm3900_vm6, %v7470_v53  ;;  %v7554_v53 = vunpack.c.l.bf16 %v7757_v13 }
 0x6ff   : > { %8524 = vmatmul.mubr.msk.f32.gmra.mxu1 %vm3900_vm6, %v7471_v30  ;;  %v7555_v30 = vunpack.c.h.bf16 %v7757_v13 }
 0x700   : > { %8526 = vmatprep.mubr.msk.f32.mxu1 %vm3900_vm6, %v7474_v47  ;;  %v7558_v47 = vunpack.c.l.bf16 %v7758_v27 }
 0x703   : > { %8527 = vmatmul.mubr.msk.f32.gmra.mxu1 %vm3900_vm6, %v7475_v24  ;;  %v7559_v24 = vunpack.c.h.bf16 %v7758_v27 }
 0x704   : > { %8529 = vmatprep.mubr.msk.f32.mxu1 %vm3900_vm6, %v7478_v58  ;;  %v7562_v58 = vunpack.c.l.bf16 %v7759_v11 }
 0x707   : > { %8530 = vmatmul.mubr.msk.f32.gmra.mxu1 %vm3900_vm6, %v7479_v37  ;;  %v7563_v37 = vunpack.c.h.bf16 %v7759_v11 }
 0x708   : > { %8532 = vmatprep.mubr.msk.f32.mxu1 %vm3900_vm6, %v7482_v15  ;;  %v7566_v15 = vunpack.c.l.bf16 %v7760_v55 }
 0x70b   : > { %8533 = vmatmul.mubr.msk.f32.gmra.mxu1 %vm3900_vm6, %v7483_v50  ;;  %v7567_v50 = vunpack.c.h.bf16 %v7760_v55 }
 0x70c   : > { %8535 = vmatprep.mubr.msk.f32.mxu1 %vm3900_vm6, %v7486_v39  ;;  %v7570_v39 = vunpack.c.l.bf16 %v7761_v46 }
 0x70f   : > { %8536 = vmatmul.mubr.msk.f32.gmra.mxu1 %vm3900_vm6, %v7487_v9  ;;  %v7762_v9 = vld [vmem:[%s11900_s10 + $0x100] sm:$0xff]  }
 0x710   : > { %8538 = vmatprep.mubr.msk.f32.mxu1 %vm3900_vm6, %v7490_v51  ;;  %v7574_v51 = vunpack.c.l.bf16 %v7762_v9  ;;  %v7575_v31 = vunpack.c.h.bf16 %v7762_v9  ;;  %v5311_v9 = vld [vmem:[%s11901_s11 + $0xc8] sm:$0xff] }
 0x713   : > { %8539 = vmatmul.mubr.msk.f32.gmra.mxu1 %vm3900_vm6, %v7491_v22  ;;  %v7763_v22 = vld [vmem:[%s11900_s10 + $0x108] sm:$0xff]  }
 0x714   : > { %8541 = vmatprep.mubr.msk.f32.mxu1 %vm3900_vm6, %v7494_v5  ;;  %v7578_v5 = vunpack.c.l.bf16 %v7763_v22  ;;  %v7579_v0 = vunpack.c.h.bf16 %v7763_v22  ;;  %v5310_v22 = vld [vmem:[%s11901_s11 + $0xc0] sm:$0xff] }
 0x717   : > { %8542 = vmatmul.mubr.msk.f32.gmra.mxu1 %vm3900_vm6, %v7495_v6  ;;  %v7764_v6 = vld [vmem:[%s11900_s10 + $0x110] sm:$0xff]  }
 0x718   : > { %8544 = vmatprep.mubr.msk.f32.mxu1 %vm3900_vm6, %v7498_v43  ;;  %v7582_v43 = vunpack.c.l.bf16 %v7764_v6  ;;  %v7583_v18 = vunpack.c.h.bf16 %v7764_v6 }
 0x71b   : > { %8545 = vmatmul.mubr.msk.f32.gmra.mxu1 %vm3900_vm6, %v7499_v1  ;;  %v7765_v1 = vld [vmem:[%s11900_s10 + $0x118] sm:$0xff]  }
 0x71c   : > { %8547 = vmatprep.mubr.msk.f32.mxu1 %vm3900_vm6, %v7502_v7  ;;  %v7586_v7 = vunpack.c.l.bf16 %v7765_v1  ;;  %v7587_v20 = vunpack.c.h.bf16 %v7765_v1 }
 0x71f   : > { %8548 = vmatmul.mubr.msk.f32.gmra.mxu1 %vm3900_vm6, %v7503_v59 }
 0x720   : > { %8550 = vmatprep.mubr.msk.f32.mxu1 %vm3900_vm6, %v7506_v34 }
 0x723   : > { %8551 = vmatmul.mubr.msk.f32.gmra.mxu1 %vm3900_vm6, %v7507_v28 }
 0x724   : > { %8553 = vmatprep.mubr.msk.f32.mxu1 %vm3900_vm6, %v7510_v48 }
 0x727   : > { %8554 = vmatmul.mubr.msk.f32.gmra.mxu1 %vm3900_vm6, %v7511_v2 }
 0x728   : > { %8556 = vmatprep.mubr.msk.f32.mxu1 %vm3900_vm6, %v7514_v60 }
 0x72b   : > { %8557 = vmatmul.mubr.msk.f32.gmra.mxu1 %vm3900_vm6, %v7515_v44  ;;  %v5317_v44 = vld [vmem:[%s11901_s11 + $0xf8] sm:$0xff] }
 0x72c   : > { %8559 = vmatprep.mubr.msk.f32.mxu1 %vm3900_vm6, %v7518_v4  ;;  %v5301_v4 = vld [vmem:[%s11901_s11 + $0x78] sm:$0xff]  ;;  %8029 = vmatprep.subr.mxu1 %v5317_v44 }
 0x72d   : > { %8030 = vmatpush3.msra.mxu1 %v5301_v4 }
 0x72e   : > { %8031 = vmatprep.subr.mxu1 %v5316_v49  ;;  %v5309_v49 = vld [vmem:[%s11901_s11 + $0xb8] sm:$0xff] }
 0x72f   : > { %8560 = vmatmul.mubr.msk.f32.gmra.mxu1 %vm3900_vm6, %v7519_v41 }
 0x730   : > { %8562 = vmatprep.mubr.msk.f32.mxu1 %vm3900_vm6, %v7522_v8  ;;  %v5300_v8 = vld [vmem:[%s11901_s11 + $0x70] sm:$0xff] }
 0x731   : > { %8032 = vmatpush3.msra.mxu1 %v5300_v8  ;;  %v5293_v8 = vld [vmem:[%s11901_s11 + $0x38] sm:$0xff] }
 0x732   : > { %8033 = vmatprep.subr.mxu1 %v5315_v26  ;;  %v5308_v26 = vld [vmem:[%s11901_s11 + $0xb0] sm:$0xff] }
 0x733   : > { %8563 = vmatmul.mubr.msk.f32.gmra.mxu1 %vm3900_vm6, %v7523_v38 }
 0x734   : > { %8565 = vmatprep.mubr.msk.f32.mxu1 %vm3900_vm6, %v7526_v16  ;;  %v5299_v16 = vld [vmem:[%s11901_s11 + $0x68] sm:$0xff] }
 0x735   : > { %8034 = vmatpush3.msra.mxu1 %v5299_v16  ;;  %v5307_v16 = vld [vmem:[%s11901_s11 + $0xa8] sm:$0xff] }
 0x736   : > { %8035 = vmatprep.subr.mxu1 %v5314_v35 }
 0x737   : > { %8566 = vmatmul.mubr.msk.f32.gmra.mxu1 %vm3900_vm6, %v7527_v63 }
 0x738   : > { %8568 = vmatprep.mubr.msk.f32.mxu1 %vm3900_vm6, %v7530_v42  ;;  %v5298_v42 = vld [vmem:[%s11901_s11 + $0x60] sm:$0xff] }
 0x739   : > { %8036 = vmatpush3.msra.mxu1 %v5298_v42  ;;  %v5306_v42 = vld [vmem:[%s11901_s11 + $0xa0] sm:$0xff] }
 0x73a   : > { %8037 = vmatprep.subr.mxu1 %v5313_v52 }
 0x73b   : > { %8569 = vmatmul.mubr.msk.f32.gmra.mxu1 %vm3900_vm6, %v7531_v54 }
 0x73c   : > { %8571 = vmatprep.mubr.msk.f32.mxu1 %vm3900_vm6, %v7534_v19  ;;  %v5297_v19 = vld [vmem:[%s11901_s11 + $0x58] sm:$0xff] }
 0x73d   : > { %8038 = vmatpush3.msra.mxu1 %v5297_v19  ;;  %v5290_v19 = vld [vmem:[%s11901_s11 + $0x20] sm:$0xff] }
 0x73e   : > { %8039 = vmatprep.subr.mxu1 %v5312_v57 }
 0x73f   : > { %8572 = vmatmul.mubr.msk.f32.gmra.mxu1 %vm3900_vm6, %v7535_v3 }
 0x740   : > { %8574 = vmatprep.mubr.msk.f32.mxu1 %vm3900_vm6, %v7538_v23  ;;  %v5296_v23 = vld [vmem:[%s11901_s11 + $0x50] sm:$0xff] }
 0x741   : > { %8040 = vmatpush3.msra.mxu1 %v5296_v23  ;;  %v5305_v23 = vld [vmem:[%s11901_s11 + $0x98] sm:$0xff] }
 0x742   : > { %8041 = vmatprep.subr.mxu1 %v5311_v9 }
 0x743   : > { %8575 = vmatmul.mubr.msk.f32.gmra.mxu1 %vm3900_vm6, %v7539_v61 }
 0x744   : > { %8577 = vmatprep.mubr.msk.f32.mxu1 %vm3900_vm6, %v7542_v40 }
 0x747   : > { %8578 = vmatmul.mubr.msk.f32.gmra.mxu1 %vm3900_vm6, %v7543_v10 }
 0x748   : > { %8580 = vmatprep.mubr.msk.f32.mxu1 %vm3900_vm6, %v7546_v62 }
 0x74b   : > { %8581 = vmatmul.mubr.msk.f32.gmra.mxu1 %vm3900_vm6, %v7547_v17 }
 0x74c   : > { %8583 = vmatprep.mubr.msk.f32.mxu1 %vm3900_vm6, %v7550_v36 }
 0x74f   : > { %8584 = vmatmul.mubr.msk.f32.gmra.mxu1 %vm3900_vm6, %v7551_v12 }
 0x750   : > { %8586 = vmatprep.mubr.msk.f32.mxu1 %vm3900_vm6, %v7554_v53 }
 0x753   : > { %8587 = vmatmul.mubr.msk.f32.gmra.mxu1 %vm3900_vm6, %v7555_v30 }
 0x754   : > { %8589 = vmatprep.mubr.msk.f32.mxu1 %vm3900_vm6, %v7558_v47 }
 0x757   : > { %8590 = vmatmul.mubr.msk.f32.gmra.mxu1 %vm3900_vm6, %v7559_v24 }
 0x758   : > { %8592 = vmatprep.mubr.msk.f32.mxu1 %vm3900_vm6, %v7562_v58 }
 0x75b   : > { %8593 = vmatmul.mubr.msk.f32.gmra.mxu1 %vm3900_vm6, %v7563_v37 }
 0x75c   : > { %8595 = vmatprep.mubr.msk.f32.mxu1 %vm3900_vm6, %v7566_v15 }
 0x75f   : > { %8596 = vmatmul.mubr.msk.f32.gmra.mxu1 %vm3900_vm6, %v7567_v50 }
 0x760   : > { %8598 = vmatprep.mubr.msk.f32.mxu1 %vm3900_vm6, %v7570_v39 }
 0x763   : > { %8599 = vmatmul.mubr.msk.f32.gmra.mxu1 %vm3900_vm6, %v7571_v56 }
 0x764   : > { %8601 = vmatprep.mubr.msk.f32.mxu1 %vm3900_vm6, %v7574_v51 }
 0x767   : > { %8602 = vmatmul.mubr.msk.f32.gmra.mxu1 %vm3900_vm6, %v7575_v31  ;;  %v5295_v31 = vld [vmem:[%s11901_s11 + $0x48] sm:$0xff] }
 0x768   : > { %8604 = vmatprep.mubr.msk.f32.mxu1 %vm3900_vm6, %v7578_v5  ;;  %v5294_v5 = vld [vmem:[%s11901_s11 + $0x40] sm:$0xff]  ;;  %8042 = vmatpush3.msra.mxu1 %v5295_v31  ;;  %v5289_v31 = vld [vmem:[%s11901_s11 + $0x18] sm:$0xff] }
 0x769   : > { %8043 = vmatprep.subr.mxu1 %v5310_v22 }
 0x76a   : > { %8044 = vmatpush3.msra.mxu1 %v5294_v5 }
 0x76b   : > { %8605 = vmatmul.mubr.msk.f32.gmra.mxu1 %vm3900_vm6, %v7579_v0  ;;  %8045 = vmatprep.subr.mxu1 %v5309_v49 }
 0x76c   : > { %8607 = vmatprep.mubr.msk.f32.mxu1 %vm3900_vm6, %v7582_v43  ;;  %8046 = vmatpush3.msra.mxu1 %v5293_v8 }
 0x76d   : > { %8047 = vmatprep.subr.mxu1 %v5308_v26 }
 0x76f   : > { %8608 = vmatmul.mubr.msk.f32.gmra.mxu1 %vm3900_vm6, %v7583_v18 }
 0x770   : > { %8610 = vmatprep.mubr.msk.f32.mxu1 %vm3900_vm6, %v7586_v7 }
 0x773   : > { %8611 = vmatmul.mubr.msk.f32.gmra.mxu1 %vm3900_vm6, %v7587_v20 }
 0x7a7   : > { %v10948_v59 = vpop.f32.mrf.mxu1 }
 0x7a9   : > { %v10950_v34 = vpop.f32.mrf.mxu1 }
 0x7ab   : > { %v10952_v33 = vpop.f32.mrf.mxu1 }
 0x7ad   : > { %v10954_v28 = vpop.f32.mrf.mxu1 }
 0x7af   : > { %v10956_v48 = vpop.f32.mrf.mxu1 }
 0x7b1   : > { %v10958_v14 = vpop.f32.mrf.mxu1 }
 0x7b3   : > { %v10960_v2 = vpop.f32.mrf.mxu1 }
 0x7b5   : > { %v10962_v60 = vpop.f32.mrf.mxu1 }
 0x7b7   : > { %v10964_v25 = vpop.f32.mrf.mxu1 }
 0x7b9   : > { %v10975_v41 = vpop.f32.mrf.mxu1 }
 0x7bb   : > { %v10983_v38 = vpop.f32.mrf.mxu1 }
 0x7bd   : > { %v4737_v63 = vpop.f32.mrf.mxu1 }
 0x7bf   : > { %v10997_v54 = vpop.f32.mrf.mxu1 }
 0x7c1   : > { %v11005_v3 = vpop.f32.mrf.mxu1 }
 0x7c3   : > { %v11010_v32 = vpop.f32.mrf.mxu1 }
 0x7c5   : > { %v11012_v61 = vpop.f32.mrf.mxu1 }
 0x7c7   : > { %v11014_v40 = vpop.f32.mrf.mxu1 }
 0x7c9   : > { %v11016_v21 = vpop.f32.mrf.mxu1 }
 0x7cb   : > { %v11018_v10 = vpop.f32.mrf.mxu1 }
 0x7cd   : > { %v11020_v62 = vpop.f32.mrf.mxu1 }
 0x7cf   : > { %v11022_v29 = vpop.f32.mrf.mxu1 }
 0x7d1   : > { %v11024_v17 = vpop.f32.mrf.mxu1 }
 0x7d3   : > { %v11026_v36 = vpop.f32.mrf.mxu1 }
 0x7d5   : > { %v11028_v13 = vpop.f32.mrf.mxu1 }
 0x7d7   : > { %v11030_v12 = vpop.f32.mrf.mxu1 }
 0x7d9   : > { %v11032_v53 = vpop.f32.mrf.mxu1 }
 0x7db   : > { %v11034_v27 = vpop.f32.mrf.mxu1 }
 0x7dd   : > { %v11036_v30 = vpop.f32.mrf.mxu1 }
 0x7df   : > { %v11038_v47 = vpop.f32.mrf.mxu1 }
 0x7e1   : > { %v11040_v11 = vpop.f32.mrf.mxu1 }
 0x7e3   : > { %v11042_v24 = vpop.f32.mrf.mxu1 }
 0x7e5   : > { %v11044_v58 = vpop.f32.mrf.mxu1 }
 0x7e7   : > { %v11046_v55 = vpop.f32.mrf.mxu1 }
 0x7e9   : > { %v11048_v37 = vpop.f32.mrf.mxu1 }
 0x7eb   : > { %v11050_v15 = vpop.f32.mrf.mxu1 }
 0x7ed   : > { %v11052_v46 = vpop.f32.mrf.mxu1 }
 0x7ef   : > { %v11054_v50 = vpop.f32.mrf.mxu1 }
 0x7f1   : > { %v11056_v39 = vpop.f32.mrf.mxu1 }
 0x7f3   : > { %v11058_v56 = vpop.f32.mrf.mxu1 }
 0x7f5   : > { %v11063_v51 = vpop.f32.mrf.mxu1 }
 0x7f7   : > { %v8567_v0 = vpop.f32.mrf.mxu1 }
 0x7f8   : > { %v9002_v6 = vpack.i.bf16 %v10964_v25, %v8567_v0  ;;  %v5304_v0 = vld [vmem:[%s11901_s11 + $0x90] sm:$0xff] }
 0x7f9   : > { %v4887_v43 = vpop.f32.mrf.mxu1 }
 0x7fa   : > { %v9007_v18 = vpack.i.bf16 %v10975_v41, %v4887_v43  ;;  %9003 = vrot.lane.b32.xlu0 %v9002_v6, %s11970_s28 }
 0x7fb   : > { %v8570_v1 = vpop.f32.mrf.mxu1 }
 0x7fc   : > { %v9012_v7 = vpack.i.bf16 %v10983_v38, %v8570_v1  ;;  %9008 = vrot.lane.b32.xlu1 %v9007_v18, %s11970_s28  ;;  %v5292_v38 = vld [vmem:[%s11901_s11 + $0x30] sm:$0xff]  ;;  %v5287_v1 = vld [vmem:[%s11901_s11 + $0x8] sm:$0xff] }
 0x7fd   : > { %v4897_v20 = vpop.f32.mrf.mxu1  ;;  %8048 = vmatpush3.msra.mxu1 %v5292_v38 }
 0x7fe   : > { %v9017_v44 = vpack.i.bf16 %v4737_v63, %v4897_v20  ;;  %9013 = vrot.lane.b32.xlu0 %v9012_v7, %s11970_s28  ;;  %v5291_v63 = vld [vmem:[%s11901_s11 + $0x28] sm:$0xff]  ;;  %8049 = vmatprep.subr.mxu1 %v5307_v16  ;;  %v5286_v20 = vld [vmem:[%s11901_s11] sm:$0xff] }
 0x7ff   : > { %v11080_v4 = vpop.f32.mrf.mxu1  ;;  %8050 = vmatpush3.msra.mxu1 %v5291_v63 }
 0x800   : > { %9018 = vrot.lane.b32.xlu1 %v9017_v44, %s11970_s28  ;;  %8051 = vmatprep.subr.mxu1 %v5306_v42 }
 0x801   : > { %v11083_v25 = vpop.f32.mrf.mxu1  ;;  %8052 = vmatpush3.msra.mxu1 %v5290_v19 }
 0x802   : > { %8053 = vmatprep.subr.mxu1 %v5305_v23 }
 0x803   : > { %v11088_v41 = vpop.f32.mrf.mxu1  ;;  %8054 = vmatpush3.msra.mxu1 %v5289_v31 }
 0x804   : > { %8055 = vmatprep.subr.mxu1 %v5304_v0 }
 0x805   : > { %v11102_v35 = vpop.f32.mrf.mxu1 }
 0x807   : > { %v8579_v52 = vpop.f32.mrf.mxu1 }
 0x808   : > { %v9022_v57 = vpack.i.bf16 %v11014_v40, %v8579_v52  ;;  %v9052_v52 = vpack.i.bf16 %v11005_v3, %v11083_v25 }
 0x809   : > { %v4927_v9 = vpop.f32.mrf.mxu1 }
 0x80a   : > { %v9027_v22 = vpack.i.bf16 %v11016_v21, %v4927_v9  ;;  %9023 = vrot.lane.b32.xlu1 %v9022_v57, %s11952_s1  ;;  %v5288_v21 = vld [vmem:[%s11901_s11 + $0x10] sm:$0xff]  ;;  %v9062_v57 = vpack.i.bf16 %v10997_v54, %v11080_v4 }
 0x80b   : > { %v8582_v5 = vpop.f32.mrf.mxu1  ;;  %8056 = vmatpush3.msra.mxu1 %v5288_v21 }
 0x80c   : > { %v9032_v40 = vpack.i.bf16 %v11018_v10, %v8582_v5  ;;  %9028 = vrot.lane.b32.xlu0 %v9027_v22, %s11952_s1  ;;  %v5303_v10 = vld [vmem:[%s11901_s11 + $0x88] sm:$0xff] }
 0x80d   : > { %v4937_v6 = vpop.f32.mrf.mxu1  ;;  %8057 = vmatprep.subr.mxu1 %v5303_v10 }
 0x80e   : > { %v9037_v43 = vpack.i.bf16 %v11020_v62, %v4937_v6  ;;  %9033 = vrot.lane.b32.xlu1 %v9032_v40, %s11952_s1  ;;  %8058 = vmatpush3.msra.mxu1 %v5287_v1  ;;  %v5302_v62 = vld [vmem:[%s11901_s11 + $0x80] sm:$0xff] }
 0x80f   : > { %v8585_v18 = vpop.f32.mrf.mxu1  ;;  %8059 = vmatprep.subr.mxu1 %v5302_v62 }
 0x810   : > { %9038 = vrot.lane.b32.xlu0 %v9037_v43, %s11952_s1  ;;  %8060 = vmatpush3.msra.mxu1 %v5286_v20  ;;  %v9077_v23 = vpack.i.bf16 %v11022_v29, %v8585_v18  ;;  %v9092_v29 = vpack.i.bf16 %v11012_v61, %v11102_v35 }
 0x811   : > { %v4947_v7 = vpop.f32.mrf.mxu1 }
 0x812   : > { %v9057_v42 = vpack.i.bf16 %v11024_v17, %v4947_v7 }
 0x813   : > { %v8588_v44 = vpop.f32.mrf.mxu1 }
 0x814   : > { %v9112_v31 = vpack.i.bf16 %v11026_v36, %v8588_v44 }
 0x815   : > { %v4957_v49 = vpop.f32.mrf.mxu1 }
 0x816   : > { %v9097_v4 = vpack.i.bf16 %v11028_v13, %v4957_v49 }
 0x817   : > { %v8591_v8 = vpop.f32.mrf.mxu1 }
 0x818   : > { %v9042_v26 = vpack.i.bf16 %v11030_v12, %v8591_v8 }
 0x819   : > { %v4967_v38 = vpop.f32.mrf.mxu1 }
 0x81a   : > { %v9047_v16 = vpack.i.bf16 %v11032_v53, %v4967_v38  ;;  %9043 = vrot.lane.b32.xlu0 %v9042_v26, %s11971_s0 }
 0x81b   : > { %v8594_v63 = vpop.f32.mrf.mxu1 }
 0x81c   : > { %9048 = vrot.lane.b32.xlu1 %v9047_v16, %s11971_s0  ;;  %v9067_v17 = vpack.i.bf16 %v11034_v27, %v8594_v63  ;;  %v5321_v27 = vld [vmem:[%s11901_s11 + $0x118] sm:$0xff] }
 0x81d   : > { %v4977_v19 = vpop.f32.mrf.mxu1  ;;  %8613 = vmatprep.subr.mxu1 %v5321_v27 }
 0x81e   : > { %9058 = vrot.lane.b32.xlu0 %v9057_v42, %s11952_s1  ;;  %v9072_v12 = vpack.i.bf16 %v11036_v30, %v4977_v19 }
 0x81f   : > { %v8597_v53 = vpop.f32.mrf.mxu1 }
 0x820   : > { %9053 = vrot.lane.b32.xlu1 %v9052_v52, %s11970_s28  ;;  %v9082_v25 = vpack.i.bf16 %v11038_v47, %v8597_v53 }
 0x821   : > { %v4987_v3 = vpop.f32.mrf.mxu1 }
 0x822   : > { %9063 = vrot.lane.b32.xlu0 %v9062_v57, %s11970_s28  ;;  %v9087_v54 = vpack.i.bf16 %v11040_v11, %v4987_v3  ;;  %v9102_v11 = vpack.i.bf16 %v11010_v32, %v11088_v41 }
 0x823   : > { %v8600_v30 = vpop.f32.mrf.mxu1 }
 0x824   : > { %9073 = vrot.lane.b32.xlu1 %v9072_v12, %s11971_s0  ;;  %v9117_v13 = vpack.i.bf16 %v11042_v24, %v8600_v30  ;;  %v5320_v12 = vld [vmem:[%s11901_s11 + $0x110] sm:$0xff]  ;;  %v5319_v30 = vld [vmem:[%s11901_s11 + $0x108] sm:$0xff] }
 0x825   : > { %v4997_v47 = vpop.f32.mrf.mxu1 }
 0x826   : > { %9068 = vrot.lane.b32.xlu0 %v9067_v17, %s11971_s0  ;;  %v9107_v9 = vpack.i.bf16 %v11044_v58, %v4997_v47 }
 0x828   : > { %9078 = vrot.lane.b32.xlu1 %v9077_v23, %s11952_s1 }
 0x82a   : > { %9083 = vrot.lane.b32.xlu0 %v9082_v25, %s11971_s0 }
 0x82c   : > { %9088 = vrot.lane.b32.xlu1 %v9087_v54, %s11971_s0 }
 0x82e   : > { %9098 = vrot.lane.b32.xlu0 %v9097_v4, %s11952_s1 }
 0x830   : > { %9093 = vrot.lane.b32.xlu1 %v9092_v29, %s11970_s28 }
 0x832   : > { %9103 = vrot.lane.b32.xlu0 %v9102_v11, %s11970_s28 }
 0x834   : > { %9108 = vrot.lane.b32.xlu1 %v9107_v9, %s11971_s0 }
 0x836   : > { %9118 = vrot.lane.b32.xlu0 %v9117_v13, %s11971_s0 }
 0x838   : > { %9113 = vrot.lane.b32.xlu1 %v9112_v31, %s11952_s1 }
 0x86c   : > { %v9004_v61 = vpop.permute.xlu0 %9003 }
 0x86d   : > { %v9005_v36 = vunpack.i.l.bf16 %v9004_v61  ;;  %v9006_v49 = vunpack.i.h.bf16 %v9004_v61 }
 0x86e   : > { %v9009_v35 = vpop.permute.xlu1 %9008 }
 0x86f   : > { %v9011_v40 = vunpack.i.h.bf16 %v9009_v35  ;;  %v9010_v24 = vunpack.i.l.bf16 %v9009_v35  ;;  %v5263_v42 = vsel %vm3900_vm6, %v11046_v55, %v9005_v36  ;;  %v5239_v3 = vsel %vm3900_vm6, %v10948_v59, %v9006_v49 }
 0x870   : > { %v11184_v22 = vpop.permute.xlu0 %9013 }
 0x871   : > { %v5238_v10 = vsel %vm3900_vm6, %v10950_v34, %v9011_v40  ;;  %v5262_v44 = vsel %vm3900_vm6, %v11048_v37, %v9010_v24  ;;  %v9015_v52 = vunpack.i.l.bf16 %v11184_v22  ;;  %v9016_v29 = vunpack.i.h.bf16 %v11184_v22 }
 0x872   : > { %v9019_v32 = vpop.permute.xlu1 %9018 }
 0x873   : > { %v9021_v53 = vunpack.i.h.bf16 %v9019_v32  ;;  %v9020_v17 = vunpack.i.l.bf16 %v9019_v32  ;;  %v5265_v9 = vsel %vm3900_vm6, %v11050_v15, %v9015_v52  ;;  %v5241_v36 = vsel %vm3900_vm6, %v10952_v33, %v9016_v29 }
 0x875   : > { %v5240_v13 = vsel %vm3900_vm6, %v10954_v28, %v9021_v53  ;;  %v5264_v35 = vsel %vm3900_vm6, %v11052_v46, %v9020_v17 }
 0x87c   : > { %v9024_v5 = vpop.permute.xlu1 %9023 }
 0x87d   : > { %v9025_v18 = vunpack.i.l.bf16 %v9024_v5  ;;  %v9026_v16 = vunpack.i.h.bf16 %v9024_v5 }
 0x87e   : > { %v9029_v41 = vpop.permute.xlu0 %9028 }
 0x87f   : > { %v9031_v6 = vunpack.i.h.bf16 %v9029_v41  ;;  %v9030_v21 = vunpack.i.l.bf16 %v9029_v41  ;;  %v5271_v37 = vsel %vm3934_vm8, %v5263_v42, %v9025_v18  ;;  %v5247_v4 = vsel %vm3934_vm8, %v5239_v3, %v9026_v16  ;;  %v8603_v16 = vpop.f32.mrf.mxu1 }
 0x880   : > { %v11186_v0 = vpop.permute.xlu1 %9033 }
 0x881   : > { %v5246_v8 = vsel %vm3934_vm8, %v5238_v10, %v9031_v6  ;;  %v5270_v38 = vsel %vm3934_vm8, %v5262_v44, %v9030_v21  ;;  %v9035_v47 = vunpack.i.l.bf16 %v11186_v0  ;;  %v9036_v22 = vunpack.i.h.bf16 %v11186_v0  ;;  %v5007_v17 = vpop.f32.mrf.mxu1 }
 0x882   : > { %v9039_v58 = vpop.permute.xlu0 %9038 }
 0x883   : > { %v9041_v55 = vunpack.i.h.bf16 %v9039_v58  ;;  %v9040_v25 = vunpack.i.l.bf16 %v9039_v58  ;;  %v5273_v0 = vsel %vm3934_vm8, %v5265_v9, %v9035_v47 }
 0x885   : > { %v5272_v15 = vsel %vm3934_vm8, %v5264_v35, %v9040_v25  ;;  %v5248_v5 = vsel %vm3934_vm8, %v5240_v13, %v9041_v55 }
 0x88c   : > { %v9044_v43 = vpop.permute.xlu0 %9043 }
 0x88d   : > { %v9045_v62 = vunpack.i.l.bf16 %v9044_v43  ;;  %v9046_v19 = vunpack.i.h.bf16 %v9044_v43 }
 0x88e   : > { %v9049_v1 = vpop.permute.xlu1 %9048 }
 0x88f   : > { %v9051_v7 = vunpack.i.h.bf16 %v9049_v1  ;;  %v9050_v20 = vunpack.i.l.bf16 %v9049_v1  ;;  %v5279_v23 = vsel %vm3968_vm10, %v5271_v37, %v9045_v62  ;;  %v5255_v59 = vsel %vm3968_vm10, %v5247_v4, %v9046_v19 }
 0x890   : > { %v11193_v26 = vpop.permute.xlu0 %9058 }
 0x891   : > { %v5254_v63 = vsel %vm3968_vm10, %v5246_v8, %v9051_v7  ;;  %v5278_v34 = vsel %vm3968_vm10, %v5270_v38, %v9050_v20  ;;  %v9061_v1 = vunpack.i.h.bf16 %v11193_v26  ;;  %v5249_v7 = vsel %vm3934_vm8, %v5241_v36, %v9036_v22 }
 0x892   : > { %v9054_v57 = vpop.permute.xlu1 %9053  ;;  %5410 = vmatprep.mubr.f32.mxu1 %v5278_v34  ;;  %v9060_v44 = vunpack.i.l.bf16 %v11193_v26 }
 0x893   : > { %5411 = vmatmul.mubr.f32.vlgmr.msra.gmra.mxu1 %v5254_v63  ;;  %v9056_v32 = vunpack.i.h.bf16 %v9054_v57  ;;  %v9055_v58 = vunpack.i.l.bf16 %v9054_v57 }
 0x894   : > { %v11208_v54 = vpop.permute.xlu0 %9063  ;;  %5415 = vmatprep.mubr.f32.mxu1 %v5279_v23  ;;  %8614 = vmatpush3.msra.mxu1 %v5321_v27  ;;  %v5318_v27 = vld [vmem:[%s11901_s11 + $0x100] sm:$0xff] }
 0x895   : > { %8615 = vmatprep.subr.mxu1 %v5320_v12  ;;  %v9065_v6 = vunpack.i.l.bf16 %v11208_v54  ;;  %v5242_v62 = vsel %vm3900_vm6, %v10958_v14, %v9056_v32  ;;  %v5266_v20 = vsel %vm3900_vm6, %v11056_v39, %v9055_v58  ;;  %v9066_v49 = vunpack.i.h.bf16 %v11208_v54 }
 0x896   : > { %v9074_v11 = vpop.permute.xlu1 %9073  ;;  %8616 = vmatpush3.msra.mxu1 %v5320_v12  ;;  %v5274_v19 = vsel %vm3934_vm8, %v5266_v20, %v9060_v44  ;;  %v5250_v39 = vsel %vm3934_vm8, %v5242_v62, %v9061_v1  ;;  %v6117_v1 = vld [vmem:[%s11904_s14 + $0xf8] sm:$0xff]  ;;  %v6100_v20 = vld [vmem:[%s11904_s14 + $0x70] sm:$0xff]  ;;  %v6115_v44 = vld [vmem:[%s11904_s14 + $0xe8] sm:$0xff] }
 0x897   : > { %v9076_v31 = vunpack.i.h.bf16 %v9074_v11  ;;  %v9075_v61 = vunpack.i.l.bf16 %v9074_v11  ;;  %5416 = vmatmul.mubr.f32.gmra.mxu1 %v5255_v59  ;;  %8617 = vmatprep.subr.mxu1 %v5319_v30  ;;  %v5267_v38 = vsel %vm3900_vm6, %v11054_v50, %v9065_v6  ;;  %v5243_v50 = vsel %vm3900_vm6, %v10956_v48, %v9066_v49  ;;  %v8606_v59 = vpop.f32.mrf.mxu1  ;;  %v6101_v62 = vld [vmem:[%s11904_s14 + $0x78] sm:$0xff]  ;;  %v6099_v49 = vld [vmem:[%s11904_s14 + $0x68] sm:$0xff] }
 0x898   : > { %v9069_v41 = vpop.permute.xlu0 %9068  ;;  %8618 = vmatpush3.msra.mxu1 %v5319_v30  ;;  %8135 = vmatprep.subr.mxu0 %v6117_v1 }
 0x899   : > { %v9070_v40 = vunpack.i.l.bf16 %v9069_v41  ;;  %v5280_v28 = vsel %vm3968_vm10, %v5272_v15, %v9075_v61  ;;  %v5256_v24 = vsel %vm3968_vm10, %v5248_v5, %v9076_v31  ;;  %8619 = vmatprep.subr.mxu1 %v5318_v27  ;;  %v9071_v46 = vunpack.i.h.bf16 %v9069_v41  ;;  %v5017_v41 = vpop.f32.mrf.mxu1  ;;  %8136 = vmatpush3.msra.mxu0 %v6101_v62 }
 0x89a   : > { %v9079_v21 = vpop.permute.xlu1 %9078  ;;  %5420 = vmatprep.mubr.f32.mxu1 %v5280_v28  ;;  %8620 = vmatpush3.msra.mxu1 %v5318_v27 }
 0x89b   : > { %5421 = vmatmul.mubr.f32.gmra.mxu1 %v5256_v24  ;;  %v5281_v43 = vsel %vm3968_vm10, %v5273_v0, %v9070_v40  ;;  %v9080_v10 = vunpack.i.l.bf16 %v9079_v21  ;;  %v5257_v33 = vsel %vm3968_vm10, %v5249_v7, %v9071_v46  ;;  %v9081_v63 = vunpack.i.h.bf16 %v9079_v21  ;;  %v6116_v7 = vld [vmem:[%s11904_s14 + $0xf0] sm:$0xff] }
 0x89c   : > { %5425 = vmatprep.mubr.f32.mxu1 %v5281_v43  ;;  %v9084_v18 = vpop.permute.xlu0 %9083  ;;  %v8609_v43 = vpop.f32.mrf.mxu1  ;;  %8137 = vmatprep.subr.mxu0 %v6116_v7 }
 0x89d   : > { %v9085_v34 = vunpack.i.l.bf16 %v9084_v18  ;;  %v5275_v26 = vsel %vm3934_vm8, %v5267_v38, %v9080_v10  ;;  %v9086_v12 = vunpack.i.h.bf16 %v9084_v18  ;;  %v5251_v25 = vsel %vm3934_vm8, %v5243_v50, %v9081_v63  ;;  %v11284_v10 = vld [vmem:[%s11903_s13] sm:$0xff]   ;;  %8138 = vmatpush3.msra.mxu0 %v6100_v20  ;;  %v6113_v38 = vld [vmem:[%s11904_s14 + $0xd8] sm:$0xff]  ;;  %v7767_v20 = vld [vmem:[%s11903_s13 + $0x10] sm:$0xff]  }
 0x89e   : > { %v9089_v8 = vpop.permute.xlu1 %9088  ;;  %v5027_v36 = vpop.f32.mrf.mxu1  ;;  %v7590_v18 = vunpack.c.l.bf16 %v11284_v10  ;;  %8139 = vmatprep.subr.mxu0 %v6115_v44  ;;  %v7591_v62 = vunpack.c.h.bf16 %v11284_v10  ;;  %v7599_v10 = vunpack.c.h.bf16 %v7767_v20 }
 0x89f   : > { %v9091_v42 = vunpack.i.h.bf16 %v9089_v8  ;;  %v9090_v14 = vunpack.i.l.bf16 %v9089_v8  ;;  %5426 = vmatmul.mubr.f32.gmra.mxu1 %v5257_v33  ;;  %v5283_v55 = vsel %vm3968_vm10, %v5275_v26, %v9085_v34  ;;  %v5259_v11 = vsel %vm3968_vm10, %v5251_v25, %v9086_v12  ;;  %v6114_v8 = vld [vmem:[%s11904_s14 + $0xe0] sm:$0xff]  ;;  %8140 = vmatpush3.msra.mxu0 %v6099_v49 }
 0x8a0   : > { %v9099_v52 = vpop.permute.xlu0 %9098  ;;  %v6098_v33 = vld [vmem:[%s11904_s14 + $0x60] sm:$0xff]  ;;  %8141 = vmatprep.subr.mxu0 %v6114_v8  ;;  %v7598_v49 = vunpack.c.l.bf16 %v7767_v20  ;;  %v7768_v8 = vld [vmem:[%s11903_s13 + $0x18] sm:$0xff]  }
 0x8a1   : > { %v5282_v57 = vsel %vm3968_vm10, %v5274_v19, %v9090_v14  ;;  %v5258_v37 = vsel %vm3968_vm10, %v5250_v39, %v9091_v42  ;;  %v9101_v48 = vunpack.i.h.bf16 %v9099_v52  ;;  %v9100_v29 = vunpack.i.l.bf16 %v9099_v52  ;;  %8142 = vmatpush3.msra.mxu0 %v6098_v33  ;;  %v6090_v20 = vld [vmem:[%s11904_s14 + $0x20] sm:$0xff] }
 0x8a2   : > { %v9094_v53 = vpop.permute.xlu1 %9093  ;;  %5430 = vmatprep.mubr.f32.mxu1 %v5282_v57  ;;  %8143 = vmatprep.subr.mxu0 %v6113_v38  ;;  %v7602_v33 = vunpack.c.l.bf16 %v7768_v8  ;;  %v7769_v38 = vld [vmem:[%s11903_s13 + $0x20] sm:$0xff]  }
 0x8a3   : > { %v9096_v23 = vunpack.i.h.bf16 %v9094_v53  ;;  %v9095_v3 = vunpack.i.l.bf16 %v9094_v53  ;;  %5431 = vmatmul.mubr.f32.gmra.mxu1 %v5258_v37 }
 0x8a4   : > { %v9104_v54 = vpop.permute.xlu0 %9103  ;;  %5435 = vmatprep.mubr.f32.mxu1 %v5283_v55 }
 0x8a5   : > { %v5244_v30 = vsel %vm3900_vm6, %v10962_v60, %v9096_v23  ;;  %v5268_v4 = vsel %vm3900_vm6, %v11063_v51, %v9095_v3  ;;  %v9106_v13 = vunpack.i.h.bf16 %v9104_v54  ;;  %v9105_v31 = vunpack.i.l.bf16 %v9104_v54 }
 0x8a6   : > { %v9109_v47 = vpop.permute.xlu1 %9108  ;;  %v5276_v61 = vsel %vm3934_vm8, %v5268_v4, %v9100_v29  ;;  %v5252_v35 = vsel %vm3934_vm8, %v5244_v30, %v9101_v48 }
 0x8a7   : > { %v9111_v9 = vunpack.i.h.bf16 %v9109_v47  ;;  %v9110_v27 = vunpack.i.l.bf16 %v9109_v47  ;;  %5436 = vmatmul.mubr.f32.gmra.mxu1 %v5259_v11  ;;  %v5245_v58 = vsel %vm3900_vm6, %v10960_v2, %v9106_v13  ;;  %v5269_v24 = vsel %vm3900_vm6, %v11058_v56, %v9105_v31  ;;  %v8612_v2 = vpop.f32.mrf.mxu1 }
 0x8a8   : > { %v9119_v22 = vpop.permute.xlu0 %9118 }
 0x8a9   : > { %v5284_v60 = vsel %vm3968_vm10, %v5276_v61, %v9110_v27  ;;  %v5260_v51 = vsel %vm3968_vm10, %v5252_v35, %v9111_v9  ;;  %v9121_v40 = vunpack.i.h.bf16 %v9119_v22  ;;  %v9120_v28 = vunpack.i.l.bf16 %v9119_v22  ;;  %v5037_v56 = vpop.f32.mrf.mxu1 }
 0x8aa   : > { %v9114_v32 = vpop.permute.xlu1 %9113  ;;  %5440 = vmatprep.mubr.f32.mxu1 %v5284_v60 }
 0x8ab   : > { %v9116_v15 = vunpack.i.h.bf16 %v9114_v32  ;;  %v9115_v5 = vunpack.i.l.bf16 %v9114_v32  ;;  %5441 = vmatmul.mubr.f32.gmra.mxu1 %v5260_v51 }
 0x8ad   : > { %v5277_v6 = vsel %vm3934_vm8, %v5269_v24, %v9115_v5  ;;  %v5253_v46 = vsel %vm3934_vm8, %v5245_v58, %v9116_v15  ;;  %v7109_v24 = vld [vmem:[%s11902_s12] ss:$0 sm:$0xff] }
 0x8ae   : > { %v5285_v21 = vsel %vm3968_vm10, %v5277_v6, %v9120_v28  ;;  %v5261_v0 = vsel %vm3968_vm10, %v5253_v46, %v9121_v40  ;;  %v4242_v6 = vadd.s32 8, %v11969_v45 }
 0x8af   : > { %5445 = vmatprep.mubr.f32.mxu1 %v5285_v21 }
 0x8b0   : > { %5446 = vmatmul.mubr.f32.gmra.mxu1 %v5261_v0  ;;  %vm5574_vm13 = vcmp.lt.s32.totalorder %v4242_v6, 9  ;;  %v6096_v6 = vld [vmem:[%s11904_s14 + $0x50] sm:$0xff] }
 0x8b1   : > { %8621 = vmatprep.mubr.msk.f32.mxu1 %vm3900_vm6, %v5007_v17 }
 0x8b4   : > { %8622 = vmatmul.mubr.msk.f32.vlgmr.msra.gmra.mxu1 %vm3900_vm6, %v8603_v16  ;;  %v6097_v16 = vld [vmem:[%s11904_s14 + $0x58] sm:$0xff] }
 0x8b5   : > { %8624 = vmatprep.mubr.msk.f32.mxu1 %vm3900_vm6, %v5017_v41  ;;  %8144 = vmatpush3.msra.mxu0 %v6097_v16  ;;  %v7603_v16 = vunpack.c.h.bf16 %v7768_v8 }
 0x8b8   : > { %8625 = vmatmul.mubr.msk.f32.gmra.mxu1 %vm3900_vm6, %v8606_v59 }
 0x8b9   : > { %8627 = vmatprep.mubr.msk.f32.mxu1 %vm3900_vm6, %v5027_v36 }
 0x8bc   : > { %8628 = vmatmul.mubr.msk.f32.gmra.mxu1 %vm3900_vm6, %v8609_v43 }
 0x8bd   : > { %8630 = vmatprep.mubr.msk.f32.mxu1 %vm3900_vm6, %v5037_v56 }
 0x8c0   : > { %8631 = vmatmul.mubr.msk.f32.gmra.mxu1 %vm3900_vm6, %v8612_v2 }
 0x8c1   : > { %8637 = vmatprep.mubr.msk.f32.mxu1 %vm1776_vm4, %v7590_v18  ;;  %v7766_v18 = vld [vmem:[%s11903_s13 + $0x8] sm:$0xff]  }
 0x8c2   : > { %v7594_v7 = vunpack.c.l.bf16 %v7766_v18  ;;  %v7595_v44 = vunpack.c.h.bf16 %v7766_v18  ;;  %v6092_v18 = vld [vmem:[%s11904_s14 + $0x30] sm:$0xff] }
 0x953   : > { %v8061_v63 = vpop.f32.mrf.mxu1 }
 0x955   : > { %v8062_v34 = vpop.f32.mrf.mxu1 }
 0x956   : > { %v8063_v13 = vadd.f32 %v8062_v34, %v8061_v63  ;;  %v7606_v63 = vunpack.c.l.bf16 %v7769_v38  ;;  %v7770_v34 = vld [vmem:[%s11903_s13 + $0x28] sm:$0xff]  }
 0x957   : > { %v8064_v42 = vpop.f32.mrf.mxu1 }
 0x959   : > { %v8065_v14 = vpop.f32.mrf.mxu1 }
 0x95a   : > { %v8066_v29 = vadd.f32 %v8065_v14, %v8064_v42  ;;  %v7607_v42 = vunpack.c.h.bf16 %v7769_v38  ;;  %v7610_v14 = vunpack.c.l.bf16 %v7770_v34 }
 0x95b   : > { %v8067_v52 = vpop.f32.mrf.mxu1 }
 0x95d   : > { %v8068_v19 = vpop.f32.mrf.mxu1 }
 0x95e   : > { %v8069_v11 = vadd.f32 %v8068_v19, %v8067_v52  ;;  %v7771_v52 = vld [vmem:[%s11903_s13 + $0x30] sm:$0xff]   ;;  %v7611_v19 = vunpack.c.h.bf16 %v7770_v34 }
 0x95f   : > { %v8070_v39 = vpop.f32.mrf.mxu1 }
 0x961   : > { %v8071_v26 = vpop.f32.mrf.mxu1 }
 0x962   : > { %v8072_v48 = vadd.f32 %v8071_v26, %v8070_v39  ;;  %v7614_v39 = vunpack.c.l.bf16 %v7771_v52  ;;  %v7772_v26 = vld [vmem:[%s11903_s13 + $0x38] sm:$0xff]  }
 0x963   : > { %v8073_v57 = vpop.f32.mrf.mxu1 }
 0x965   : > { %v8074_v37 = vpop.f32.mrf.mxu1 }
 0x966   : > { %v8075_v31 = vadd.f32 %v8074_v37, %v8073_v57  ;;  %v7615_v57 = vunpack.c.h.bf16 %v7771_v52  ;;  %v7618_v37 = vunpack.c.l.bf16 %v7772_v26  ;;  %v6088_v52 = vld [vmem:[%s11904_s14 + $0x10] sm:$0xff] }
 0x967   : > { %v8076_v50 = vpop.f32.mrf.mxu1 }
 0x969   : > { %v8077_v12 = vpop.f32.mrf.mxu1 }
 0x96a   : > { %v8078_v59 = vadd.f32 %v8077_v12, %v8076_v50  ;;  %v7773_v50 = vld [vmem:[%s11903_s13 + $0x40] sm:$0xff]   ;;  %v7619_v12 = vunpack.c.h.bf16 %v7772_v26  ;;  %v6087_v26 = vld [vmem:[%s11904_s14 + $0x8] sm:$0xff] }
 0x96b   : > { %v8079_v53 = vpop.f32.mrf.mxu1 }
 0x96d   : > { %v8080_v17 = vpop.f32.mrf.mxu1 }
 0x96e   : > { %v8081_v61 = vadd.f32 %v8080_v17, %v8079_v53  ;;  %v7622_v53 = vunpack.c.l.bf16 %v7773_v50  ;;  %v7774_v17 = vld [vmem:[%s11903_s13 + $0x48] sm:$0xff]  }
 0x970   : > { %v8082_v23 = vpop.f32.mrf.mxu1 }
 0x972   : > { %v8083_v3 = vpop.f32.mrf.mxu1 }
 0x973   : > { %v8084_v9 = vadd.f32 %v8083_v3, %v8082_v23  ;;  %v7623_v23 = vunpack.c.h.bf16 %v7773_v50  ;;  %v7626_v3 = vunpack.c.l.bf16 %v7774_v17  ;;  %v6086_v50 = vld [vmem:[%s11904_s14] sm:$0xff] }
 0x974   : > { %v8623_v55 = vpop.f32.mrf.mxu1 }
 0x975   : > { %v5523_v22 = vadd.f32 %v8623_v55, %v8066_v29  ;;  %v7775_v55 = vld [vmem:[%s11903_s13 + $0x50] sm:$0xff]   ;;  %v7777_v29 = vld [vmem:[%s11903_s13 + $0x60] sm:$0xff]  }
 0x976   : > { %v5517_v25 = vpop.f32.mrf.mxu1 }
 0x977   : > { %v5518_v41 = vadd.f32 %v8063_v13, %v5517_v25  ;;  %v7627_v25 = vunpack.c.h.bf16 %v7774_v17  ;;  %v7779_v13 = vld [vmem:[%s11903_s13 + $0x70] sm:$0xff]  }
 0x978   : > { %v8626_v54 = vpop.f32.mrf.mxu1 }
 0x979   : > { %v5533_v27 = vadd.f32 %v8626_v54, %v8072_v48  ;;  %v7630_v54 = vunpack.c.l.bf16 %v7775_v55 }
 0x97a   : > { %v5527_v30 = vpop.f32.mrf.mxu1 }
 0x97b   : > { %v5528_v60 = vadd.f32 %v8069_v11, %v5527_v30  ;;  %v5557_v5 = vmax.f32 %v5523_v22, %v5533_v27  ;;  %v7776_v30 = vld [vmem:[%s11903_s13 + $0x58] sm:$0xff]   ;;  %v7638_v11 = vunpack.c.l.bf16 %v7777_v29  ;;  %v7647_v22 = vunpack.c.h.bf16 %v7779_v13 }
 0x97c   : > { %v8629_v4 = vpop.f32.mrf.mxu1  ;;  %v7634_v48 = vunpack.c.l.bf16 %v7776_v30 }
 0x97d   : > { %v5543_v51 = vadd.f32 %v8629_v4, %v8078_v59  ;;  %v5556_v46 = vmax.f32 %v5518_v41, %v5528_v60  ;;  %v7631_v4 = vunpack.c.h.bf16 %v7775_v55  ;;  %v7778_v59 = vld [vmem:[%s11903_s13 + $0x68] sm:$0xff]  }
 0x97e   : > { %v5537_v47 = vpop.f32.mrf.mxu1  ;;  %v7642_v27 = vunpack.c.l.bf16 %v7778_v59 }
 0x97f   : > { %v5538_v58 = vadd.f32 %v8075_v31, %v5537_v47  ;;  %v7635_v47 = vunpack.c.h.bf16 %v7776_v30  ;;  %v7643_v31 = vunpack.c.h.bf16 %v7778_v59 }
 0x980   : > { %v8632_v35 = vpop.f32.mrf.mxu1 }
 0x981   : > { %v5553_v32 = vadd.f32 %v8632_v35, %v8084_v9  ;;  %v7639_v9 = vunpack.c.h.bf16 %v7777_v29  ;;  %v7780_v35 = vld [vmem:[%s11903_s13 + $0x78] sm:$0xff]  }
 0x982   : > { %v5547_v15 = vpop.f32.mrf.mxu1  ;;  %v7650_v60 = vunpack.c.l.bf16 %v7780_v35 }
 0x983   : > { %v5559_v40 = vmax.f32 %v5543_v51, %v5553_v32  ;;  %v5548_v28 = vadd.f32 %v8081_v61, %v5547_v15  ;;  %v7646_v61 = vunpack.c.l.bf16 %v7779_v13  ;;  %v7781_v51 = vld [vmem:[%s11903_s13 + $0x80] sm:$0xff]   ;;  %v7651_v32 = vunpack.c.h.bf16 %v7780_v35 }
 0x984   : > { %v7654_v41 = vunpack.c.l.bf16 %v7781_v51  ;;  %v7655_v15 = vunpack.c.h.bf16 %v7781_v51 }
 0x985   : > { %v5561_v21 = vmax.f32 %v5557_v5, %v5559_v40  ;;  %v5558_v0 = vmax.f32 %v5538_v58, %v5548_v28  ;;  %v7782_v5 = vld [vmem:[%s11903_s13 + $0x88] sm:$0xff]   ;;  %v11972_v28 = vmov 0.0  }
 0x986   : > { %v7658_v58 = vunpack.c.l.bf16 %v7782_v5  ;;  %v7659_v40 = vunpack.c.h.bf16 %v7782_v5 }
 0x987   : > { %v5570_v43 = vadd.f32 %v7109_v24, %v5561_v21  ;;  %v5560_v36 = vmax.f32 %v5556_v46, %v5558_v0  ;;  %v6111_v46 = vld [vmem:[%s11904_s14 + $0xc8] sm:$0xff]  ;;  %v6110_v0 = vld [vmem:[%s11904_s14 + $0xc0] sm:$0xff] }
 0x988   : > { %v6095_v21 = vld [vmem:[%s11904_s14 + $0x48] sm:$0xff] }
 0x989   : > { %v5572_v2 = vmax.f32 %v5570_v43, 0.0  ;;  %v5569_v56 = vadd.f32 %v7109_v24, %v5560_v36  ;;  %v6112_v24 = vld [vmem:[%s11904_s14 + $0xd0] sm:$0xff]  ;;  %v6094_v43 = vld [vmem:[%s11904_s14 + $0x40] sm:$0xff]  ;;  %v6109_v36 = vld [vmem:[%s11904_s14 + $0xb8] sm:$0xff] }
 0x98a   : > { %8145 = vmatprep.subr.mxu0 %v6112_v24 }
 0x98b   : > { %8633 = vmatprep.subr.msk.mxu1 %vm5574_vm13, %v5572_v2  ;;  %v5571_v1 = vmax.f32 %v5569_v56, 0.0  ;;  %8146 = vmatpush3.msra.mxu0 %v6096_v6  ;;  %v6108_v56 = vld [vmem:[%s11904_s14 + $0xb0] sm:$0xff] }
 0x98c   : > { %8634 = vmatpush3.msk.msra.mxu1 %vm5574_vm13, %v5572_v2  ;;  %8147 = vmatprep.subr.mxu0 %v6111_v46  ;;  %v6093_v2 = vld [vmem:[%s11904_s14 + $0x38] sm:$0xff] }
 0x98d   : > { %8635 = vmatprep.subr.mxu1 %v5571_v1  ;;  %8148 = vmatpush3.msra.mxu0 %v6095_v21 }
 0x98e   : > { %8636 = vmatpush3.msra.mxu1 %v5571_v1  ;;  %8149 = vmatprep.subr.mxu0 %v6110_v0  ;;  %v6107_v1 = vld [vmem:[%s11904_s14 + $0xa8] sm:$0xff] }
 0x98f   : > { %8638 = vmatmul.mubr.msk.f32.vlgmr.msra.gmra.mxu1 %vm1776_vm4, %v7591_v62  ;;  %8150 = vmatpush3.msra.mxu0 %v6094_v43  ;;  %v6091_v62 = vld [vmem:[%s11904_s14 + $0x28] sm:$0xff] }
 0x990   : > { %8640 = vmatprep.mubr.msk.f32.mxu1 %vm1776_vm4, %v7594_v7  ;;  %8151 = vmatprep.subr.mxu0 %v6109_v36  ;;  %v6106_v7 = vld [vmem:[%s11904_s14 + $0xa0] sm:$0xff] }
 0x991   : > { %8152 = vmatpush3.msra.mxu0 %v6093_v2 }
 0x992   : > { %8153 = vmatprep.subr.mxu0 %v6108_v56  ;;  %v6133_v56 = vld [vmem:[%s11904_s14 + $0x178] sm:$0xff] }
 0x993   : > { %8641 = vmatmul.mubr.msk.f32.gmra.mxu1 %vm1776_vm4, %v7595_v44  ;;  %8154 = vmatpush3.msra.mxu0 %v6092_v18  ;;  %v6105_v44 = vld [vmem:[%s11904_s14 + $0x98] sm:$0xff] }
 0x994   : > { %8643 = vmatprep.mubr.msk.f32.mxu1 %vm1776_vm4, %v7598_v49  ;;  %8155 = vmatprep.subr.mxu0 %v6107_v1  ;;  %v6089_v49 = vld [vmem:[%s11904_s14 + $0x18] sm:$0xff] }
 0x995   : > { %8156 = vmatpush3.msra.mxu0 %v6091_v62  ;;  %v6148_v62 = vld [vmem:[%s11904_s14 + $0x1f0] sm:$0xff] }
 0x996   : > { %8157 = vmatprep.subr.mxu0 %v6106_v7 }
 0x997   : > { %8644 = vmatmul.mubr.msk.f32.gmra.mxu1 %vm1776_vm4, %v7599_v10  ;;  %8158 = vmatpush3.msra.mxu0 %v6090_v20 }
 0x998   : > { %8646 = vmatprep.mubr.msk.f32.mxu1 %vm1776_vm4, %v7602_v33  ;;  %8159 = vmatprep.subr.mxu0 %v6105_v44  ;;  %v6132_v44 = vld [vmem:[%s11904_s14 + $0x170] sm:$0xff] }
 0x999   : > { %8160 = vmatpush3.msra.mxu0 %v6089_v49 }
 0x99b   : > { %8647 = vmatmul.mubr.msk.f32.gmra.mxu1 %vm1776_vm4, %v7603_v16 }
 0x99c   : > { %8649 = vmatprep.mubr.msk.f32.mxu1 %vm1776_vm4, %v7606_v63 }
 0x99f   : > { %8650 = vmatmul.mubr.msk.f32.gmra.mxu1 %vm1776_vm4, %v7607_v42  ;;  %v6104_v42 = vld [vmem:[%s11904_s14 + $0x90] sm:$0xff] }
 0x9a0   : > { %8652 = vmatprep.mubr.msk.f32.mxu1 %vm1776_vm4, %v7610_v14  ;;  %8161 = vmatprep.subr.mxu0 %v6104_v42  ;;  %v6146_v42 = vld [vmem:[%s11904_s14 + $0x1e0] sm:$0xff] }
 0x9a1   : > { %8162 = vmatpush3.msra.mxu0 %v6088_v52 }
 0x9a3   : > { %8653 = vmatmul.mubr.msk.f32.gmra.mxu1 %vm1776_vm4, %v7611_v19  ;;  %v6103_v19 = vld [vmem:[%s11904_s14 + $0x88] sm:$0xff] }
 0x9a4   : > { %8655 = vmatprep.mubr.msk.f32.mxu1 %vm1776_vm4, %v7614_v39  ;;  %8163 = vmatprep.subr.mxu0 %v6103_v19  ;;  %v6130_v19 = vld [vmem:[%s11904_s14 + $0x160] sm:$0xff] }
 0x9a5   : > { %8164 = vmatpush3.msra.mxu0 %v6087_v26 }
 0x9a7   : > { %8656 = vmatmul.mubr.msk.f32.gmra.mxu1 %vm1776_vm4, %v7615_v57  ;;  %v6102_v57 = vld [vmem:[%s11904_s14 + $0x80] sm:$0xff] }
 0x9a8   : > { %8658 = vmatprep.mubr.msk.f32.mxu1 %vm1776_vm4, %v7618_v37  ;;  %8165 = vmatprep.subr.mxu0 %v6102_v57 }
 0x9a9   : > { %8166 = vmatpush3.msra.mxu0 %v6086_v50 }
 0x9ab   : > { %8659 = vmatmul.mubr.msk.f32.gmra.mxu1 %vm1776_vm4, %v7619_v12  ;;  %v6149_v12 = vld [vmem:[%s11904_s14 + $0x1f8] sm:$0xff] }
 0x9ac   : > { %8661 = vmatprep.mubr.msk.f32.mxu1 %vm1776_vm4, %v7622_v53  ;;  %8179 = vmatprep.subr.mxu0 %v6149_v12  ;;  %v6128_v12 = vld [vmem:[%s11904_s14 + $0x150] sm:$0xff] }
 0x9af   : > { %8662 = vmatmul.mubr.msk.f32.gmra.mxu1 %vm1776_vm4, %v7623_v23 }
 0x9b0   : > { %8664 = vmatprep.mubr.msk.f32.mxu1 %vm1776_vm4, %v7626_v3 }
 0x9b3   : > { %8665 = vmatmul.mubr.msk.f32.gmra.mxu1 %vm1776_vm4, %v7627_v25 }
 0x9b4   : > { %8667 = vmatprep.mubr.msk.f32.mxu1 %vm1776_vm4, %v7630_v54 }
 0x9b7   : > { %8668 = vmatmul.mubr.msk.f32.gmra.mxu1 %vm1776_vm4, %v7631_v4 }
 0x9b8   : > { %8670 = vmatprep.mubr.msk.f32.mxu1 %vm1776_vm4, %v7634_v48 }
 0x9bb   : > { %8671 = vmatmul.mubr.msk.f32.gmra.mxu1 %vm1776_vm4, %v7635_v47 }
 0x9bc   : > { %8673 = vmatprep.mubr.msk.f32.mxu1 %vm1776_vm4, %v7638_v11 }
 0x9bf   : > { %8674 = vmatmul.mubr.msk.f32.gmra.mxu1 %vm1776_vm4, %v7639_v9 }
 0x9c0   : > { %8676 = vmatprep.mubr.msk.f32.mxu1 %vm1776_vm4, %v7642_v27 }
 0x9c3   : > { %8677 = vmatmul.mubr.msk.f32.gmra.mxu1 %vm1776_vm4, %v7643_v31 }
 0x9c4   : > { %8679 = vmatprep.mubr.msk.f32.mxu1 %vm1776_vm4, %v7646_v61 }
 0x9c7   : > { %8680 = vmatmul.mubr.msk.f32.gmra.mxu1 %vm1776_vm4, %v7647_v22 }
 0x9c8   : > { %8682 = vmatprep.mubr.msk.f32.mxu1 %vm1776_vm4, %v7650_v60 }
 0x9cb   : > { %8683 = vmatmul.mubr.msk.f32.gmra.mxu1 %vm1776_vm4, %v7651_v32 }
 0x9cc   : > { %8685 = vmatprep.mubr.msk.f32.mxu1 %vm1776_vm4, %v7654_v41 }
 0x9cf   : > { %8686 = vmatmul.mubr.msk.f32.gmra.mxu1 %vm1776_vm4, %v7655_v15 }
 0x9d0   : > { %8688 = vmatprep.mubr.msk.f32.mxu1 %vm1776_vm4, %v7658_v58 }
 0x9d3   : > { %8689 = vmatmul.mubr.msk.f32.gmra.mxu1 %vm1776_vm4, %v7659_v40 }
 0x9d4   : > { %6569 = vmatprep.mubr.f32.mxu1 %v11972_v28 }
 0xa4f   : > { %v11458_v8 = vpop.f32.mrf.mxu1 }
 0xa51   : > { %v11460_v10 = vpop.f32.mrf.mxu1 }
 0xa53   : > { %v11462_v33 = vpop.f32.mrf.mxu1 }
 0xa55   : > { %v11464_v38 = vpop.f32.mrf.mxu1 }
 0xa57   : > { %v8645_v16 = vpop.f32.mrf.mxu1 }
 0xa59   : > { %v5847_v63 = vpop.f32.mrf.mxu1 }
 0xa5b   : > { %v8648_v34 = vpop.f32.mrf.mxu1 }
 0xa5d   : > { %v5857_v14 = vpop.f32.mrf.mxu1 }
 0xa5f   : > { %v11475_v39 = vpop.f32.mrf.mxu1 }
 0xa61   : > { %v5867_v37 = vpop.f32.mrf.mxu1 }
 0xa63   : > { %v11489_v53 = vpop.f32.mrf.mxu1 }
 0xa65   : > { %v11491_v17 = vpop.f32.mrf.mxu1 }
 0xa67   : > { %v8657_v23 = vpop.f32.mrf.mxu1 }
 0xa68   : > { %v9127_v3 = vpack.i.bf16 %v8645_v16, %v8657_v23  ;;  %v6131_v16 = vld [vmem:[%s11904_s14 + $0x168] sm:$0xff] }
 0xa69   : > { %v5887_v55 = vpop.f32.mrf.mxu1 }
 0xa6a   : > { %v9122_v25 = vpack.i.bf16 %v5847_v63, %v5887_v55  ;;  %9128 = vrot.lane.b32.xlu0 %v9127_v3, %s11952_s1  ;;  %v6126_v3 = vld [vmem:[%s11904_s14 + $0x140] sm:$0xff]  ;;  %v6141_v55 = vld [vmem:[%s11904_s14 + $0x1b8] sm:$0xff] }
 0xa6b   : > { %v8660_v54 = vpop.f32.mrf.mxu1 }
 0xa6c   : > { %v9137_v30 = vpack.i.bf16 %v8648_v34, %v8660_v54  ;;  %9123 = vrot.lane.b32.xlu1 %v9122_v25, %s11952_s1  ;;  %v6140_v25 = vld [vmem:[%s11904_s14 + $0x1b0] sm:$0xff] }
 0xa6d   : > { %v5897_v4 = vpop.f32.mrf.mxu1  ;;  %v6124_v54 = vld [vmem:[%s11904_s14 + $0x130] sm:$0xff] }
 0xa6e   : > { %v9132_v48 = vpack.i.bf16 %v5857_v14, %v5897_v4  ;;  %9138 = vrot.lane.b32.xlu0 %v9137_v30, %s11952_s1  ;;  %v6139_v30 = vld [vmem:[%s11904_s14 + $0x1a8] sm:$0xff] }
 0xa6f   : > { %v11496_v29 = vpop.f32.mrf.mxu1  ;;  %v6123_v4 = vld [vmem:[%s11904_s14 + $0x128] sm:$0xff] }
 0xa70   : > { %9133 = vrot.lane.b32.xlu1 %v9132_v48, %s11952_s1  ;;  %v6138_v48 = vld [vmem:[%s11904_s14 + $0x1a0] sm:$0xff] }
 0xa71   : > { %v11499_v47 = vpop.f32.mrf.mxu1 }
 0xa73   : > { %v11501_v11 = vpop.f32.mrf.mxu1 }
 0xa75   : > { %v11503_v59 = vpop.f32.mrf.mxu1 }
 0xa77   : > { %v8669_v9 = vpop.f32.mrf.mxu1 }
 0xa79   : > { %v5927_v27 = vpop.f32.mrf.mxu1 }
 0xa7b   : > { %v8672_v13 = vpop.f32.mrf.mxu1 }
 0xa7d   : > { %v5937_v31 = vpop.f32.mrf.mxu1 }
 0xa7f   : > { %v11505_v61 = vpop.f32.mrf.mxu1 }
 0xa81   : > { %v11507_v35 = vpop.f32.mrf.mxu1 }
 0xa83   : > { %v11509_v22 = vpop.f32.mrf.mxu1 }
 0xa85   : > { %v11511_v60 = vpop.f32.mrf.mxu1 }
 0xa87   : > { %v8681_v51 = vpop.f32.mrf.mxu1 }
 0xa88   : > { %v9147_v32 = vpack.i.bf16 %v8669_v9, %v8681_v51  ;;  %v6122_v9 = vld [vmem:[%s11904_s14 + $0x120] sm:$0xff]  ;;  %v6120_v51 = vld [vmem:[%s11904_s14 + $0x110] sm:$0xff] }
 0xa89   : > { %v5967_v41 = vpop.f32.mrf.mxu1 }
 0xa8a   : > { %v9142_v15 = vpack.i.bf16 %v5927_v27, %v5967_v41  ;;  %9148 = vrot.lane.b32.xlu0 %v9147_v32, %s11952_s1  ;;  %v6137_v27 = vld [vmem:[%s11904_s14 + $0x198] sm:$0xff]  ;;  %v6135_v41 = vld [vmem:[%s11904_s14 + $0x188] sm:$0xff] }
 0xa8b   : > { %v8684_v5 = vpop.f32.mrf.mxu1 }
 0xa8c   : > { %v9157_v58 = vpack.i.bf16 %v8672_v13, %v8684_v5  ;;  %9143 = vrot.lane.b32.xlu1 %v9142_v15, %s11952_s1  ;;  %v6121_v13 = vld [vmem:[%s11904_s14 + $0x118] sm:$0xff]  ;;  %v6119_v15 = vld [vmem:[%s11904_s14 + $0x108] sm:$0xff] }
 0xa8d   : > { %v5977_v40 = vpop.f32.mrf.mxu1 }
 0xa8e   : > { %v9152_v24 = vpack.i.bf16 %v5937_v31, %v5977_v40  ;;  %9158 = vrot.lane.b32.xlu0 %v9157_v58, %s11952_s1  ;;  %v6136_v31 = vld [vmem:[%s11904_s14 + $0x190] sm:$0xff]  ;;  %v6134_v58 = vld [vmem:[%s11904_s14 + $0x180] sm:$0xff] }
 0xa90   : > { %9153 = vrot.lane.b32.xlu1 %v9152_v24, %s11952_s1 }
 0xadc   : > { %v9129_v6 = vpop.permute.xlu0 %9128 }
 0xadd   : > { %v9130_v21 = vunpack.i.l.bf16 %v9129_v6  ;;  %v9131_v18 = vunpack.i.h.bf16 %v9129_v6 }
 0xade   : > { %v9124_v46 = vpop.permute.xlu1 %9123 }
 0xadf   : > { %v9126_v0 = vunpack.i.h.bf16 %v9124_v46  ;;  %v9125_v43 = vunpack.i.l.bf16 %v9124_v46  ;;  %v6075_v20 = vsel %vm3934_vm8, %v11475_v39, %v9130_v21  ;;  %v6071_v34 = vsel %vm3934_vm8, %v11458_v8, %v9131_v18  ;;  %v6145_v8 = vld [vmem:[%s11904_s14 + $0x1d8] sm:$0xff]  ;;  %v6118_v46 = vld [vmem:[%s11904_s14 + $0x100] sm:$0xff] }
 0xae0   : > { %v9139_v49 = vpop.permute.xlu0 %9138  ;;  %v6129_v39 = vld [vmem:[%s11904_s14 + $0x158] sm:$0xff] }
 0xae1   : > { %v6070_v36 = vsel %vm3934_vm8, %v11460_v10, %v9126_v0  ;;  %v6074_v2 = vsel %vm3934_vm8, %v5867_v37, %v9125_v43  ;;  %v6147_v10 = vld [vmem:[%s11904_s14 + $0x1e8] sm:$0xff]  ;;  %v9140_v14 = vunpack.i.l.bf16 %v9139_v49  ;;  %v9141_v26 = vunpack.i.h.bf16 %v9139_v49  ;;  %v6144_v37 = vld [vmem:[%s11904_s14 + $0x1d0] sm:$0xff]  ;;  %v6157_v21 = vld [vmem:[%s11904_s14 + $0x238] sm:$0xff] }
 0xae2   : > { %6234 = vmatprep.mubr.f32.mxu0 %v6074_v2  ;;  %v9134_v1 = vpop.permute.xlu1 %9133 }
 0xae3   : > { %v9135_v7 = vunpack.i.l.bf16 %v9134_v1  ;;  %6235 = vmatmul.mubr.f32.vlgmr.msra.gmra.mxu0 %v6070_v36  ;;  %v9136_v63 = vunpack.i.h.bf16 %v9134_v1  ;;  %v6077_v50 = vsel %vm3934_vm8, %v11489_v53, %v9140_v14  ;;  %v6073_v23 = vsel %vm3934_vm8, %v11462_v33, %v9141_v26  ;;  %v6142_v53 = vld [vmem:[%s11904_s14 + $0x1c0] sm:$0xff]  ;;  %v6125_v33 = vld [vmem:[%s11904_s14 + $0x138] sm:$0xff] }
 0xae4   : > { %6239 = vmatprep.mubr.f32.mxu0 %v6075_v20  ;;  %8180 = vmatpush3.msra.mxu0 %v6133_v56  ;;  %v6156_v56 = vld [vmem:[%s11904_s14 + $0x230] sm:$0xff]  ;;  %v6500_v26 = vld [vmem:[%s11906_s16 + $0x1d8] sm:$0xff] }
 0xae5   : > { %8181 = vmatprep.subr.mxu0 %v6148_v62  ;;  %v6076_v52 = vsel %vm3934_vm8, %v11491_v17, %v9135_v7  ;;  %v6072_v57 = vsel %vm3934_vm8, %v11464_v38, %v9136_v63  ;;  %v6143_v17 = vld [vmem:[%s11904_s14 + $0x1c8] sm:$0xff] }
 0xae6   : > { %8182 = vmatpush3.msra.mxu0 %v6132_v44  ;;  %v6127_v38 = vld [vmem:[%s11904_s14 + $0x148] sm:$0xff]  ;;  %v6154_v44 = vld [vmem:[%s11904_s14 + $0x220] sm:$0xff] }
 0xae7   : > { %6240 = vmatmul.mubr.f32.gmra.mxu0 %v6071_v34  ;;  %8183 = vmatprep.subr.mxu0 %v6147_v10  ;;  %v6153_v10 = vld [vmem:[%s11904_s14 + $0x218] sm:$0xff]  ;;  %v6152_v34 = vld [vmem:[%s11904_s14 + $0x210] sm:$0xff] }
 0xae8   : > { %6244 = vmatprep.mubr.f32.mxu0 %v6076_v52  ;;  %8184 = vmatpush3.msra.mxu0 %v6131_v16  ;;  %v6150_v52 = vld [vmem:[%s11904_s14 + $0x200] sm:$0xff] }
 0xae9   : > { %8185 = vmatprep.subr.mxu0 %v6146_v42  ;;  %v6151_v42 = vld [vmem:[%s11904_s14 + $0x208] sm:$0xff] }
 0xaea   : > { %8186 = vmatpush3.msra.mxu0 %v6130_v19  ;;  %v6504_v19 = vld [vmem:[%s11906_s16 + $0x1f8] sm:$0xff] }
 0xaeb   : > { %6245 = vmatmul.mubr.f32.gmra.mxu0 %v6072_v57  ;;  %8187 = vmatprep.subr.mxu0 %v6145_v8  ;;  %v6501_v8 = vld [vmem:[%s11906_s16 + $0x1e0] sm:$0xff] }
 0xaec   : > { %6249 = vmatprep.mubr.f32.mxu0 %v6077_v50  ;;  %8188 = vmatpush3.msra.mxu0 %v6129_v39  ;;  %v6503_v39 = vld [vmem:[%s11906_s16 + $0x1f0] sm:$0xff]  ;;  %v6497_v57 = vld [vmem:[%s11906_s16 + $0x1c0] sm:$0xff]  ;;  %v6494_v50 = vld [vmem:[%s11906_s16 + $0x1a8] sm:$0xff] }
 0xaed   : > { %8189 = vmatprep.subr.mxu0 %v6144_v37  ;;  %v6499_v37 = vld [vmem:[%s11906_s16 + $0x1d0] sm:$0xff] }
 0xaee   : > { %8190 = vmatpush3.msra.mxu0 %v6128_v12  ;;  %v6496_v12 = vld [vmem:[%s11906_s16 + $0x1b8] sm:$0xff] }
 0xaef   : > { %6250 = vmatmul.mubr.f32.gmra.mxu0 %v6073_v23  ;;  %8191 = vmatprep.subr.mxu0 %v6143_v17  ;;  %v6493_v17 = vld [vmem:[%s11906_s16 + $0x1a0] sm:$0xff]  ;;  %v6490_v23 = vld [vmem:[%s11906_s16 + $0x188] sm:$0xff] }
 0xaf0   : > { %8192 = vmatpush3.msra.mxu0 %v6127_v38  ;;  %v6495_v38 = vld [vmem:[%s11906_s16 + $0x1b0] sm:$0xff] }
 0xaf1   : > { %8193 = vmatprep.subr.mxu0 %v6142_v53  ;;  %v6492_v53 = vld [vmem:[%s11906_s16 + $0x198] sm:$0xff] }
 0xaf2   : > { %8194 = vmatpush3.msra.mxu0 %v6126_v3  ;;  %v6489_v3 = vld [vmem:[%s11906_s16 + $0x180] sm:$0xff] }
 0xaf3   : > { %8195 = vmatprep.subr.mxu0 %v6141_v55  ;;  %v6491_v55 = vld [vmem:[%s11906_s16 + $0x190] sm:$0xff] }
 0xaf4   : > { %8196 = vmatpush3.msra.mxu0 %v6125_v33  ;;  %v6486_v33 = vld [vmem:[%s11906_s16 + $0x168] sm:$0xff] }
 0xaf5   : > { %8197 = vmatprep.subr.mxu0 %v6140_v25  ;;  %v6488_v25 = vld [vmem:[%s11906_s16 + $0x178] sm:$0xff] }
 0xaf6   : > { %8198 = vmatpush3.msra.mxu0 %v6124_v54  ;;  %v6485_v54 = vld [vmem:[%s11906_s16 + $0x160] sm:$0xff] }
 0xaf7   : > { %8199 = vmatprep.subr.mxu0 %v6139_v30  ;;  %v6487_v30 = vld [vmem:[%s11906_s16 + $0x170] sm:$0xff] }
 0xaf8   : > { %8200 = vmatpush3.msra.mxu0 %v6123_v4  ;;  %v6482_v4 = vld [vmem:[%s11906_s16 + $0x148] sm:$0xff] }
 0xaf9   : > { %8201 = vmatprep.subr.mxu0 %v6138_v48  ;;  %v6484_v48 = vld [vmem:[%s11906_s16 + $0x158] sm:$0xff] }
 0xafa   : > { %8202 = vmatpush3.msra.mxu0 %v6122_v9  ;;  %v6481_v9 = vld [vmem:[%s11906_s16 + $0x140] sm:$0xff] }
 0xafb   : > { %8203 = vmatprep.subr.mxu0 %v6137_v27  ;;  %v6483_v27 = vld [vmem:[%s11906_s16 + $0x150] sm:$0xff] }
 0xafc   : > { %8204 = vmatpush3.msra.mxu0 %v6121_v13  ;;  %v9149_v32 = vpop.permute.xlu0 %9148  ;;  %v6478_v13 = vld [vmem:[%s11906_s16 + $0x128] sm:$0xff] }
 0xafd   : > { %8205 = vmatprep.subr.mxu0 %v6136_v31  ;;  %v9150_v40 = vunpack.i.l.bf16 %v9149_v32  ;;  %v9151_v36 = vunpack.i.h.bf16 %v9149_v32  ;;  %v6480_v31 = vld [vmem:[%s11906_s16 + $0x138] sm:$0xff]  ;;  %v6479_v32 = vld [vmem:[%s11906_s16 + $0x130] sm:$0xff] }
 0xafe   : > { %8206 = vmatpush3.msra.mxu0 %v6120_v51  ;;  %v9144_v5 = vpop.permute.xlu1 %9143  ;;  %v6477_v51 = vld [vmem:[%s11906_s16 + $0x120] sm:$0xff] }
 0xaff   : > { %v9146_v24 = vunpack.i.h.bf16 %v9144_v5  ;;  %v9145_v6 = vunpack.i.l.bf16 %v9144_v5  ;;  %8207 = vmatprep.subr.mxu0 %v6135_v41  ;;  %v6083_v1 = vsel %vm3934_vm8, %v11505_v61, %v9150_v40  ;;  %v6079_v20 = vsel %vm3934_vm8, %v11496_v29, %v9151_v36  ;;  %v6474_v41 = vld [vmem:[%s11906_s16 + $0x108] sm:$0xff]  ;;  %v6473_v5 = vld [vmem:[%s11906_s16 + $0x100] sm:$0xff]  ;;  %v6467_v36 = vld [vmem:[%s11906_s16 + $0xd0] sm:$0xff] }
 0xb00   : > { %8208 = vmatpush3.msra.mxu0 %v6119_v15  ;;  %v9159_v62 = vpop.permute.xlu0 %9158  ;;  %v6476_v15 = vld [vmem:[%s11906_s16 + $0x118] sm:$0xff]  ;;  %v6470_v40 = vld [vmem:[%s11906_s16 + $0xe8] sm:$0xff] }
 0xb01   : > { %v6078_v0 = vsel %vm3934_vm8, %v11499_v47, %v9146_v24  ;;  %8209 = vmatprep.subr.mxu0 %v6134_v58  ;;  %v6082_v43 = vsel %vm3934_vm8, %v11507_v35, %v9145_v6  ;;  %v6155_v47 = vld [vmem:[%s11904_s14 + $0x228] sm:$0xff]  ;;  %v8687_v35 = vpop.f32.mrf.mxu1  ;;  %v9160_v49 = vunpack.i.l.bf16 %v9159_v62  ;;  %v9161_v63 = vunpack.i.h.bf16 %v9159_v62  ;;  %v6475_v58 = vld [vmem:[%s11906_s16 + $0x110] sm:$0xff]  ;;  %v6472_v24 = vld [vmem:[%s11906_s16 + $0xf8] sm:$0xff] }
 0xb02   : > { %8210 = vmatpush3.msra.mxu0 %v6118_v46  ;;  %6319 = vmatprep.mubr.f32.mxu0 %v6082_v43  ;;  %v9154_v2 = vpop.permute.xlu1 %9153  ;;  %v6469_v6 = vld [vmem:[%s11906_s16 + $0xe0] sm:$0xff]  ;;  %v6471_v46 = vld [vmem:[%s11906_s16 + $0xf0] sm:$0xff]  ;;  %v6458_v62 = vld [vmem:[%s11906_s16 + $0x88] sm:$0xff] }
 0xb03   : > { %v9155_v18 = vunpack.i.l.bf16 %v9154_v2  ;;  %6320 = vmatmul.mubr.f32.vlgmr.msra.gmra.mxu0 %v6078_v0  ;;  %8691 = vmatprep.subr.mxu0 %v6157_v21  ;;  %v9156_v7 = vunpack.i.h.bf16 %v9154_v2  ;;  %v5987_v16 = vpop.f32.mrf.mxu1  ;;  %v6468_v0 = vld [vmem:[%s11906_s16 + $0xd8] sm:$0xff]  ;;  %v6465_v43 = vld [vmem:[%s11906_s16 + $0xc0] sm:$0xff]  ;;  %v6462_v2 = vld [vmem:[%s11906_s16 + $0xa8] sm:$0xff] }
 0xb04   : > { %6324 = vmatprep.mubr.f32.mxu0 %v6083_v1  ;;  %8692 = vmatpush3.msra.mxu0 %v6157_v21  ;;  %v6466_v21 = vld [vmem:[%s11906_s16 + $0xc8] sm:$0xff]  ;;  %v6463_v1 = vld [vmem:[%s11906_s16 + $0xb0] sm:$0xff] }
 0xb05   : > { %8693 = vmatprep.subr.mxu0 %v6156_v56  ;;  %v6084_v61 = vsel %vm3934_vm8, %v11511_v60, %v9155_v18  ;;  %v6080_v29 = vsel %vm3934_vm8, %v11503_v59, %v9156_v7  ;;  %v6085_v60 = vsel %vm3934_vm8, %v11509_v22, %v9160_v49  ;;  %v8690_v14 = vpop.f32.mrf.mxu1  ;;  %v6081_v59 = vsel %vm3934_vm8, %v11501_v11, %v9161_v63  ;;  %v6502_v11 = vld [vmem:[%s11906_s16 + $0x1e8] sm:$0xff]  ;;  %v6461_v18 = vld [vmem:[%s11906_s16 + $0xa0] sm:$0xff]  ;;  %v6459_v7 = vld [vmem:[%s11906_s16 + $0x90] sm:$0xff] }
 0xb06   : > { %8694 = vmatpush3.msra.mxu0 %v6156_v56  ;;  %6505 = vmatprep.subr.mxu1 %v6502_v11  ;;  %v6464_v56 = vld [vmem:[%s11906_s16 + $0xb8] sm:$0xff]  ;;  %v6453_v49 = vld [vmem:[%s11906_s16 + $0x60] sm:$0xff]  ;;  %v6443_v11 = vld [vmem:[%s11906_s16 + $0x10] sm:$0xff] }
 0xb07   : > { %6325 = vmatmul.mubr.f32.gmra.mxu0 %v6079_v20  ;;  %8695 = vmatprep.subr.mxu0 %v6155_v47  ;;  %v5997_v22 = vpop.f32.mrf.mxu1  ;;  %v6454_v20 = vld [vmem:[%s11906_s16 + $0x68] sm:$0xff]  ;;  %v6449_v63 = vld [vmem:[%s11906_s16 + $0x40] sm:$0xff] }
 0xb08   : > { %6329 = vmatprep.mubr.f32.mxu0 %v6084_v61  ;;  %8696 = vmatpush3.msra.mxu0 %v6155_v47  ;;  %v6460_v47 = vld [vmem:[%s11906_s16 + $0x98] sm:$0xff]  ;;  %v6455_v61 = vld [vmem:[%s11906_s16 + $0x70] sm:$0xff] }
 0xb09   : > { %8697 = vmatprep.subr.mxu0 %v6154_v44  ;;  %6506 = vmatpush1.msra.mxu1 %v6501_v8 }
 0xb0a   : > { %8698 = vmatpush3.msra.mxu0 %v6154_v44  ;;  %v6456_v44 = vld [vmem:[%s11906_s16 + $0x78] sm:$0xff] }
 0xb0b   : > { %6330 = vmatmul.mubr.f32.gmra.mxu0 %v6080_v29  ;;  %8699 = vmatprep.subr.mxu0 %v6153_v10  ;;  %v6451_v29 = vld [vmem:[%s11906_s16 + $0x50] sm:$0xff] }
 0xb0c   : > { %6334 = vmatprep.mubr.f32.mxu0 %v6085_v60  ;;  %8700 = vmatpush3.msra.mxu0 %v6153_v10  ;;  %v6450_v10 = vld [vmem:[%s11906_s16 + $0x48] sm:$0xff]  ;;  %v6448_v60 = vld [vmem:[%s11906_s16 + $0x38] sm:$0xff] }
 0xb0d   : > { %8701 = vmatprep.subr.mxu0 %v6152_v34 }
 0xb0e   : > { %8702 = vmatpush3.msra.mxu0 %v6152_v34  ;;  %v6446_v34 = vld [vmem:[%s11906_s16 + $0x28] sm:$0xff] }
 0xb0f   : > { %6335 = vmatmul.mubr.f32.gmra.mxu0 %v6081_v59  ;;  %8703 = vmatprep.subr.mxu0 %v6151_v42  ;;  %v6442_v59 = vld [vmem:[%s11906_s16 + $0x8] sm:$0xff] }
 0xb10   : > { %8704 = vmatpush3.msra.mxu0 %v6151_v42  ;;  %8707 = vmatprep.mubr.msk.f32.mxu0 %vm3934_vm8, %v5987_v16  ;;  %v6452_v16 = vld [vmem:[%s11906_s16 + $0x58] sm:$0xff]  ;;  %v6445_v42 = vld [vmem:[%s11906_s16 + $0x20] sm:$0xff] }
 0xb11   : > { %8705 = vmatprep.subr.mxu0 %v6150_v52 }
 0xb12   : > { %8706 = vmatpush3.msra.mxu0 %v6150_v52  ;;  %v6444_v52 = vld [vmem:[%s11906_s16 + $0x18] sm:$0xff] }
 0xb13   : > { %8708 = vmatmul.mubr.msk.f32.vlgmr.msra.gmra.mxu0 %vm3934_vm8, %v8687_v35  ;;  %6576 = vmatprep.subr.mxu0 %v6504_v19  ;;  %v6457_v35 = vld [vmem:[%s11906_s16 + $0x80] sm:$0xff] }
 0xb14   : > { %8710 = vmatprep.mubr.msk.f32.mxu0 %vm3934_vm8, %v5997_v22  ;;  %6577 = vmatpush1.msra.mxu0 %v6503_v39  ;;  %v6441_v22 = vld [vmem:[%s11906_s16] sm:$0xff] }
 0xb15   : > { %6578 = vmatprep.subr.mxu0 %v6500_v26 }
 0xb16   : > { %6579 = vmatpush1.msra.mxu0 %v6499_v37 }
 0xb17   : > { %8711 = vmatmul.mubr.msk.f32.gmra.mxu0 %vm3934_vm8, %v8690_v14  ;;  %6580 = vmatprep.subr.mxu0 %v6496_v12  ;;  %v6447_v14 = vld [vmem:[%s11906_s16 + $0x30] sm:$0xff] }
 0xb18   : > { %6640 = vmatprep.mubr.f32.mxu0 %v11972_v28  ;;  %v6498_v28 = vld [vmem:[%s11906_s16 + $0x1c8] sm:$0xff]  ;;  %6581 = vmatpush1.msra.mxu0 %v6495_v38 }
 0xb19   : > { %6507 = vmatprep.subr.mxu1 %v6498_v28  ;;  %6582 = vmatprep.subr.mxu0 %v6492_v53 }
 0xb1a   : > { %6508 = vmatpush1.msra.mxu1 %v6497_v57  ;;  %6583 = vmatpush1.msra.mxu0 %v6491_v55 }
 0xb1b   : > { %6509 = vmatprep.subr.mxu1 %v6494_v50  ;;  %6584 = vmatprep.subr.mxu0 %v6488_v25 }
 0xb1c   : > { %6510 = vmatpush1.msra.mxu1 %v6493_v17  ;;  %6585 = vmatpush1.msra.mxu0 %v6487_v30 }
 0xb1d   : > { %6511 = vmatprep.subr.mxu1 %v6490_v23  ;;  %6586 = vmatprep.subr.mxu0 %v6484_v48 }
 0xb1e   : > { %6512 = vmatpush1.msra.mxu1 %v6489_v3  ;;  %6587 = vmatpush1.msra.mxu0 %v6483_v27 }
 0xb1f   : > { %6513 = vmatprep.subr.mxu1 %v6486_v33  ;;  %6588 = vmatprep.subr.mxu0 %v6480_v31 }
 0xb20   : > { %6514 = vmatpush1.msra.mxu1 %v6485_v54  ;;  %6589 = vmatpush1.msra.mxu0 %v6479_v32 }
 0xb21   : > { %6515 = vmatprep.subr.mxu1 %v6482_v4  ;;  %6590 = vmatprep.subr.mxu0 %v6476_v15 }
 0xb22   : > { %6516 = vmatpush1.msra.mxu1 %v6481_v9  ;;  %6591 = vmatpush1.msra.mxu0 %v6475_v58 }
 0xb23   : > { %6517 = vmatprep.subr.mxu1 %v6478_v13  ;;  %6592 = vmatprep.subr.mxu0 %v6472_v24 }
 0xb24   : > { %6518 = vmatpush1.msra.mxu1 %v6477_v51  ;;  %6593 = vmatpush1.msra.mxu0 %v6471_v46 }
 0xb25   : > { %6519 = vmatprep.subr.mxu1 %v6474_v41  ;;  %6594 = vmatprep.subr.mxu0 %v6468_v0 }
 0xb26   : > { %6520 = vmatpush1.msra.mxu1 %v6473_v5  ;;  %6595 = vmatpush1.msra.mxu0 %v6467_v36  ;;  %v7151_v36 = vld [vmem:[%s11905_s15] ss:$0 sm:$0xff] }
 0xb27   : > { %6521 = vmatprep.subr.mxu1 %v6470_v40  ;;  %6596 = vmatprep.subr.mxu0 %v6464_v56 }
 0xb28   : > { %6522 = vmatpush1.msra.mxu1 %v6469_v6  ;;  %6597 = vmatpush1.msra.mxu0 %v6463_v1  ;;  %v6647_v1 = vld [vmem:[%s11908_s18] sm:$0xff] }
 0xb29   : > { %6523 = vmatprep.subr.mxu1 %v6466_v21  ;;  %6598 = vmatprep.subr.mxu0 %v6460_v47  ;;  %v6651_v47 = vcombine.high %v6647_v1, %v6647_v1 }
 0xb2a   : > { %6524 = vmatpush1.msra.mxu1 %v6465_v43  ;;  %6599 = vmatpush1.msra.mxu0 %v6459_v7 }
 0xb2b   : > { %6525 = vmatprep.subr.mxu1 %v6462_v2  ;;  %6600 = vmatprep.subr.mxu0 %v6456_v44 }
 0xb2c   : > { %6526 = vmatpush1.msra.mxu1 %v6461_v18  ;;  %6601 = vmatpush1.msra.mxu0 %v6455_v61 }
 0xb2d   : > { %6527 = vmatprep.subr.mxu1 %v6458_v62  ;;  %6602 = vmatprep.subr.mxu0 %v6452_v16  ;;  %v6648_v62 = vld [vmem:[%s11908_s18 + $0x8] sm:$0xff] }
 0xb2e   : > { %6528 = vmatpush1.msra.mxu1 %v6457_v35  ;;  %6603 = vmatpush1.msra.mxu0 %v6451_v29  ;;  %v6652_v35 = vcombine.high %v6648_v62, %v6648_v62 }
 0xb2f   : > { %6529 = vmatprep.subr.mxu1 %v6454_v20  ;;  %6604 = vmatprep.subr.mxu0 %v6448_v60 }
 0xb30   : > { %6530 = vmatpush1.msra.mxu1 %v6453_v49  ;;  %6605 = vmatpush1.msra.mxu0 %v6447_v14 }
 0xb31   : > { %6531 = vmatprep.subr.mxu1 %v6450_v10  ;;  %6606 = vmatprep.subr.mxu0 %v6444_v52 }
 0xb32   : > { %6532 = vmatpush1.msra.mxu1 %v6449_v63  ;;  %6607 = vmatpush1.msra.mxu0 %v6443_v11 }
 0xb33   : > { %6533 = vmatprep.subr.mxu1 %v6446_v34 }
 0xb34   : > { %6534 = vmatpush1.msra.mxu1 %v6445_v42 }
 0xb35   : > { %6535 = vmatprep.subr.mxu1 %v6442_v59 }
 0xb36   : > { %6536 = vmatpush1.msra.mxu1 %v6441_v22 }
 0xba3   : > { %v8167_v19 = vpop.f32.mrf.mxu0 }
 0xba5   : > { %v8168_v8 = vpop.f32.mrf.mxu0 }
 0xba6   : > { %v8169_v30 = vadd.f32 %v8168_v8, %v8167_v19 }
 0xba7   : > { %v8170_v39 = vpop.f32.mrf.mxu0 }
 0xba9   : > { %v8171_v28 = vpop.f32.mrf.mxu0 }
 0xbaa   : > { %v8172_v13 = vadd.f32 %v8171_v28, %v8170_v39 }
 0xbab   : > { %v8173_v26 = vpop.f32.mrf.mxu0 }
 0xbad   : > { %v8174_v57 = vpop.f32.mrf.mxu0 }
 0xbae   : > { %v8175_v31 = vadd.f32 %v8174_v57, %v8173_v26 }
 0xbaf   : > { %v8176_v37 = vpop.f32.mrf.mxu0 }
 0xbb1   : > { %v8177_v50 = vpop.f32.mrf.mxu0 }
 0xbb2   : > { %v8178_v51 = vadd.f32 %v8177_v50, %v8176_v37 }
 0xbc3   : > { %v8211_v12 = vpop.f32.mrf.mxu0 }
 0xbc5   : > { %v8212_v17 = vpop.f32.mrf.mxu0 }
 0xbc6   : > { %v8213_v25 = vadd.f32 %v8212_v17, %v8211_v12 }
 0xbc7   : > { %v8214_v38 = vpop.f32.mrf.mxu0 }
 0xbc8   : > { %v6322_v32 = vadd.f32 %v8213_v25, %v8169_v30 }
 0xbc9   : > { %v8215_v23 = vpop.f32.mrf.mxu0 }
 0xbca   : > { %v8216_v4 = vadd.f32 %v8215_v23, %v8214_v38  ;;  %v6687_v23 = vld [vmem:[%s11907_s17] sm:$0x1] }
 0xbcb   : > { %v8217_v53 = vpop.f32.mrf.mxu0 }
 0xbcc   : > { %v6327_v15 = vadd.f32 %v8216_v4, %v8172_v13 }
 0xbcd   : > { %v8218_v3 = vpop.f32.mrf.mxu0 }
 0xbce   : > { %v8219_v48 = vadd.f32 %v8218_v3, %v8217_v53 }
 0xbcf   : > { %v8220_v55 = vpop.f32.mrf.mxu0 }
 0xbd0   : > { %v6332_v40 = vadd.f32 %v8219_v48, %v8175_v31 }
 0xbd1   : > { %v8221_v33 = vpop.f32.mrf.mxu0 }
 0xbd2   : > { %v8222_v9 = vadd.f32 %v8221_v33, %v8220_v55 }
 0xbd3   : > { %v8709_v54 = vpop.f32.mrf.mxu0 }
 0xbd4   : > { %v6337_v58 = vadd.f32 %v8222_v9, %v8178_v51  ;;  %v6412_v6 = vadd.f32 %v8709_v54, %v6327_v15 }
 0xbd5   : > { %v6406_v27 = vpop.f32.mrf.mxu0 }
 0xbd6   : > { %v6407_v5 = vadd.f32 %v6406_v27, %v6322_v32  ;;  %v6692_v27 = vld [vmem:[%s11909_s19] sm:$0x1]  ;;  %v9185_v32 = vmov 0  }
 0xbd7   : > { %v8712_v41 = vpop.f32.mrf.mxu0  ;;  %9162 = vset.pattern.permute.xlu0 %v9185_v32 }
 0xbd8   : > { %v6422_v46 = vadd.f32 %v8712_v41, %v6337_v58  ;;  %v6425_v0 = vmax.f32 %v6407_v5, %v6412_v6  ;;  %v6697_v41 = vld [vmem:[#allocation2] sm:$0x1] }
 0xbd9   : > { %v6416_v24 = vpop.f32.mrf.mxu0 }
 0xbda   : > { %v6417_v21 = vadd.f32 %v6416_v24, %v6332_v40 }
 0xbdc   : > { %v6426_v43 = vmax.f32 %v6417_v21, %v6422_v46 }
 0xbde   : > { %v6427_v2 = vmax.f32 %v6425_v0, %v6426_v43 }
 0xbe0   : > { %v6435_v56 = vadd.f32 %v7151_v36, %v6427_v2 }
 0xbe2   : > { %v6436_v18 = vmax.f32 %v6435_v56, 0.0 }
 0xbe4   : > { %7152 = vmatmul.mubr.msk.f32.vlgmr.msra.gmra.mxu1 %vm6437_vm14, %v6436_v18  ;;  %7153 = vmatmul.mubr.msk.f32.vlgmr.msra.gmra.mxu0 %vm6437_vm14, %v6436_v18 }
 0xca4   : > { %v6571_v7 = vpop.f32.mrf.mxu1  ;;  %v6642_v20 = vpop.f32.mrf.mxu0 }
 0xca5   : > { %v6655_v44 = vmul.f32 %v6647_v1, %v6571_v7  ;;  %v6657_v49 = vmul.f32 %v6648_v62, %v6642_v20 }
 0xca6   : > { %v6573_v61 = vpop.f32.mrf.mxu1  ;;  %v6644_v10 = vpop.f32.mrf.mxu0 }
 0xca7   : > { %v6659_v45 = vsel %vm707_vm1, %v6655_v44, 0.0  ;;  %v6673_v16 = vsel %vm707_vm1, %v6657_v49, 0.0  ;;  %v6656_v63 = vmul.f32 %v6651_v47, %v6573_v61  ;;  %v6658_v29 = vmul.f32 %v6652_v35, %v6644_v10 }
 0xca8   : > { %v6660_v34 = vrot.slane %v6659_v45, 4  ;;  %v6674_v60 = vrot.slane %v6673_v16, 4 }
 0xca9   : > { %v6666_v42 = vsel %vm707_vm1, %v6656_v63, 0.0  ;;  %v6680_v14 = vsel %vm707_vm1, %v6658_v29, 0.0 }
 0xcaa   : > { %v6661_v59 = vadd.f32 %v6660_v34, %v6659_v45  ;;  %v6675_v52 = vadd.f32 %v6674_v60, %v6673_v16  ;;  %v6667_v22 = vrot.slane %v6666_v42, 4  ;;  %v6681_v11 = vrot.slane %v6680_v14, 4 }
 0xcac   : > { %v6662_v19 = vrot.slane %v6661_v59, 2  ;;  %v6676_v8 = vrot.slane %v6675_v52, 2  ;;  %v6668_v39 = vadd.f32 %v6667_v22, %v6666_v42  ;;  %v6682_v28 = vadd.f32 %v6681_v11, %v6680_v14 }
 0xcae   : > { %v6663_v26 = vadd.f32 %v6662_v19, %v6661_v59  ;;  %v6677_v57 = vadd.f32 %v6676_v8, %v6675_v52  ;;  %v6669_v37 = vrot.slane %v6668_v39, 2  ;;  %v6683_v50 = vrot.slane %v6682_v28, 2 }
 0xcb0   : > { %v6664_v12 = vrot.slane %v6663_v26, 1  ;;  %v6670_v17 = vadd.f32 %v6669_v37, %v6668_v39  ;;  %v6684_v38 = vadd.f32 %v6683_v50, %v6682_v28  ;;  %v6678_v3 = vrot.slane %v6677_v57, 1 }
 0xcb2   : > { %v6665_v53 = vadd.f32 %v6664_v12, %v6663_v26  ;;  %v6671_v55 = vrot.slane %v6670_v17, 1  ;;  %v6685_v54 = vrot.slane %v6684_v38, 1  ;;  %v6679_v30 = vadd.f32 %v6678_v3, %v6677_v57 }
 0xcb4   : > { %v6688_v33 = vadd.f32 %v6687_v23, %v6665_v53  ;;  %v6672_v25 = vadd.f32 %v6671_v55, %v6670_v17  ;;  %v6686_v48 = vadd.f32 %v6685_v54, %v6684_v38 }
 0xcb6   : > { %v6689_v4 = vadd.f32 %v6688_v33, %v6672_v25 }
 0xcb8   : > { %v6690_v9 = vadd.f32 %v6689_v4, %v6679_v30 }
 0xcba   : > { %v6691_v13 = vadd.f32 %v6690_v9, %v6686_v48 }
 0xcbc   : > { %v6693_v31 = vmul.f32 %v6692_v27, %v6691_v13 }
 0xcbe   : > { %v6694_v51 = vsel %vm1576_vm2, %v6693_v31, 0.0 }
 0xcbf   : > { %6695 = vadd.xlane.f32.xlu1 %v6694_v51 }
 0xd48   : > { %v6696_v15 = vpop.xlane.xlu1 %6695 }
 0xd49   : > { %v6698_v5 = vadd.f32 %v6697_v41, %v6696_v15 }
 0xd4b   : > { %v6699_v58 = vsub.f32 0.0, %v6698_v5 }
 0xd4d   : > { %v6700_v40 = vmul.f32 1.442695, %v6699_v58 }
 0xd4f   : > { %9165 = vpow2.f32 %v6700_v40 }
 0xd5c   : > { %v9166_v24 = vpop.eup %9165 }
 0xd5d   : > { %v6702_v6 = vadd.f32 1.0, %v9166_v24 }
 0xd5f   : > { %9167 = vrcp.f32 %v6702_v6 }
 0xd6c   : > { %v9168_v46 = vpop.eup %9167 }
 0xd6d   : > { %6707 = vperm.xlu0 %9162, %v9168_v46  }
 0xde8   : > { %v6708_v21 = vpop.permute.xlu0 %6707 }
 0xde9   : > { %6710 = vst [vmem:[%s654_s7] sm:$0x1] %v6708_v21 }
 0xdea PF: > { %s33_s26 = sadd.s32 1, %s9175_s26  }
 0xdeb   : > { %p30_p4 = scmp.ge.s32.totalorder %s33_s26, 10  }
 0xded   :  { %32 = sbr.rel (!%p30_p4) target bundleno = 9 (0x9), region = 139 }

</bundles_post_ra>
